<compile_context>
chip_gen: v6e
topology: v6e:2x2x1
jax: 0.10.0
libtpu: 0.0.40
codegen_flags: <defaults>
</compile_context>

<pallas_src>
import numpy as np
import jax
import jax.numpy as jnp
from jax import lax
from jax.experimental import pallas as pl
from jax.experimental.pallas import tpu as pltpu


# ----------------------------- Pallas kernel --------------------------------
def make_poolsplat_kernel(TB, H, W, nf, nm, g):
    R = TB * H                 # rows of the fold view handled per grid step
    WR = W * R                 # rows of the w-major pixel layout
    cg = nf // g
    Kc = 9 * nf                # real contraction depth of the fused 3x3 conv
    Kp = ((Kc + 127) // 128) * 128
    HIGH = lax.Precision.HIGHEST

    def kernel(xf_ref, sa_ref, ta_ref, w1p_ref, sel_ref, sb2_ref, tb2_ref,
               sc_ref, tc_ref, w2_ref, sd_ref, td_ref, w3_ref, neg_ref,
               same_ref, o_ref):
        # ---- ReLU -> BN(nf), lane-dense fold layout (R, W*nf) ---------------
        xf = xf_ref[...].reshape(R, W * nf)
        x1 = jnp.maximum(xf, 0.0) * sa_ref[...] + ta_ref[...]

        # ---- dy row shifts (sublane rolls) + pad=1 row masks ----------------
        # Row r = b*H + h of the fold.  Masks also kill cross-batch wrap rows.
        hrow = lax.broadcasted_iota(jnp.int32, (R, 1), 0) % H
        up = jnp.where(hrow > 0, jnp.roll(x1, 1, axis=0), 0.0)        # h-1
        dn = jnp.where(hrow < H - 1, jnp.roll(x1, -1, axis=0), 0.0)   # h+1

        # Cast once to bf16 so all assembly shuffles move half the bytes.
        x1b = x1.astype(jnp.bfloat16)
        upb = up.astype(jnp.bfloat16)
        dnb = dn.astype(jnp.bfloat16)

        # Lane-pad by nf on both sides: pad=1 along w done purely in lane space.
        zpad = jnp.zeros((R, nf), jnp.bfloat16)
        P0 = jnp.concatenate([zpad, upb, zpad], axis=1)   # (R, (W+2)*nf), dy=0
        P1 = jnp.concatenate([zpad, x1b, zpad], axis=1)   # dy=1
        P2 = jnp.concatenate([zpad, dnb, zpad], axis=1)   # dy=2

        # ---- w-major im2col: lhs row q = w*R + r, lane t*nf+c, t = dy*3+dx --
        # For output pixel w, the three dx taps of one dy are the 24 contiguous
        # lanes [w*nf, w*nf + 3*nf) of P_dy — full-lane slices, no 4D scratch.
        zkp = jnp.zeros((R, Kp - Kc), jnp.bfloat16) if Kp > Kc else None
        blocks = []
        for w in range(W):
            lo, hi = w * nf, w * nf + 3 * nf
            pieces = [P0[:, lo:hi], P1[:, lo:hi], P2[:, lo:hi]]
            if zkp is not None:
                pieces.append(zkp)
            blocks.append(jnp.concatenate(pieces, axis=1))            # (R, Kp)
        lhs = jnp.concatenate(blocks, axis=0)                         # (WR, Kp)

        # ---- fused grouped 3x3 conv: ONE bf16 MXU pass (K padded to 128) ----
        y = jnp.dot(lhs, w1p_ref[...],
                    preferred_element_type=jnp.float32)               # (WR, nm)

        # ---- MaxPool2d(2): h-pair = sublane roll by 1, w-pair = roll by R ---
        # Only even-h / even-w rows of `blk` are read (via `sel`), so wrapped
        # rows never contaminate the result (requires even H and W).
        t1 = jnp.maximum(y, jnp.roll(y, -1, axis=0))
        blk = jnp.maximum(t1, jnp.roll(t1, -R, axis=0))

        # ---- global sum of the selected 2x2-block maxima on the idle MXU ----
        pooled = jnp.dot(sel_ref[...], blk, precision=HIGH,
                         preferred_element_type=jnp.float32)          # (TB, nm)
        # sb2/tb2 already carry BN(nm), 1/(H2*W2) and the SmartPoolNF scale.
        z = pooled * sb2_ref[...] + tb2_ref[...]

        # ---- ReLU -> BN(nm) -> 1x1 grouped conv (nm -> nm) ------------------
        t = jnp.maximum(z, 0.0) * sc_ref[...] + tc_ref[...]
        y2 = jnp.dot(t, w2_ref[...], precision=HIGH,
                     preferred_element_type=jnp.float32)
        # ---- ReLU -> BN(nm) -> 1x1 grouped conv (nm -> nf) ------------------
        u = jnp.maximum(y2, 0.0) * sd_ref[...] + td_ref[...]
        att = jnp.dot(u, w3_ref[...], precision=HIGH,
                      preferred_element_type=jnp.float32)             # (TB, nf)

        # ---- per-group softmax * (nf/g); hoisted masks, MXU group sum -------
        gmax = jnp.max(att[:, :, None] + neg_ref[...][None, :, :], axis=1)
        e = jnp.exp(att - gmax)
        gsum = jnp.dot(e, same_ref[...], precision=HIGH,
                       preferred_element_type=jnp.float32)            # (TB, nf)
        aw = e * pl.reciprocal(gsum, approx=True) * float(cg)         # (TB, nf)

        # ---- lane-aligned replicate aw -> (TB, W*nf) (log-doubling rolls) ---
        if W > 1 and (W & (W - 1)) == 0:
            awf = jnp.concatenate(
                [aw, jnp.zeros((TB, (W - 1) * nf), jnp.float32)], axis=1)
            s = nf
            while s < W * nf:
                awf = awf + jnp.roll(awf, s, axis=1)
                s *= 2
        else:
            awf = jnp.concatenate([aw] * W, axis=1)                   # fallback

        # ---- epilogue: out = x * attention, full-128-lane store -------------
        o_ref[...] = xf_ref[...] * awf[:, None, :]

    return kernel


# ------------------------------- wrapper -------------------------------------
def _tc_count():
    # Number of TensorCores sharing one Pallas grid (megacore parts only).
    try:
        kind = jax.devices()[0].device_kind.lower()
    except Exception:
        return 1
    return 2 if any(tag in kind for tag in ("v7", "7x", "v4", "v5p")) else 1


def _pick_tb(B, H, W, nf, nm):
    # Per-batch VMEM footprint: in/out blocks (double-buffered) + the big
    # in-kernel values (bf16 im2col lhs, f32 conv output + pooling temps).
    per_b = H * W * nf * 4 * 4 + H * W * nm * (2 + 4 + 4 + 4)
    cap = max(1, (12 * 1024 * 1024) // max(per_b, 1))
    ncores = _tc_count()
    want_steps = 1 if ncores == 1 else (2 * ncores if B >= 2 * ncores else ncores)
    best = 1
    for tb in range(1, B + 1):
        if B % tb or tb > cap:
            continue
        if tb == 1 or B // tb >= want_steps:
            best = tb
    return best


def pool_splat_pallas(x_nchw, P, g):
    x = jnp.transpose(x_nchw, (0, 2, 3, 1)).astype(jnp.float32)   # NCHW -> NHWC
    B, H, W, nf = x.shape
    nm = P["w2m"].shape[0]
    assert H % 2 == 0 and W % 2 == 0, "MaxPool2d(2) path needs even H, W"
    H2, W2 = H // 2, W // 2
    bfac = float(np.sqrt(H2 * W2) / 8.0)                          # SmartPoolNF
    cg = nf // g

    TB = _pick_tb(B, H, W, nf, nm)
    R = TB * H
    x_fold = x.reshape(B, H, W * nf)                              # lane-dense

    # BN(nf) affine tiled to the fold lane layout (lane = w*nf + c).
    sa_f = jnp.tile(P["sa"], (1, W)).astype(jnp.float32)          # (1, W*nf)
    ta_f = jnp.tile(P["ta"], (1, W)).astype(jnp.float32)

    # Fused 3x3 conv weight (rows t*nf+c, t = dy*3+dx), zero-padded K -> 128.
    Kc = 9 * nf
    Kp = ((Kc + 127) // 128) * 128
    w1p = np.zeros((Kp, nm), np.float32)
    w1p[:Kc] = np.asarray(P["w1m"]).reshape(Kc, nm)
    w1p = jnp.asarray(w1p).astype(jnp.bfloat16)

    # 0/1 selection matrix: picks even-h / even-w rows of the w-major layout
    # (q = w*R + b*H + h) per local batch — the pooling reduce runs on the MXU.
    q = np.arange(W * R)
    wq, rq = q // R, q % R
    bq, hq = rq // H, rq % H
    sel = ((wq % 2 == 0) & (hq % 2 == 0))[None, :] & \
          (bq[None, :] == np.arange(TB)[:, None])
    sel = jnp.asarray(sel.astype(np.float32))                     # (TB, W*R)

    # Fold avg-pool (1/(H2*W2)) and the SmartPoolNF scale into BN(nm).
    sb2 = (P["sb"] * (bfac / (H2 * W2))).astype(jnp.float32)
    tb2 = (P["tb"] * bfac).astype(jnp.float32)

    # Hoisted softmax group masks.
    gid = np.arange(nf) // cg
    same_np = (gid[:, None] == gid[None, :]).astype(np.float32)
    same = jnp.asarray(same_np)
    neg = jnp.asarray(np.where(same_np > 0, 0.0, -1e30).astype(np.float32))

    params = [sa_f, ta_f, w1p, sel, sb2, tb2, P["sc"], P["tc"], P["w2m"],
              P["sd"], P["td"], P["w3m"], neg, same]

    def const_spec(a):
        return pl.BlockSpec(a.shape, lambda b, _nd=a.ndim: (0,) * _nd)

    out_fold = pl.pallas_call(
        make_poolsplat_kernel(TB, H, W, nf, nm, g),
        out_shape=jax.ShapeDtypeStruct((B, H, W * nf), jnp.float32),
        grid_spec=pltpu.PrefetchScalarGridSpec(
            num_scalar_prefetch=0,
            grid=(B // TB,),
            in_specs=[pl.BlockSpec((TB, H, W * nf), lambda b: (b, 0, 0))]
                     + [const_spec(a) for a in params],
            out_specs=pl.BlockSpec((TB, H, W * nf), lambda b: (b, 0, 0))),
        compiler_params=pltpu.CompilerParams(
            # NOTE: pltpu.CORE_PARALLEL on the batch axis is a further option
            # for v7x-class parts; plain "parallel" is kept for portability.
            dimension_semantics=("parallel",),
            vmem_limit_bytes=32 * 1024 * 1024),
    )(x_fold, *params)

    out = out_fold.reshape(B, H, W, nf)
    return jnp.transpose(out, (0, 3, 1, 2))                       # back to NCHW


# -------------------------- deterministic params -----------------------------
def make_params(key, nf, g, bottle=None):
    if bottle is None:
        bottle = max(nf // 2, 32)
    nm = bottle * g
    ks = jax.random.split(key, 8)

    def kaiming(k, shape, fan_in):
        return (jax.random.normal(k, shape, jnp.float32)
                * np.sqrt(2.0 / fan_in)).astype(jnp.float32)

    w1 = kaiming(ks[0], (nm, nf // g, 3, 3), (nf // g) * 9)   # torch OIHW layout
    w2 = kaiming(ks[1], (nm, nm // g, 1, 1), nm // g)
    w3 = kaiming(ks[2], (nf, nm // g, 1, 1), nm // g)

    def bn_fold(k, c):
        # TODO(synk): BatchNorm2d is folded in eval mode (running stats); the
        # training-mode batch-statistics path is not implemented in the kernel.
        k1, k2, k3, k4 = jax.random.split(k, 4)
        w = 1.0 + 0.1 * jax.random.normal(k1, (c,))
        b = 0.1 * jax.random.normal(k2, (c,))
        rm = 0.1 * jax.random.normal(k3, (c,))
        rv = 1.0 + 0.1 * jnp.abs(jax.random.normal(k4, (c,)))
        s = w / jnp.sqrt(rv + 1e-5)
        t = b - rm * s
        return (s.reshape(1, c).astype(jnp.float32),
                t.reshape(1, c).astype(jnp.float32))

    sa, ta = bn_fold(ks[3], nf)
    sb, tb = bn_fold(ks[4], nm)
    sc, tc = bn_fold(ks[5], nm)
    sd, td = bn_fold(ks[6], nm)

    # Block-diagonal matmul forms of the grouped convs (channels-last layout).
    cig, cog = nf // g, nm // g
    w1m = np.zeros((9, nf, nm), np.float32)
    w1n = np.asarray(w1)
    for gi in range(g):
        for kh in range(3):
            for kw in range(3):
                w1m[kh * 3 + kw,
                    gi * cig:(gi + 1) * cig,
                    gi * cog:(gi + 1) * cog] = w1n[gi * cog:(gi + 1) * cog, :, kh, kw].T

    def blockdiag_1x1(w, ci, co):
        cig_, cog_ = ci // g, co // g
        m = np.zeros((ci, co), np.float32)
        wn = np.asarray(w)[:, :, 0, 0]
        for gi in range(g):
            m[gi * cig_:(gi + 1) * cig_,
              gi * cog_:(gi + 1) * cog_] = wn[gi * cog_:(gi + 1) * cog_, :].T
        return m

    return dict(w1=w1, w2=w2, w3=w3,
                w1m=jnp.asarray(w1m),
                w2m=jnp.asarray(blockdiag_1x1(w2, nm, nm)),
                w3m=jnp.asarray(blockdiag_1x1(w3, nm, nf)),
                sa=sa, ta=ta, sb=sb, tb=tb, sc=sc, tc=tc, sd=sd, td=td)


# ------------------------ pure-JAX reference (for check) ---------------------
def reference(x_nchw, P, g):
    x = jnp.transpose(x_nchw, (0, 2, 3, 1)).astype(jnp.float32)
    B, H, W, nf = x.shape
    HIGH = lax.Precision.HIGHEST
    x1 = jnp.maximum(x, 0.0) * P["sa"] + P["ta"]
    k1 = jnp.transpose(P["w1"], (2, 3, 1, 0))                 # HWIO
    y = lax.conv_general_dilated(x1, k1, (1, 1), ((1, 1), (1, 1)),
                                 dimension_numbers=("NHWC", "HWIO", "NHWC"),
                                 feature_group_count=g, precision=HIGH)
    m = lax.reduce_window(y, -jnp.inf, lax.max, (1, 2, 2, 1), (1, 2, 2, 1), "VALID")
    m = m * P["sb"] + P["tb"]
    H2, W2 = H // 2, W // 2
    p = jnp.mean(m, axis=(1, 2), keepdims=True) * (np.sqrt(H2 * W2) / 8.0)
    t = jnp.maximum(p, 0.0) * P["sc"] + P["tc"]
    k2 = jnp.transpose(P["w2"], (2, 3, 1, 0))
    y2 = lax.conv_general_dilated(t, k2, (1, 1), "VALID",
                                  dimension_numbers=("NHWC", "HWIO", "NHWC"),
                                  feature_group_count=g, precision=HIGH)
    u = jnp.maximum(y2, 0.0) * P["sd"] + P["td"]
    k3 = jnp.transpose(P["w3"], (2, 3, 1, 0))
    att = lax.conv_general_dilated(u, k3, (1, 1), "VALID",
                                   dimension_numbers=("NHWC", "HWIO", "NHWC"),
                                   feature_group_count=g, precision=HIGH)
    a = jax.nn.softmax(att.reshape(B, g, nf // g), axis=2)
    a = a.reshape(B, 1, 1, nf) * (nf / g)
    return jnp.transpose(x * a, (0, 3, 1, 2))


# ---------------------------------- main --------------------------------------
if __name__ == "__main__":
    nf, g = 8, 4                  # PoolSplat(nf=8, g=4) -> bottle=32, nm=128
    B, H, W = 2, 16, 16
    key = jax.random.PRNGKey(0)
    kx, kp = jax.random.split(key)
    x = jax.random.normal(kx, (B, nf, H, W), jnp.float32)     # NCHW, like PyTorch

    P = make_params(kp, nf, g)
    out = pool_splat_pallas(x, P, g)
    out = jax.block_until_ready(out)

    ref = jax.block_until_ready(reference(x, P, g))
    np.testing.assert_allclose(np.asarray(out), np.asarray(ref), rtol=2e-2, atol=2e-2)
    assert out.shape == x.shape and out.dtype == jnp.float32
    print("KERNEL_OK")
</pallas_src>

<mosaic_0001>
module attributes {stable_mosaic.version = 11 : i64} {
  func.func @kernel(%arg0: i32, %arg1: memref<2x16x128xf32, #tpu.memory_space<vmem>>, %arg2: memref<1x128xf32, #tpu.memory_space<vmem>>, %arg3: memref<1x128xf32, #tpu.memory_space<vmem>>, %arg4: memref<128x128xbf16, #tpu.memory_space<vmem>>, %arg5: memref<2x512xf32, #tpu.memory_space<vmem>>, %arg6: memref<1x128xf32, #tpu.memory_space<vmem>>, %arg7: memref<1x128xf32, #tpu.memory_space<vmem>>, %arg8: memref<1x128xf32, #tpu.memory_space<vmem>>, %arg9: memref<1x128xf32, #tpu.memory_space<vmem>>, %arg10: memref<128x128xf32, #tpu.memory_space<vmem>>, %arg11: memref<1x128xf32, #tpu.memory_space<vmem>>, %arg12: memref<1x128xf32, #tpu.memory_space<vmem>>, %arg13: memref<128x8xf32, #tpu.memory_space<vmem>>, %arg14: memref<8x8xf32, #tpu.memory_space<vmem>>, %arg15: memref<8x8xf32, #tpu.memory_space<vmem>>, %arg16: memref<2x16x128xf32, #tpu.memory_space<vmem>>) attributes {dimension_semantics = [#tpu.dimension_semantics<parallel>], iteration_bounds = array<i64: 1>, scalar_prefetch = 0 : i64, scratch_operands = 0 : i64, tpu.core_type = #tpu.core_type<tc>, window_params = [{transform_indices = @transform_0, window_bounds = array<i64: 2, 16, 128>}, {pipeline_mode = #tpu.pipeline_mode<synchronous>, transform_indices = @transform_1, window_bounds = array<i64: 1, 128>}, {pipeline_mode = #tpu.pipeline_mode<synchronous>, transform_indices = @transform_2, window_bounds = array<i64: 1, 128>}, {pipeline_mode = #tpu.pipeline_mode<synchronous>, transform_indices = @transform_3, window_bounds = array<i64: 128, 128>}, {pipeline_mode = #tpu.pipeline_mode<synchronous>, transform_indices = @transform_4, window_bounds = array<i64: 2, 512>}, {pipeline_mode = #tpu.pipeline_mode<synchronous>, transform_indices = @transform_5, window_bounds = array<i64: 1, 128>}, {pipeline_mode = #tpu.pipeline_mode<synchronous>, transform_indices = @transform_6, window_bounds = array<i64: 1, 128>}, {pipeline_mode = #tpu.pipeline_mode<synchronous>, transform_indices = @transform_7, window_bounds = array<i64: 1, 128>}, {pipeline_mode = #tpu.pipeline_mode<synchronous>, transform_indices = @transform_8, window_bounds = array<i64: 1, 128>}, {pipeline_mode = #tpu.pipeline_mode<synchronous>, transform_indices = @transform_9, window_bounds = array<i64: 128, 128>}, {pipeline_mode = #tpu.pipeline_mode<synchronous>, transform_indices = @transform_10, window_bounds = array<i64: 1, 128>}, {pipeline_mode = #tpu.pipeline_mode<synchronous>, transform_indices = @transform_11, window_bounds = array<i64: 1, 128>}, {pipeline_mode = #tpu.pipeline_mode<synchronous>, transform_indices = @transform_12, window_bounds = array<i64: 128, 8>}, {pipeline_mode = #tpu.pipeline_mode<synchronous>, transform_indices = @transform_13, window_bounds = array<i64: 8, 8>}, {pipeline_mode = #tpu.pipeline_mode<synchronous>, transform_indices = @transform_14, window_bounds = array<i64: 8, 8>}, {transform_indices = @transform_15, window_bounds = array<i64: 2, 16, 128>}]} {
    %c0 = arith.constant 0 : index
    %c0_0 = arith.constant 0 : index
    %c0_1 = arith.constant 0 : index
    %0 = vector.load %arg1[%c0, %c0_0, %c0_1] : memref<2x16x128xf32, #tpu.memory_space<vmem>>, vector<2x16x128xf32>
    %1 = vector.shape_cast %0 : vector<2x16x128xf32> to vector<32x128xf32>
    %cst = arith.constant 0.000000e+00 : f32
    %2 = vector.broadcast %cst : f32 to vector<32x128xf32>
    %3 = arith.maximumf %1, %2 : vector<32x128xf32>
    %c0_2 = arith.constant 0 : index
    %c0_3 = arith.constant 0 : index
    %4 = vector.load %arg2[%c0_2, %c0_3] : memref<1x128xf32, #tpu.memory_space<vmem>>, vector<1x128xf32>
    %5 = vector.broadcast %4 : vector<1x128xf32> to vector<32x128xf32>
    %6 = arith.mulf %3, %5 : vector<32x128xf32>
    %c0_4 = arith.constant 0 : index
    %c0_5 = arith.constant 0 : index
    %7 = vector.load %arg3[%c0_4, %c0_5] : memref<1x128xf32, #tpu.memory_space<vmem>>, vector<1x128xf32>
    %8 = vector.broadcast %7 : vector<1x128xf32> to vector<32x128xf32>
    %9 = arith.addf %6, %8 : vector<32x128xf32>
    %10 = tpu.iota {dimensions = array<i32: 0>} : vector<32x1xi32>
    %c16_i32 = arith.constant 16 : i32
    %c0_i32 = arith.constant 0 : i32
    %11 = arith.cmpi eq, %c16_i32, %c0_i32 : i32
    %c1_i32 = arith.constant 1 : i32
    %12 = arith.select %11, %c1_i32, %c16_i32 : i32
    %13 = vector.broadcast %12 : i32 to vector<32x1xi32>
    %14 = arith.remsi %10, %13 : vector<32x1xi32>
    %c0_i32_6 = arith.constant 0 : i32
    %15 = vector.broadcast %c0_i32_6 : i32 to vector<32x1xi32>
    %16 = arith.cmpi ne, %14, %15 : vector<32x1xi32>
    %c0_i32_7 = arith.constant 0 : i32
    %17 = vector.broadcast %c0_i32_7 : i32 to vector<32x1xi32>
    %18 = arith.cmpi slt, %14, %17 : vector<32x1xi32>
    %c0_i32_8 = arith.constant 0 : i32
    %19 = arith.cmpi slt, %12, %c0_i32_8 : i32
    %20 = vector.broadcast %19 : i1 to vector<32x1xi1>
    %21 = vector.broadcast %20 : vector<32x1xi1> to vector<32x1xi1>
    %22 = arith.xori %18, %21 : vector<32x1xi1>
    %23 = arith.andi %22, %16 : vector<32x1xi1>
    %24 = vector.broadcast %12 : i32 to vector<32x1xi32>
    %25 = arith.addi %14, %24 : vector<32x1xi32>
    %26 = arith.select %23, %25, %14 : vector<32x1xi1>, vector<32x1xi32>
    %c0_i32_9 = arith.constant 0 : i32
    %27 = vector.broadcast %c0_i32_9 : i32 to vector<32x1xi32>
    %28 = arith.cmpi sgt, %26, %27 : vector<32x1xi32>
    %29 = vector.extract_strided_slice %9 {offsets = [31, 0], sizes = [1, 128], strides = [1, 1]} : vector<32x128xf32> to vector<1x128xf32>
    %30 = vector.extract_strided_slice %9 {offsets = [0, 0], sizes = [31, 128], strides = [1, 1]} : vector<32x128xf32> to vector<31x128xf32>
    %31 = tpu.concatenate %29, %30 in 0 : vector<1x128xf32>, vector<31x128xf32> -> vector<32x128xf32>
    %cst_10 = arith.constant 0.000000e+00 : f32
    %32 = vector.shape_cast %28 : vector<32x1xi1> to vector<32x1xi1>
    %33 = vector.broadcast %32 : vector<32x1xi1> to vector<32x128xi1>
    %34 = vector.broadcast %cst_10 : f32 to vector<32x128xf32>
    %35 = arith.select %33, %31, %34 : vector<32x128xi1>, vector<32x128xf32>
    %c15_i32 = arith.constant 15 : i32
    %36 = vector.broadcast %c15_i32 : i32 to vector<32x1xi32>
    %37 = arith.cmpi slt, %26, %36 : vector<32x1xi32>
    %38 = vector.extract_strided_slice %9 {offsets = [1, 0], sizes = [31, 128], strides = [1, 1]} : vector<32x128xf32> to vector<31x128xf32>
    %39 = vector.extract_strided_slice %9 {offsets = [0, 0], sizes = [1, 128], strides = [1, 1]} : vector<32x128xf32> to vector<1x128xf32>
    %40 = tpu.concatenate %38, %39 in 0 : vector<31x128xf32>, vector<1x128xf32> -> vector<32x128xf32>
    %cst_11 = arith.constant 0.000000e+00 : f32
    %41 = vector.shape_cast %37 : vector<32x1xi1> to vector<32x1xi1>
    %42 = vector.broadcast %41 : vector<32x1xi1> to vector<32x128xi1>
    %43 = vector.broadcast %cst_11 : f32 to vector<32x128xf32>
    %44 = arith.select %42, %40, %43 : vector<32x128xi1>, vector<32x128xf32>
    %45 = arith.truncf %9 : vector<32x128xf32> to vector<32x128xbf16>
    %46 = arith.truncf %35 : vector<32x128xf32> to vector<32x128xbf16>
    %47 = arith.truncf %44 : vector<32x128xf32> to vector<32x128xbf16>
    %cst_12 = arith.constant 0.000000e+00 : bf16
    %48 = vector.broadcast %cst_12 : bf16 to vector<32x8xbf16>
    %49 = tpu.concatenate %48, %46, %48 in 1 : vector<32x8xbf16>, vector<32x128xbf16>, vector<32x8xbf16> -> vector<32x144xbf16>
    %50 = tpu.concatenate %48, %45, %48 in 1 : vector<32x8xbf16>, vector<32x128xbf16>, vector<32x8xbf16> -> vector<32x144xbf16>
    %51 = tpu.concatenate %48, %47, %48 in 1 : vector<32x8xbf16>, vector<32x128xbf16>, vector<32x8xbf16> -> vector<32x144xbf16>
    %cst_13 = arith.constant 0.000000e+00 : bf16
    %52 = vector.broadcast %cst_13 : bf16 to vector<32x56xbf16>
    %53 = vector.extract_strided_slice %49 {offsets = [0, 0], sizes = [32, 24], strides = [1, 1]} : vector<32x144xbf16> to vector<32x24xbf16>
    %54 = vector.extract_strided_slice %50 {offsets = [0, 0], sizes = [32, 24], strides = [1, 1]} : vector<32x144xbf16> to vector<32x24xbf16>
    %55 = vector.extract_strided_slice %51 {offsets = [0, 0], sizes = [32, 24], strides = [1, 1]} : vector<32x144xbf16> to vector<32x24xbf16>
    %56 = tpu.concatenate %53, %54, %55, %52 in 1 : vector<32x24xbf16>, vector<32x24xbf16>, vector<32x24xbf16>, vector<32x56xbf16> -> vector<32x128xbf16>
    %57 = vector.extract_strided_slice %49 {offsets = [0, 8], sizes = [32, 24], strides = [1, 1]} : vector<32x144xbf16> to vector<32x24xbf16>
    %58 = vector.extract_strided_slice %50 {offsets = [0, 8], sizes = [32, 24], strides = [1, 1]} : vector<32x144xbf16> to vector<32x24xbf16>
    %59 = vector.extract_strided_slice %51 {offsets = [0, 8], sizes = [32, 24], strides = [1, 1]} : vector<32x144xbf16> to vector<32x24xbf16>
    %60 = tpu.concatenate %57, %58, %59, %52 in 1 : vector<32x24xbf16>, vector<32x24xbf16>, vector<32x24xbf16>, vector<32x56xbf16> -> vector<32x128xbf16>
    %61 = vector.extract_strided_slice %49 {offsets = [0, 16], sizes = [32, 24], strides = [1, 1]} : vector<32x144xbf16> to vector<32x24xbf16>
    %62 = vector.extract_strided_slice %50 {offsets = [0, 16], sizes = [32, 24], strides = [1, 1]} : vector<32x144xbf16> to vector<32x24xbf16>
    %63 = vector.extract_strided_slice %51 {offsets = [0, 16], sizes = [32, 24], strides = [1, 1]} : vector<32x144xbf16> to vector<32x24xbf16>
    %64 = tpu.concatenate %61, %62, %63, %52 in 1 : vector<32x24xbf16>, vector<32x24xbf16>, vector<32x24xbf16>, vector<32x56xbf16> -> vector<32x128xbf16>
    %65 = vector.extract_strided_slice %49 {offsets = [0, 24], sizes = [32, 24], strides = [1, 1]} : vector<32x144xbf16> to vector<32x24xbf16>
    %66 = vector.extract_strided_slice %50 {offsets = [0, 24], sizes = [32, 24], strides = [1, 1]} : vector<32x144xbf16> to vector<32x24xbf16>
    %67 = vector.extract_strided_slice %51 {offsets = [0, 24], sizes = [32, 24], strides = [1, 1]} : vector<32x144xbf16> to vector<32x24xbf16>
    %68 = tpu.concatenate %65, %66, %67, %52 in 1 : vector<32x24xbf16>, vector<32x24xbf16>, vector<32x24xbf16>, vector<32x56xbf16> -> vector<32x128xbf16>
    %69 = vector.extract_strided_slice %49 {offsets = [0, 32], sizes = [32, 24], strides = [1, 1]} : vector<32x144xbf16> to vector<32x24xbf16>
    %70 = vector.extract_strided_slice %50 {offsets = [0, 32], sizes = [32, 24], strides = [1, 1]} : vector<32x144xbf16> to vector<32x24xbf16>
    %71 = vector.extract_strided_slice %51 {offsets = [0, 32], sizes = [32, 24], strides = [1, 1]} : vector<32x144xbf16> to vector<32x24xbf16>
    %72 = tpu.concatenate %69, %70, %71, %52 in 1 : vector<32x24xbf16>, vector<32x24xbf16>, vector<32x24xbf16>, vector<32x56xbf16> -> vector<32x128xbf16>
    %73 = vector.extract_strided_slice %49 {offsets = [0, 40], sizes = [32, 24], strides = [1, 1]} : vector<32x144xbf16> to vector<32x24xbf16>
    %74 = vector.extract_strided_slice %50 {offsets = [0, 40], sizes = [32, 24], strides = [1, 1]} : vector<32x144xbf16> to vector<32x24xbf16>
    %75 = vector.extract_strided_slice %51 {offsets = [0, 40], sizes = [32, 24], strides = [1, 1]} : vector<32x144xbf16> to vector<32x24xbf16>
    %76 = tpu.concatenate %73, %74, %75, %52 in 1 : vector<32x24xbf16>, vector<32x24xbf16>, vector<32x24xbf16>, vector<32x56xbf16> -> vector<32x128xbf16>
    %77 = vector.extract_strided_slice %49 {offsets = [0, 48], sizes = [32, 24], strides = [1, 1]} : vector<32x144xbf16> to vector<32x24xbf16>
    %78 = vector.extract_strided_slice %50 {offsets = [0, 48], sizes = [32, 24], strides = [1, 1]} : vector<32x144xbf16> to vector<32x24xbf16>
    %79 = vector.extract_strided_slice %51 {offsets = [0, 48], sizes = [32, 24], strides = [1, 1]} : vector<32x144xbf16> to vector<32x24xbf16>
    %80 = tpu.concatenate %77, %78, %79, %52 in 1 : vector<32x24xbf16>, vector<32x24xbf16>, vector<32x24xbf16>, vector<32x56xbf16> -> vector<32x128xbf16>
    %81 = vector.extract_strided_slice %49 {offsets = [0, 56], sizes = [32, 24], strides = [1, 1]} : vector<32x144xbf16> to vector<32x24xbf16>
    %82 = vector.extract_strided_slice %50 {offsets = [0, 56], sizes = [32, 24], strides = [1, 1]} : vector<32x144xbf16> to vector<32x24xbf16>
    %83 = vector.extract_strided_slice %51 {offsets = [0, 56], sizes = [32, 24], strides = [1, 1]} : vector<32x144xbf16> to vector<32x24xbf16>
    %84 = tpu.concatenate %81, %82, %83, %52 in 1 : vector<32x24xbf16>, vector<32x24xbf16>, vector<32x24xbf16>, vector<32x56xbf16> -> vector<32x128xbf16>
    %85 = vector.extract_strided_slice %49 {offsets = [0, 64], sizes = [32, 24], strides = [1, 1]} : vector<32x144xbf16> to vector<32x24xbf16>
    %86 = vector.extract_strided_slice %50 {offsets = [0, 64], sizes = [32, 24], strides = [1, 1]} : vector<32x144xbf16> to vector<32x24xbf16>
    %87 = vector.extract_strided_slice %51 {offsets = [0, 64], sizes = [32, 24], strides = [1, 1]} : vector<32x144xbf16> to vector<32x24xbf16>
    %88 = tpu.concatenate %85, %86, %87, %52 in 1 : vector<32x24xbf16>, vector<32x24xbf16>, vector<32x24xbf16>, vector<32x56xbf16> -> vector<32x128xbf16>
    %89 = vector.extract_strided_slice %49 {offsets = [0, 72], sizes = [32, 24], strides = [1, 1]} : vector<32x144xbf16> to vector<32x24xbf16>
    %90 = vector.extract_strided_slice %50 {offsets = [0, 72], sizes = [32, 24], strides = [1, 1]} : vector<32x144xbf16> to vector<32x24xbf16>
    %91 = vector.extract_strided_slice %51 {offsets = [0, 72], sizes = [32, 24], strides = [1, 1]} : vector<32x144xbf16> to vector<32x24xbf16>
    %92 = tpu.concatenate %89, %90, %91, %52 in 1 : vector<32x24xbf16>, vector<32x24xbf16>, vector<32x24xbf16>, vector<32x56xbf16> -> vector<32x128xbf16>
    %93 = vector.extract_strided_slice %49 {offsets = [0, 80], sizes = [32, 24], strides = [1, 1]} : vector<32x144xbf16> to vector<32x24xbf16>
    %94 = vector.extract_strided_slice %50 {offsets = [0, 80], sizes = [32, 24], strides = [1, 1]} : vector<32x144xbf16> to vector<32x24xbf16>
    %95 = vector.extract_strided_slice %51 {offsets = [0, 80], sizes = [32, 24], strides = [1, 1]} : vector<32x144xbf16> to vector<32x24xbf16>
    %96 = tpu.concatenate %93, %94, %95, %52 in 1 : vector<32x24xbf16>, vector<32x24xbf16>, vector<32x24xbf16>, vector<32x56xbf16> -> vector<32x128xbf16>
    %97 = vector.extract_strided_slice %49 {offsets = [0, 88], sizes = [32, 24], strides = [1, 1]} : vector<32x144xbf16> to vector<32x24xbf16>
    %98 = vector.extract_strided_slice %50 {offsets = [0, 88], sizes = [32, 24], strides = [1, 1]} : vector<32x144xbf16> to vector<32x24xbf16>
    %99 = vector.extract_strided_slice %51 {offsets = [0, 88], sizes = [32, 24], strides = [1, 1]} : vector<32x144xbf16> to vector<32x24xbf16>
    %100 = tpu.concatenate %97, %98, %99, %52 in 1 : vector<32x24xbf16>, vector<32x24xbf16>, vector<32x24xbf16>, vector<32x56xbf16> -> vector<32x128xbf16>
    %101 = vector.extract_strided_slice %49 {offsets = [0, 96], sizes = [32, 24], strides = [1, 1]} : vector<32x144xbf16> to vector<32x24xbf16>
    %102 = vector.extract_strided_slice %50 {offsets = [0, 96], sizes = [32, 24], strides = [1, 1]} : vector<32x144xbf16> to vector<32x24xbf16>
    %103 = vector.extract_strided_slice %51 {offsets = [0, 96], sizes = [32, 24], strides = [1, 1]} : vector<32x144xbf16> to vector<32x24xbf16>
    %104 = tpu.concatenate %101, %102, %103, %52 in 1 : vector<32x24xbf16>, vector<32x24xbf16>, vector<32x24xbf16>, vector<32x56xbf16> -> vector<32x128xbf16>
    %105 = vector.extract_strided_slice %49 {offsets = [0, 104], sizes = [32, 24], strides = [1, 1]} : vector<32x144xbf16> to vector<32x24xbf16>
    %106 = vector.extract_strided_slice %50 {offsets = [0, 104], sizes = [32, 24], strides = [1, 1]} : vector<32x144xbf16> to vector<32x24xbf16>
    %107 = vector.extract_strided_slice %51 {offsets = [0, 104], sizes = [32, 24], strides = [1, 1]} : vector<32x144xbf16> to vector<32x24xbf16>
    %108 = tpu.concatenate %105, %106, %107, %52 in 1 : vector<32x24xbf16>, vector<32x24xbf16>, vector<32x24xbf16>, vector<32x56xbf16> -> vector<32x128xbf16>
    %109 = vector.extract_strided_slice %49 {offsets = [0, 112], sizes = [32, 24], strides = [1, 1]} : vector<32x144xbf16> to vector<32x24xbf16>
    %110 = vector.extract_strided_slice %50 {offsets = [0, 112], sizes = [32, 24], strides = [1, 1]} : vector<32x144xbf16> to vector<32x24xbf16>
    %111 = vector.extract_strided_slice %51 {offsets = [0, 112], sizes = [32, 24], strides = [1, 1]} : vector<32x144xbf16> to vector<32x24xbf16>
    %112 = tpu.concatenate %109, %110, %111, %52 in 1 : vector<32x24xbf16>, vector<32x24xbf16>, vector<32x24xbf16>, vector<32x56xbf16> -> vector<32x128xbf16>
    %113 = vector.extract_strided_slice %49 {offsets = [0, 120], sizes = [32, 24], strides = [1, 1]} : vector<32x144xbf16> to vector<32x24xbf16>
    %114 = vector.extract_strided_slice %50 {offsets = [0, 120], sizes = [32, 24], strides = [1, 1]} : vector<32x144xbf16> to vector<32x24xbf16>
    %115 = vector.extract_strided_slice %51 {offsets = [0, 120], sizes = [32, 24], strides = [1, 1]} : vector<32x144xbf16> to vector<32x24xbf16>
    %116 = tpu.concatenate %113, %114, %115, %52 in 1 : vector<32x24xbf16>, vector<32x24xbf16>, vector<32x24xbf16>, vector<32x56xbf16> -> vector<32x128xbf16>
    %117 = tpu.concatenate %56, %60, %64, %68, %72, %76, %80, %84, %88, %92, %96, %100, %104, %108, %112, %116 in 0 : vector<32x128xbf16>, vector<32x128xbf16>, vector<32x128xbf16>, vector<32x128xbf16>, vector<32x128xbf16>, vector<32x128xbf16>, vector<32x128xbf16>, vector<32x128xbf16>, vector<32x128xbf16>, vector<32x128xbf16>, vector<32x128xbf16>, vector<32x128xbf16>, vector<32x128xbf16>, vector<32x128xbf16>, vector<32x128xbf16>, vector<32x128xbf16> -> vector<512x128xbf16>
    %c0_14 = arith.constant 0 : index
    %c0_15 = arith.constant 0 : index
    %118 = vector.load %arg4[%c0_14, %c0_15] : memref<128x128xbf16, #tpu.memory_space<vmem>>, vector<128x128xbf16>
    %cst_16 = arith.constant dense<0.000000e+00> : vector<512x128xf32>
    %119 = tpu.matmul %117, %118, %cst_16 {dimension_numbers = #tpu.dot_dimension_numbers<[1], [0], [0], [1], [0, 0, 1, 1], [], []>} : vector<512x128xbf16>, vector<128x128xbf16>, vector<512x128xf32> -> vector<512x128xf32>
    %120 = vector.extract_strided_slice %119 {offsets = [1, 0], sizes = [511, 128], strides = [1, 1]} : vector<512x128xf32> to vector<511x128xf32>
    %121 = vector.extract_strided_slice %119 {offsets = [0, 0], sizes = [1, 128], strides = [1, 1]} : vector<512x128xf32> to vector<1x128xf32>
    %122 = tpu.concatenate %120, %121 in 0 : vector<511x128xf32>, vector<1x128xf32> -> vector<512x128xf32>
    %123 = arith.maximumf %119, %122 : vector<512x128xf32>
    %124 = vector.extract_strided_slice %123 {offsets = [32, 0], sizes = [480, 128], strides = [1, 1]} : vector<512x128xf32> to vector<480x128xf32>
    %125 = vector.extract_strided_slice %123 {offsets = [0, 0], sizes = [32, 128], strides = [1, 1]} : vector<512x128xf32> to vector<32x128xf32>
    %126 = tpu.concatenate %124, %125 in 0 : vector<480x128xf32>, vector<32x128xf32> -> vector<512x128xf32>
    %127 = arith.maximumf %123, %126 : vector<512x128xf32>
    %c0_17 = arith.constant 0 : index
    %c0_18 = arith.constant 0 : index
    %128 = vector.load %arg5[%c0_17, %c0_18] : memref<2x512xf32, #tpu.memory_space<vmem>>, vector<2x512xf32>
    %cst_19 = arith.constant dense<0.000000e+00> : vector<2x128xf32>
    %129 = tpu.matmul %128, %127, %cst_19 {dimension_numbers = #tpu.dot_dimension_numbers<[1], [0], [0], [1], [0, 0, 1, 1], [], []>, precision = #tpu.contract_precision<fp32>} : vector<2x512xf32>, vector<512x128xf32>, vector<2x128xf32> -> vector<2x128xf32>
    %c0_20 = arith.constant 0 : index
    %c0_21 = arith.constant 0 : index
    %130 = vector.load %arg6[%c0_20, %c0_21] : memref<1x128xf32, #tpu.memory_space<vmem>>, vector<1x128xf32>
    %131 = vector.broadcast %130 : vector<1x128xf32> to vector<2x128xf32>
    %132 = arith.mulf %129, %131 : vector<2x128xf32>
    %c0_22 = arith.constant 0 : index
    %c0_23 = arith.constant 0 : index
    %133 = vector.load %arg7[%c0_22, %c0_23] : memref<1x128xf32, #tpu.memory_space<vmem>>, vector<1x128xf32>
    %134 = vector.broadcast %133 : vector<1x128xf32> to vector<2x128xf32>
    %135 = arith.addf %132, %134 : vector<2x128xf32>
    %cst_24 = arith.constant 0.000000e+00 : f32
    %136 = vector.broadcast %cst_24 : f32 to vector<2x128xf32>
    %137 = arith.maximumf %135, %136 : vector<2x128xf32>
    %c0_25 = arith.constant 0 : index
    %c0_26 = arith.constant 0 : index
    %138 = vector.load %arg8[%c0_25, %c0_26] : memref<1x128xf32, #tpu.memory_space<vmem>>, vector<1x128xf32>
    %139 = vector.broadcast %138 : vector<1x128xf32> to vector<2x128xf32>
    %140 = arith.mulf %137, %139 : vector<2x128xf32>
    %c0_27 = arith.constant 0 : index
    %c0_28 = arith.constant 0 : index
    %141 = vector.load %arg9[%c0_27, %c0_28] : memref<1x128xf32, #tpu.memory_space<vmem>>, vector<1x128xf32>
    %142 = vector.broadcast %141 : vector<1x128xf32> to vector<2x128xf32>
    %143 = arith.addf %140, %142 : vector<2x128xf32>
    %c0_29 = arith.constant 0 : index
    %c0_30 = arith.constant 0 : index
    %144 = vector.load %arg10[%c0_29, %c0_30] : memref<128x128xf32, #tpu.memory_space<vmem>>, vector<128x128xf32>
    %cst_31 = arith.constant dense<0.000000e+00> : vector<2x128xf32>
    %145 = tpu.matmul %143, %144, %cst_31 {dimension_numbers = #tpu.dot_dimension_numbers<[1], [0], [0], [1], [0, 0, 1, 1], [], []>, precision = #tpu.contract_precision<fp32>} : vector<2x128xf32>, vector<128x128xf32>, vector<2x128xf32> -> vector<2x128xf32>
    %cst_32 = arith.constant 0.000000e+00 : f32
    %146 = vector.broadcast %cst_32 : f32 to vector<2x128xf32>
    %147 = arith.maximumf %145, %146 : vector<2x128xf32>
    %c0_33 = arith.constant 0 : index
    %c0_34 = arith.constant 0 : index
    %148 = vector.load %arg11[%c0_33, %c0_34] : memref<1x128xf32, #tpu.memory_space<vmem>>, vector<1x128xf32>
    %149 = vector.broadcast %148 : vector<1x128xf32> to vector<2x128xf32>
    %150 = arith.mulf %147, %149 : vector<2x128xf32>
    %c0_35 = arith.constant 0 : index
    %c0_36 = arith.constant 0 : index
    %151 = vector.load %arg12[%c0_35, %c0_36] : memref<1x128xf32, #tpu.memory_space<vmem>>, vector<1x128xf32>
    %152 = vector.broadcast %151 : vector<1x128xf32> to vector<2x128xf32>
    %153 = arith.addf %150, %152 : vector<2x128xf32>
    %c0_37 = arith.constant 0 : index
    %c0_38 = arith.constant 0 : index
    %154 = vector.load %arg13[%c0_37, %c0_38] : memref<128x8xf32, #tpu.memory_space<vmem>>, vector<128x8xf32>
    %cst_39 = arith.constant dense<0.000000e+00> : vector<2x8xf32>
    %155 = tpu.matmul %153, %154, %cst_39 {dimension_numbers = #tpu.dot_dimension_numbers<[1], [0], [0], [1], [0, 0, 1, 1], [], []>, precision = #tpu.contract_precision<fp32>} : vector<2x128xf32>, vector<128x8xf32>, vector<2x8xf32> -> vector<2x8xf32>
    %156 = vector.shape_cast %155 : vector<2x8xf32> to vector<2x8x1xf32>
    %c0_40 = arith.constant 0 : index
    %c0_41 = arith.constant 0 : index
    %157 = vector.load %arg14[%c0_40, %c0_41] : memref<8x8xf32, #tpu.memory_space<vmem>>, vector<8x8xf32>
    %158 = vector.shape_cast %157 : vector<8x8xf32> to vector<1x8x8xf32>
    %159 = vector.broadcast %156 : vector<2x8x1xf32> to vector<2x8x8xf32>
    %160 = vector.broadcast %158 : vector<1x8x8xf32> to vector<2x8x8xf32>
    %161 = arith.addf %159, %160 : vector<2x8x8xf32>
    %cst_42 = arith.constant dense<0xFF800000> : vector<2x8xf32>
    %162 = vector.multi_reduction <maximumf>, %161, %cst_42 [1] : vector<2x8x8xf32> to vector<2x8xf32>
    %163 = arith.subf %155, %162 : vector<2x8xf32>
    %164 = math.exp %163 : vector<2x8xf32>
    %c0_43 = arith.constant 0 : index
    %c0_44 = arith.constant 0 : index
    %165 = vector.load %arg15[%c0_43, %c0_44] : memref<8x8xf32, #tpu.memory_space<vmem>>, vector<8x8xf32>
    %cst_45 = arith.constant dense<0.000000e+00> : vector<2x8xf32>
    %166 = tpu.matmul %164, %165, %cst_45 {dimension_numbers = #tpu.dot_dimension_numbers<[1], [0], [0], [1], [0, 0, 1, 1], [], []>, precision = #tpu.contract_precision<fp32>} : vector<2x8xf32>, vector<8x8xf32>, vector<2x8xf32> -> vector<2x8xf32>
    %167 = tpu.reciprocal %166 {approx = true} : vector<2x8xf32> -> vector<2x8xf32>
    %168 = arith.mulf %164, %167 : vector<2x8xf32>
    %cst_46 = arith.constant 2.000000e+00 : f32
    %169 = vector.broadcast %cst_46 : f32 to vector<2x8xf32>
    %170 = arith.mulf %168, %169 : vector<2x8xf32>
    %cst_47 = arith.constant 0.000000e+00 : f32
    %171 = vector.broadcast %cst_47 : f32 to vector<2x120xf32>
    %172 = tpu.concatenate %170, %171 in 1 : vector<2x8xf32>, vector<2x120xf32> -> vector<2x128xf32>
    %173 = vector.extract_strided_slice %172 {offsets = [0, 120], sizes = [2, 8], strides = [1, 1]} : vector<2x128xf32> to vector<2x8xf32>
    %174 = vector.extract_strided_slice %172 {offsets = [0, 0], sizes = [2, 120], strides = [1, 1]} : vector<2x128xf32> to vector<2x120xf32>
    %175 = tpu.concatenate %173, %174 in 1 : vector<2x8xf32>, vector<2x120xf32> -> vector<2x128xf32>
    %176 = arith.addf %172, %175 : vector<2x128xf32>
    %177 = vector.extract_strided_slice %176 {offsets = [0, 112], sizes = [2, 16], strides = [1, 1]} : vector<2x128xf32> to vector<2x16xf32>
    %178 = vector.extract_strided_slice %176 {offsets = [0, 0], sizes = [2, 112], strides = [1, 1]} : vector<2x128xf32> to vector<2x112xf32>
    %179 = tpu.concatenate %177, %178 in 1 : vector<2x16xf32>, vector<2x112xf32> -> vector<2x128xf32>
    %180 = arith.addf %176, %179 : vector<2x128xf32>
    %181 = vector.extract_strided_slice %180 {offsets = [0, 96], sizes = [2, 32], strides = [1, 1]} : vector<2x128xf32> to vector<2x32xf32>
    %182 = vector.extract_strided_slice %180 {offsets = [0, 0], sizes = [2, 96], strides = [1, 1]} : vector<2x128xf32> to vector<2x96xf32>
    %183 = tpu.concatenate %181, %182 in 1 : vector<2x32xf32>, vector<2x96xf32> -> vector<2x128xf32>
    %184 = arith.addf %180, %183 : vector<2x128xf32>
    %185 = vector.extract_strided_slice %184 {offsets = [0, 64], sizes = [2, 64], strides = [1, 1]} : vector<2x128xf32> to vector<2x64xf32>
    %186 = vector.extract_strided_slice %184 {offsets = [0, 0], sizes = [2, 64], strides = [1, 1]} : vector<2x128xf32> to vector<2x64xf32>
    %187 = tpu.concatenate %185, %186 in 1 : vector<2x64xf32>, vector<2x64xf32> -> vector<2x128xf32>
    %188 = arith.addf %184, %187 : vector<2x128xf32>
    %c0_48 = arith.constant 0 : index
    %c0_49 = arith.constant 0 : index
    %c0_50 = arith.constant 0 : index
    %189 = vector.load %arg1[%c0_48, %c0_49, %c0_50] : memref<2x16x128xf32, #tpu.memory_space<vmem>>, vector<2x16x128xf32>
    %190 = vector.shape_cast %188 : vector<2x128xf32> to vector<2x1x128xf32>
    %191 = vector.broadcast %190 : vector<2x1x128xf32> to vector<2x16x128xf32>
    %192 = arith.mulf %189, %191 : vector<2x16x128xf32>
    %c0_51 = arith.constant 0 : index
    %c0_52 = arith.constant 0 : index
    %c0_53 = arith.constant 0 : index
    %193 = vector.load %arg16[%c0_51, %c0_52, %c0_53] : memref<2x16x128xf32, #tpu.memory_space<vmem>>, vector<2x16x128xf32>
    tpu.vector_store %arg16[%c0_51, %c0_52, %c0_53], %192 {strides = array<i32>} : memref<2x16x128xf32, #tpu.memory_space<vmem>>, vector<2x16x128xf32>,
    return
  }
  func.func @transform_0(%arg0: i32) -> (i32, i32, i32) {
    %c0_i32 = arith.constant 0 : i32
    %c0_i32_0 = arith.constant 0 : i32
    %c0_i32_1 = arith.constant 0 : i32
    return %arg0, %c0_i32, %c0_i32_0 : i32, i32, i32
  }
  func.func @transform_1(%arg0: i32) -> (i32, i32) {
    %c0_i32 = arith.constant 0 : i32
    %c0_i32_0 = arith.constant 0 : i32
    %c0_i32_1 = arith.constant 0 : i32
    return %c0_i32, %c0_i32_0 : i32, i32
  }
  func.func @transform_2(%arg0: i32) -> (i32, i32) {
    %c0_i32 = arith.constant 0 : i32
    %c0_i32_0 = arith.constant 0 : i32
    %c0_i32_1 = arith.constant 0 : i32
    return %c0_i32, %c0_i32_0 : i32, i32
  }
  func.func @transform_3(%arg0: i32) -> (i32, i32) {
    %c0_i32 = arith.constant 0 : i32
    %c0_i32_0 = arith.constant 0 : i32
    %c0_i32_1 = arith.constant 0 : i32
    return %c0_i32, %c0_i32_0 : i32, i32
  }
  func.func @transform_4(%arg0: i32) -> (i32, i32) {
    %c0_i32 = arith.constant 0 : i32
    %c0_i32_0 = arith.constant 0 : i32
    %c0_i32_1 = arith.constant 0 : i32
    return %c0_i32, %c0_i32_0 : i32, i32
  }
  func.func @transform_5(%arg0: i32) -> (i32, i32) {
    %c0_i32 = arith.constant 0 : i32
    %c0_i32_0 = arith.constant 0 : i32
    %c0_i32_1 = arith.constant 0 : i32
    return %c0_i32, %c0_i32_0 : i32, i32
  }
  func.func @transform_6(%arg0: i32) -> (i32, i32) {
    %c0_i32 = arith.constant 0 : i32
    %c0_i32_0 = arith.constant 0 : i32
    %c0_i32_1 = arith.constant 0 : i32
    return %c0_i32, %c0_i32_0 : i32, i32
  }
  func.func @transform_7(%arg0: i32) -> (i32, i32) {
    %c0_i32 = arith.constant 0 : i32
    %c0_i32_0 = arith.constant 0 : i32
    %c0_i32_1 = arith.constant 0 : i32
    return %c0_i32, %c0_i32_0 : i32, i32
  }
  func.func @transform_8(%arg0: i32) -> (i32, i32) {
    %c0_i32 = arith.constant 0 : i32
    %c0_i32_0 = arith.constant 0 : i32
    %c0_i32_1 = arith.constant 0 : i32
    return %c0_i32, %c0_i32_0 : i32, i32
  }
  func.func @transform_9(%arg0: i32) -> (i32, i32) {
    %c0_i32 = arith.constant 0 : i32
    %c0_i32_0 = arith.constant 0 : i32
    %c0_i32_1 = arith.constant 0 : i32
    return %c0_i32, %c0_i32_0 : i32, i32
  }
  func.func @transform_10(%arg0: i32) -> (i32, i32) {
    %c0_i32 = arith.constant 0 : i32
    %c0_i32_0 = arith.constant 0 : i32
    %c0_i32_1 = arith.constant 0 : i32
    return %c0_i32, %c0_i32_0 : i32, i32
  }
  func.func @transform_11(%arg0: i32) -> (i32, i32) {
    %c0_i32 = arith.constant 0 : i32
    %c0_i32_0 = arith.constant 0 : i32
    %c0_i32_1 = arith.constant 0 : i32
    return %c0_i32, %c0_i32_0 : i32, i32
  }
  func.func @transform_12(%arg0: i32) -> (i32, i32) {
    %c0_i32 = arith.constant 0 : i32
    %c0_i32_0 = arith.constant 0 : i32
    %c0_i32_1 = arith.constant 0 : i32
    return %c0_i32, %c0_i32_0 : i32, i32
  }
  func.func @transform_13(%arg0: i32) -> (i32, i32) {
    %c0_i32 = arith.constant 0 : i32
    %c0_i32_0 = arith.constant 0 : i32
    %c0_i32_1 = arith.constant 0 : i32
    return %c0_i32, %c0_i32_0 : i32, i32
  }
  func.func @transform_14(%arg0: i32) -> (i32, i32) {
    %c0_i32 = arith.constant 0 : i32
    %c0_i32_0 = arith.constant 0 : i32
    %c0_i32_1 = arith.constant 0 : i32
    return %c0_i32, %c0_i32_0 : i32, i32
  }
  func.func @transform_15(%arg0: i32) -> (i32, i32, i32) {
    %c0_i32 = arith.constant 0 : i32
    %c0_i32_0 = arith.constant 0 : i32
    %c0_i32_1 = arith.constant 0 : i32
    return %arg0, %c0_i32, %c0_i32_0 : i32, i32, i32
  }
}

</mosaic_0001>

<bundles_post_ra>
// kernel: tpu_custom_call.1
= control target key start
LH: loop header
LB: loop body
LE: loop exit
PB: predicated region body
PF: predicated region fallthrough
CT: control target
= control target key end

     0   :  { %20 = vsyncpa [#allocation3], 0  ;;  %s9683_s0 = inlined_call_operand.hbm [shape: f32[2,16,128], index: 0, kind: input, shape index: {}]   ;;  %s9684_s1 = inlined_call_operand.vmem [shape: f32[1,128], index: 1, kind: input, shape index: {}]   ;;  %s9685_s2 = inlined_call_operand.hbm [shape: f32[1,128], index: 2, kind: input, shape index: {}]   ;;  %s9686_s3 = inlined_call_operand.hbm [shape: bf16[128,128], index: 3, kind: input, shape index: {}]   ;;  %s9687_s4 = inlined_call_operand.vmem [shape: f32[2,512], index: 4, kind: input, shape index: {}]   ;;  %s9688_s5 = inlined_call_operand.hbm [shape: f32[1,128], index: 5, kind: input, shape index: {}]   ;;  %s9689_s6 = inlined_call_operand.hbm [shape: f32[1,128], index: 6, kind: input, shape index: {}]   ;;  %s9690_s7 = inlined_call_operand.hbm [shape: f32[1,128], index: 7, kind: input, shape index: {}]   ;;  %s9691_s8 = inlined_call_operand.hbm [shape: f32[1,128], index: 8, kind: input, shape index: {}]   ;;  %s9692_s9 = inlined_call_operand.vmem [shape: f32[128,128], index: 9, kind: input, shape index: {}]   ;;  %s9693_s10 = inlined_call_operand.hbm [shape: f32[1,128], index: 10, kind: input, shape index: {}]   ;;  %s9694_s11 = inlined_call_operand.hbm [shape: f32[1,128], index: 11, kind: input, shape index: {}]   ;;  %s9695_s12 = inlined_call_operand.vmem [shape: f32[128,8], index: 12, kind: input, shape index: {}]   ;;  %s9696_s13 = inlined_call_operand.vmem [shape: f32[8,8], index: 13, kind: input, shape index: {}]   ;;  %s9697_s14 = inlined_call_operand.vmem [shape: f32[8,8], index: 14, kind: input, shape index: {}]   ;;  %s9698_s15 = inlined_call_operand.hbm [shape: f32[2,16,128], index: 15, kind: output, shape index: {}]  }
   0x1   :  { %21 = vsyncpa [#allocation6], 0 }
   0x2   :  { %22 = vsyncpa [#allocation9], 0 }
   0x3   :  { %23 = vsyncpa [#allocation12], 0 }
   0x4   :  { %24 = vsyncpa [#allocation15], 0 }
   0x5   :  { %25 = vsyncpa [#allocation4], 0  ;;  %s6744_s18 = smov [#allocation5]   ;;  %s6745_s20 = smov [#allocation8]  }
   0x6   :  { %s46_s19 = sshll.u32 %s6744_s18, 4  ;;  %s70_s21 = sshll.u32 %s6745_s20, 4  ;;  %s47_s19 = int_to_ptr.vmem [resolvable:$true] %s46_s19  ;;  %s71_s21 = int_to_ptr.vmem [resolvable:$true] %s70_s21 }
   0x7   :  { %s6540_s22 = scalar_lea.vmem %s47_s19, 16  ;;  %s6544_s23 = scalar_lea.vmem %s47_s19, 32 }
   0x8   :  { %p6541_p0 = scmp.ne.s32.totalorder %s47_s19, %s6540_s22  ;;  %p6545_p1 = scmp.lt.s32.totalorder %s47_s19, %s47_s19 }
   0x9   :  { %p6546_p2 = scmp.lt.s32.totalorder %s6544_s23, %s6540_s22 }
   0xb   :  { %p6547_p3 = por %p6546_p2, %p6545_p1 }
   0xd   :  { %p6548_p4 = pnand %p6547_p3, %p6541_p0 }
   0xf   :  { %6551 = shalt.err (!%p6548_p4)
}
  0x10   :  { %49 = dma.hbm_to_vmem [thread:$0]  %s9685_s2, 16, %s47_s19, [#allocation6]  }
  0x11   :  { %s6560_s26 = scalar_lea.vmem %s71_s21, 16  ;;  %s6564_s27 = scalar_lea.vmem %s71_s21, 32 }
  0x12   :  { %p6561_p5 = scmp.ne.s32.totalorder %s71_s21, %s6560_s26  ;;  %p6565_p6 = scmp.lt.s32.totalorder %s71_s21, %s71_s21 }
  0x13   :  { %p6566_p7 = scmp.lt.s32.totalorder %s6564_s27, %s6560_s26 }
  0x15   :  { %p6567_p8 = por %p6566_p7, %p6565_p6 }
  0x17   :  { %p6568_p9 = pnand %p6567_p8, %p6561_p5 }
  0x19   :  { %6571 = shalt.err (!%p6568_p9)
}
  0x1a   :  { %73 = dma.hbm_to_vmem [thread:$0]  %s9688_s5, 16, %s71_s21, [#allocation9]  }
  0x1b   :  { %s6746_s30 = smov [#allocation11]   ;;  %s6747_s17 = smov [#allocation14]  }
  0x1c   :  { %s90_s16 = sshll.u32 %s6746_s30, 4  ;;  %s112_s18 = sshll.u32 %s6747_s17, 4  ;;  %s91_s16 = int_to_ptr.vmem [resolvable:$true] %s90_s16  ;;  %s113_s18 = int_to_ptr.vmem [resolvable:$true] %s112_s18 }
  0x1d   :  { %s6580_s20 = scalar_lea.vmem %s91_s16, 16  ;;  %s6584_s2 = scalar_lea.vmem %s91_s16, 32 }
  0x1e   :  { %p6581_p10 = scmp.ne.s32.totalorder %s91_s16, %s6580_s20  ;;  %p6585_p11 = scmp.lt.s32.totalorder %s91_s16, %s91_s16 }
  0x1f   :  { %p6586_p12 = scmp.lt.s32.totalorder %s6584_s2, %s6580_s20 }
  0x21   :  { %p6587_p13 = por %p6586_p12, %p6585_p11 }
  0x23   :  { %p6588_p0 = pnand %p6587_p13, %p6581_p10 }
  0x25   :  { %6591 = shalt.err (!%p6588_p0)
}
  0x26   :  { %93 = dma.hbm_to_vmem [thread:$0]  %s9690_s7, 16, %s91_s16, [#allocation12]  }
  0x27   :  { %s6600_s23 = scalar_lea.vmem %s113_s18, 16  ;;  %s6604_s5 = scalar_lea.vmem %s113_s18, 32 }
  0x28   :  { %p6601_p1 = scmp.ne.s32.totalorder %s113_s18, %s6600_s23  ;;  %p6605_p2 = scmp.lt.s32.totalorder %s113_s18, %s113_s18 }
  0x29   :  { %p6606_p3 = scmp.lt.s32.totalorder %s6604_s5, %s6600_s23 }
  0x2b   :  { %p6607_p4 = por %p6606_p3, %p6605_p2 }
  0x2d   :  { %p6608_p5 = pnand %p6607_p4, %p6601_p1 }
  0x2f   :  { %6611 = shalt.err (!%p6608_p5)
}
  0x30   :  { %115 = dma.hbm_to_vmem [thread:$0]  %s9693_s10, 16, %s113_s18, [#allocation15]  }
  0x31   :  { %s6748_s25 = smov [#allocation2]  }
  0x32   :  { %s31_s26 = sshll.u32 %s6748_s25, 4  ;;  %s32_s26 = int_to_ptr.vmem [resolvable:$true] %s31_s26 }
  0x33   :  { %s6620_s27 = scalar_lea.vmem %s32_s26, 512  ;;  %p6625_p7 = scmp.lt.s32.totalorder %s32_s26, %s32_s26 }
  0x34   :  { %p6621_p6 = scmp.ne.s32.totalorder %s32_s26, %s6620_s27  ;;  %p6626_p8 = scmp.lt.s32.totalorder %s6620_s27, %s6620_s27 }
  0x36   :  { %p6627_p9 = por %p6626_p8, %p6625_p7 }
  0x38   :  { %p6628_p10 = pnand %p6627_p9, %p6621_p6 }
  0x3a   :  { %6631 = shalt.err (!%p6628_p10)
}
  0x3b   :  { %s6749_s7 = smov 128   ;;  %s6750_s28 = smov 8  }
  0x3c   :  { %37 = dma.hbm_to_vmem [thread:$0]  %s9683_s0, 512, %s32_s26, [#allocation3], %s6749_s7, %s6749_s7, %s6750_s28  }
  0x3d   :  { %s6751_s10 = smov [#allocation7]  }
  0x3e   :  { %s55_s16 = sshll.u32 %s6751_s10, 4  ;;  %s56_s16 = int_to_ptr.vmem [resolvable:$true] %s55_s16 }
  0x3f   :  { %s6640_s17 = scalar_lea.vmem %s56_s16, 1024  ;;  %p6645_p12 = scmp.lt.s32.totalorder %s56_s16, %s56_s16 }
  0x40   :  { %p6641_p11 = scmp.ne.s32.totalorder %s56_s16, %s6640_s17  ;;  %p6646_p13 = scmp.lt.s32.totalorder %s6640_s17, %s6640_s17 }
  0x42   :  { %p6647_p0 = por %p6646_p13, %p6645_p12 }
  0x44   :  { %p6648_p1 = pnand %p6647_p0, %p6641_p11 }
  0x46   :  { %6651 = shalt.err (!%p6648_p1)
}
  0x47   :  { %s6752_s18 = smov 64   ;;  %s6753_s20 = smov 4  }
  0x48   :  { %61 = dma.hbm_to_vmem [thread:$0]  %s9686_s3, 1024, %s56_s16, [#allocation6], %s6752_s18, %s6752_s18, %s6753_s20  }
  0x49   :  { %s6754_s22 = smov [#allocation10]   ;;  %s6755_s23 = smov [#allocation13]  }
  0x4a   :  { %s80_s0 = sshll.u32 %s6754_s22, 4  ;;  %s100_s5 = sshll.u32 %s6755_s23, 4  ;;  %s81_s0 = int_to_ptr.vmem [resolvable:$true] %s80_s0  ;;  %s101_s5 = int_to_ptr.vmem [resolvable:$true] %s100_s5 }
  0x4b   :  { %s6660_s21 = scalar_lea.vmem %s81_s0, 16  ;;  %s6664_s24 = scalar_lea.vmem %s81_s0, 32 }
  0x4c   :  { %p6661_p2 = scmp.ne.s32.totalorder %s81_s0, %s6660_s21  ;;  %p6665_p3 = scmp.lt.s32.totalorder %s81_s0, %s81_s0 }
  0x4d   :  { %p6666_p4 = scmp.lt.s32.totalorder %s6664_s24, %s6660_s21 }
  0x4f   :  { %p6667_p5 = por %p6666_p4, %p6665_p3 }
  0x51   :  { %p6668_p6 = pnand %p6667_p5, %p6661_p2 }
  0x53   :  { %6671 = shalt.err (!%p6668_p6)
}
  0x54   :  { %83 = dma.hbm_to_vmem [thread:$0]  %s9689_s6, 16, %s81_s0, [#allocation9]  }
  0x55   :  { %s6680_s27 = scalar_lea.vmem %s101_s5, 16  ;;  %s6684_s3 = scalar_lea.vmem %s101_s5, 32 }
  0x56   :  { %p6681_p7 = scmp.ne.s32.totalorder %s101_s5, %s6680_s27  ;;  %p6685_p8 = scmp.lt.s32.totalorder %s101_s5, %s101_s5 }
  0x57   :  { %p6686_p9 = scmp.lt.s32.totalorder %s6684_s3, %s6680_s27 }
  0x59   :  { %p6687_p10 = por %p6686_p9, %p6685_p8 }
  0x5b   :  { %p6688_p11 = pnand %p6687_p10, %p6681_p7 }
  0x5d   :  { %6691 = shalt.err (!%p6688_p11)
}
  0x5e   :  { %103 = dma.hbm_to_vmem [thread:$0]  %s9691_s8, 16, %s101_s5, [#allocation12]  }
  0x5f   :  { %s6756_s10 = smov [#allocation16]  }
  0x60   :  { %s122_s16 = sshll.u32 %s6756_s10, 4  ;;  %s123_s16 = int_to_ptr.vmem [resolvable:$true] %s122_s16 }
  0x61   :  { %s6700_s17 = scalar_lea.vmem %s123_s16, 16  ;;  %s6704_s20 = scalar_lea.vmem %s123_s16, 32 }
  0x62   :  { %p6701_p12 = scmp.ne.s32.totalorder %s123_s16, %s6700_s17  ;;  %p6705_p13 = scmp.lt.s32.totalorder %s123_s16, %s123_s16 }
  0x63   :  { %p6706_p0 = scmp.lt.s32.totalorder %s6704_s20, %s6700_s17 }
  0x65   :  { %p6707_p1 = por %p6706_p0, %p6705_p13 }
  0x67   :  { %p6708_p2 = pnand %p6707_p1, %p6701_p12 }
  0x69   :  { %6711 = shalt.err (!%p6708_p2)
}
  0x6a   :  { %125 = dma.hbm_to_vmem [thread:$0]  %s9694_s11, 16, %s123_s16, [#allocation15]  }
  0x6b   :  { %6732 = dma.done.wait [#allocation3], 512  }
  0x6c   :  { %6733 = vsyncadd [#allocation3], 4294966784 }
  0x6d   :  { %6734 = dma.done.wait [#allocation6], 1040  }
  0x6e   :  { %6735 = vsyncadd [#allocation6], 4294966256 }
  0x6f   :  { %6736 = dma.done.wait [#allocation9], 32  }
  0x70   :  { %6737 = vsyncadd [#allocation9], 4294967264 }
  0x71   :  { %6738 = dma.done.wait [#allocation12], 32  }
  0x72   :  { %6739 = vsyncadd [#allocation12], 4294967264 }
  0x73   :  { %6740 = dma.done.wait [#allocation15], 32  }
  0x74   :  { %6741 = vsyncadd [#allocation15], 4294967264  ;;  %v190_v0 = vlaneseq  ;;  %v160_v5 = vld [vmem:[#allocation2] sm:$0xff]  ;;  %v161_v6 = vld [vmem:[#allocation2 + $0x8] sm:$0xff]  ;;  %vm281_vm0 = vcmask 1046528   ;;  %vm253_vm1 = vcmask 1040384  }
  0x75   :  { %v5230_v7 = vld [vmem:[%s9684_s1] ss:$0 sm:$0xff]  ;;  %v164_v8 = vmax.f32 %v160_v5, 0.0  ;;  %v165_v9 = vmax.f32 %v161_v6, 0.0  ;;  %v162_v10 = vld [vmem:[#allocation2 + $0x10] sm:$0xff]  ;;  %v163_v11 = vld [vmem:[#allocation2 + $0x18] sm:$0xff] }
  0x76   :  { %v6887_v1 = vshrl.u32 %v190_v0, 7  ;;  %v5231_v14 = vld [vmem:[#allocation5] ss:$0 sm:$0xff]  ;;  %v166_v15 = vmax.f32 %v162_v10, 0.0  ;;  %v167_v16 = vmax.f32 %v163_v11, 0.0  ;;  %v6516_v57 = vld [vmem:[#allocation7 + $0x30] sm:$0xff]  }
  0x77   :  { %v175_v17 = vmul.f32 %v5230_v7, %v164_v8  ;;  %v176_v18 = vmul.f32 %v5230_v7, %v165_v9  ;;  %v6515_v56 = vld [vmem:[#allocation7 + $0x38] sm:$0xff]   ;;  %vm319_vm6 = vcmask 64512   ;;  %v6517_v60 = vld [vmem:[#allocation7 + $0x28] sm:$0xff]   ;;  %s6757_s1 = smov 24   ;;  %v6518_v0 = vld [vmem:[#allocation7 + $0x20] sm:$0xff]   ;;  %s6758_s19 = smov 48  }
  0x78   :  { %9902 = vst [vmem:[#allocation24_spill] sm:$0xff] %v6887_v1  ;;  %v192_v2 = vadd.s32 8, %v6887_v1  ;;  %v194_v3 = vadd.s32 24, %v6887_v1  ;;  %v199_v4 = vand.u32 15, %v6887_v1  ;;  %v193_v13 = vadd.s32 16, %v6887_v1  ;;  %5954 = vmatprep.subr.bf16.mxu0 %v6515_v56  ;;  %v6519_v6 = vld [vmem:[#allocation7 + $0x18] sm:$0xff]  }
  0x79   :  { %v177_v21 = vmul.f32 %v5230_v7, %v166_v15  ;;  %v178_v22 = vmul.f32 %v5230_v7, %v167_v16  ;;  %v186_v23 = vadd.f32 %v5231_v14, %v175_v17  ;;  %v187_v24 = vadd.f32 %v5231_v14, %v176_v18  ;;  %5955 = vmatpush3.bf16.msra.mxu0 %v6515_v56  ;;  %s6759_s22 = smov 16   ;;  %s6760_s0 = smov 120   ;;  %v6520_v8 = vld [vmem:[#allocation7 + $0x10] sm:$0xff]   ;;  %v6521_v10 = vld [vmem:[#allocation7 + $0x8] sm:$0xff]   ;;  %v6522_v11 = vld [vmem:[#allocation7] sm:$0xff]  }
  0x7a   :  { %v206_v12 = vand.u32 15, %v192_v2  ;;  %v220_v19 = vand.u32 15, %v194_v3  ;;  %vm6896_vm2 = vcmp.gt.s32.totalorder %v199_v4, 0  ;;  %v213_v26 = vand.u32 15, %v193_v13  ;;  %5956 = vmatprep.subr.bf16.mxu0 %v6516_v57  ;;  %s6761_s23 = smov 40   ;;  %s6762_s5 = smov 112  }
  0x7b   :  { %v188_v27 = vadd.f32 %v5231_v14, %v177_v21  ;;  %v189_v28 = vadd.f32 %v5231_v14, %v178_v22  ;;  %v307_v29 = vpack.c.bf16 %v187_v24, %v186_v23  ;;  %v282_v30 = vrot.slane %v186_v23, 1  ;;  %s6763_s21 = smov 32   ;;  %s6764_s24 = smov 104  }
  0x7c   :  { %vm6900_vm3 = vcmp.lt.s32.totalorder %v206_v12, 15  ;;  %v283_v31 = vrot.slane %v187_v24, 1  ;;  %v254_v32 = vrot.slane %v186_v23, 7  ;;  %vm6904_vm4 = vcmp.lt.s32.totalorder %v220_v19, 15  ;;  %s6765_s25 = smov 96   ;;  %s6766_s26 = smov 88  }
  0x7d   :  { %v285_v33 = vrot.slane %v188_v27, 1  ;;  %v287_v35 = vrot.slane %v189_v28, 1  ;;  %v248_v36 = vrot.slane %v189_v28, 7  ;;  %329 = vrot.lane.b32.xlu0 %v307_v29, %s6750_s28  ;;  %v308_v37 = vpack.c.bf16 %v189_v28, %v188_v27  ;;  %5957 = vmatpush3.bf16.msra.mxu0 %v6516_v57  ;;  %s6767_s27 = smov 80   ;;  %s6768_s3 = smov 72  }
  0x7e   :  { %v284_v38 = vsel %vm281_vm0, %v282_v30, %v283_v31  ;;  %v255_v39 = vrot.slane %v187_v24, 7  ;;  %v257_v40 = vrot.slane %v188_v27, 7  ;;  %vm245_vm5 = vcmp.gt.s32.totalorder %v213_v26, 0  ;;  %5958 = vmatprep.subr.bf16.mxu0 %v6517_v60  ;;  %s6769_s29 = smov 56  }
  0x7f   :  { %v286_v41 = vsel %vm281_vm0, %v283_v31, %v285_v33  ;;  %v288_v42 = vsel %vm281_vm0, %v285_v33, %v287_v35  ;;  %v294_v43 = vsel %vm281_vm0, %v287_v35, %v282_v30  ;;  %v264_v44 = vsel %vm253_vm1, %v248_v36, %v254_v32 }
  0x80   :  { %v304_v45 = vsel %vm6900_vm3, %v286_v41, 0.0  ;;  %v306_v46 = vsel %vm6904_vm4, %v294_v43, 0.0  ;;  %v256_v47 = vsel %vm253_vm1, %v254_v32, %v255_v39  ;;  %v273_v48 = vsel %vm6896_vm2, %v264_v44, 0.0 }
  0x81   :  { %v311_v49 = vpack.c.bf16 %v304_v45, %v284_v38  ;;  %v258_v50 = vsel %vm253_vm1, %v255_v39, %v257_v40  ;;  %331 = vrot.lane.b32.xlu0 %v308_v37, %s6750_s28  ;;  %v309_v51 = vpack.c.bf16 %v256_v47, %v273_v48  ;;  %v312_v52 = vpack.c.bf16 %v306_v46, %v288_v42 }
  0x82   :  { %v259_v53 = vsel %vm253_vm1, %v257_v40, %v248_v36  ;;  %v275_v54 = vsel %vm245_vm5, %v258_v50, 0.0  ;;  %5959 = vmatpush3.bf16.msra.mxu0 %v6517_v60  ;;  %vm363_vm7 = vcmask 195584   ;;  %vm368_vm8 = vcmask 392192  }
  0x83   :  { %341 = vrot.lane.b32.xlu1 %v311_v49, %s6750_s28  ;;  %v310_v55 = vpack.c.bf16 %v259_v53, %v275_v54  ;;  %5960 = vmatprep.subr.bf16.mxu0 %v6518_v0  ;;  %vm373_vm9 = vcmask 588800   ;;  %vm729_vm10 = vcmask 326656   ;;  %vm716_vm11 = vcmask 130048  }
  0x84   :  { %vm742_vm12 = vcmask 523264   ;;  %vm778_vm13 = vcmask 261120   ;;  %vm789_vm14 = vcmask 457728   ;;  %vm6772_vm15 = vmmov 0  }
  0x85   :  { %315 = vrot.lane.b32.xlu0 %v309_v51, %s6750_s28 }
  0x86   :  { %5961 = vmatpush3.bf16.msra.mxu0 %v6518_v0 }
  0x87   :  { %343 = vrot.lane.b32.xlu1 %v312_v52, %s6750_s28  ;;  %5962 = vmatprep.subr.bf16.mxu0 %v6519_v6 }
  0x8a   :  { %5963 = vmatpush3.bf16.msra.mxu0 %v6519_v6 }
  0x8b   :  { %317 = vrot.lane.b32.xlu1 %v310_v55, %s6750_s28  ;;  %5964 = vmatprep.subr.bf16.mxu0 %v6520_v8 }
  0x8e   :  { %5965 = vmatpush3.bf16.msra.mxu0 %v6520_v8 }
  0x8f   :  { %5966 = vmatprep.subr.bf16.mxu0 %v6521_v10 }
  0x92   :  { %5967 = vmatpush3.bf16.msra.mxu0 %v6521_v10 }
  0x93   :  { %5968 = vmatprep.subr.bf16.mxu0 %v6522_v11 }
  0x96   :  { %5969 = vmatpush3.bf16.msra.mxu0 %v6522_v11 }
  0xef   :  { %v6928_v58 = vpop.permute.xlu0 %329 }
  0xf0   :  { %v6932_v59 = vsel %vm319_vm6, 0, %v6928_v58  ;;  %v337_v49 = vsel %vm319_vm6, %v6928_v58, 0 }
  0xf1   :  { %353 = vrot.lane.b32.xlu0 %v6932_v59, %s6757_s1 }
  0xf3   :  { %v6936_v61 = vpop.permute.xlu0 %331 }
  0xf4   :  { %v6940_v62 = vsel %vm319_vm6, 0, %v6936_v61  ;;  %v338_v60 = vsel %vm319_vm6, %v6936_v61, 0 }
  0xf5   :  { %v6942_v63 = vpop.permute.xlu1 %341  ;;  %355 = vrot.lane.b32.xlu1 %v6940_v62, %s6757_s1 }
  0xf6   :  { %v6946_v2 = vsel %vm319_vm6, 0, %v6942_v63  ;;  %v349_v10 = vsel %vm319_vm6, %v6942_v63, 0 }
  0xf7   :  { %359 = vrot.lane.b32.xlu0 %v6946_v2, %s6758_s19  ;;  %v6952_v3 = vpop.permute.xlu0 %315 }
  0xf8   :  { %v6958_v5 = vsel %vm319_vm6, 0, %v6952_v3  ;;  %v325_v45 = vsel %vm319_vm6, %v6952_v3, 0 }
  0xf9   :  { %v6954_v4 = vpop.permute.xlu1 %343  ;;  %384 = vrot.lane.b32.xlu1 %v6932_v59, %s6759_s22 }
  0xfa   :  { %v6996_v12 = vsel %vm319_vm6, 0, %v6954_v4 }
  0xfb   :  { %380 = vrot.lane.b32.xlu0 %v6958_v5, %s6760_s0 }
  0xfd   :  { %v6964_v7 = vpop.permute.xlu1 %317  ;;  %386 = vrot.lane.b32.xlu1 %v6940_v62, %s6759_s22 }
  0xfe   :  { %v6968_v9 = vsel %vm319_vm6, 0, %v6964_v7  ;;  %v326_v55 = vsel %vm319_vm6, %v6964_v7, 0 }
  0xff   :  { %382 = vrot.lane.b32.xlu0 %v6968_v9, %s6760_s0 }
 0x101   :  { %410 = vrot.lane.b32.xlu1 %v6932_v59, %s6750_s28 }
 0x103   :  { %388 = vrot.lane.b32.xlu0 %v6946_v2, %s6761_s23 }
 0x105   :  { %412 = vrot.lane.b32.xlu1 %v6940_v62, %s6750_s28 }
 0x107   :  { %406 = vrot.lane.b32.xlu0 %v6958_v5, %s6762_s5 }
 0x109   :  { %456 = vrot.lane.b32.xlu1 %v6932_v59, %s6760_s0 }
 0x10b   :  { %408 = vrot.lane.b32.xlu0 %v6968_v9, %s6762_s5 }
 0x10d   :  { %458 = vrot.lane.b32.xlu1 %v6940_v62, %s6760_s0 }
 0x10f   :  { %414 = vrot.lane.b32.xlu0 %v6946_v2, %s6763_s21 }
 0x111   :  { %482 = vrot.lane.b32.xlu1 %v6932_v59, %s6762_s5 }
 0x113   :  { %432 = vrot.lane.b32.xlu0 %v6958_v5, %s6764_s24 }
 0x115   :  { %361 = vrot.lane.b32.xlu1 %v6996_v12, %s6758_s19 }
 0x117   :  { %436 = vrot.lane.b32.xlu0 %v6946_v2, %s6757_s1 }
 0x119   :  { %484 = vrot.lane.b32.xlu1 %v6940_v62, %s6762_s5 }
 0x11b   :  { %452 = vrot.lane.b32.xlu0 %v6958_v5, %s6765_s25 }
 0x11d   :  { %390 = vrot.lane.b32.xlu1 %v6996_v12, %s6761_s23 }
 0x11f   :  { %454 = vrot.lane.b32.xlu0 %v6968_v9, %s6765_s25 }
 0x121   :  { %508 = vrot.lane.b32.xlu1 %v6932_v59, %s6764_s24 }
 0x123   :  { %460 = vrot.lane.b32.xlu0 %v6946_v2, %s6759_s22 }
 0x125   :  { %416 = vrot.lane.b32.xlu1 %v6996_v12, %s6763_s21 }
 0x127   :  { %478 = vrot.lane.b32.xlu0 %v6958_v5, %s6766_s26 }
 0x129   :  { %434 = vrot.lane.b32.xlu1 %v6968_v9, %s6764_s24 }
 0x12b   :  { %480 = vrot.lane.b32.xlu0 %v6968_v9, %s6766_s26 }
 0x12d   :  { %438 = vrot.lane.b32.xlu1 %v6996_v12, %s6757_s1 }
 0x12f   :  { %486 = vrot.lane.b32.xlu0 %v6946_v2, %s6750_s28 }
 0x131   :  { %510 = vrot.lane.b32.xlu1 %v6940_v62, %s6764_s24 }
 0x133   :  { %504 = vrot.lane.b32.xlu0 %v6958_v5, %s6767_s27 }
 0x135   :  { %462 = vrot.lane.b32.xlu1 %v6996_v12, %s6759_s22 }
 0x137   :  { %506 = vrot.lane.b32.xlu0 %v6968_v9, %s6767_s27 }
 0x139   :  { %528 = vrot.lane.b32.xlu1 %v6932_v59, %s6765_s25 }
 0x13b   :  { %524 = vrot.lane.b32.xlu0 %v6958_v5, %s6768_s3 }
 0x13d   :  { %488 = vrot.lane.b32.xlu1 %v6996_v12, %s6750_s28 }
 0x13f   :  { %526 = vrot.lane.b32.xlu0 %v6968_v9, %s6768_s3 }
 0x141   :  { %530 = vrot.lane.b32.xlu1 %v6940_v62, %s6765_s25 }
 0x143   :  { %532 = vrot.lane.b32.xlu0 %v6946_v2, %s6760_s0 }
 0x145   :  { %554 = vrot.lane.b32.xlu1 %v6932_v59, %s6766_s26 }
 0x147   :  { %550 = vrot.lane.b32.xlu0 %v6958_v5, %s6752_s18 }
 0x149   :  { %556 = vrot.lane.b32.xlu1 %v6940_v62, %s6766_s26 }
 0x14b   :  { %552 = vrot.lane.b32.xlu0 %v6968_v9, %s6752_s18 }
 0x14d   :  { %534 = vrot.lane.b32.xlu1 %v6996_v12, %s6760_s0 }
 0x14f   :  { %558 = vrot.lane.b32.xlu0 %v6946_v2, %s6762_s5 }
 0x151   :  { %580 = vrot.lane.b32.xlu1 %v6932_v59, %s6767_s27 }
 0x153   :  { %576 = vrot.lane.b32.xlu0 %v6958_v5, %s6769_s29 }
 0x155   :  { %560 = vrot.lane.b32.xlu1 %v6996_v12, %s6762_s5 }
 0x157   :  { %578 = vrot.lane.b32.xlu0 %v6968_v9, %s6769_s29 }
 0x159   :  { %582 = vrot.lane.b32.xlu1 %v6940_v62, %s6767_s27 }
 0x15b   :  { %584 = vrot.lane.b32.xlu0 %v6946_v2, %s6764_s24 }
 0x15d   :  { %586 = vrot.lane.b32.xlu1 %v6996_v12, %s6764_s24 }
 0x15f   :  { %602 = vrot.lane.b32.xlu0 %v6958_v5, %s6758_s19 }
 0x161   :  { %606 = vrot.lane.b32.xlu1 %v6932_v59, %s6768_s3 }
 0x163   :  { %604 = vrot.lane.b32.xlu0 %v6968_v9, %s6758_s19  ;;  %v354_v13 = vpop.permute.xlu0 %353 }
 0x164   :  { %v365_v15 = vsel %vm363_vm7, %v6958_v5, %v354_v13 }
 0x165   :  { %608 = vrot.lane.b32.xlu1 %v6940_v62, %s6768_s3 }
 0x167   :  { %610 = vrot.lane.b32.xlu0 %v6946_v2, %s6765_s25  ;;  %v356_v14 = vpop.permute.xlu1 %355 }
 0x168   :  { %v367_v32 = vsel %vm363_vm7, %v6968_v9, %v356_v14  ;;  %v350_v14 = vsel %vm319_vm6, %v6954_v4, 0 }
 0x169   :  { %v360_v16 = vpop.permute.xlu0 %359  ;;  %632 = vrot.lane.b32.xlu1 %v6932_v59, %s6752_s18 }
 0x16a   :  { %v370_v17 = vsel %vm368_vm8, %v365_v15, %v360_v16 }
 0x16b   :  { %628 = vrot.lane.b32.xlu0 %v6958_v5, %s6761_s23  ;;  %5970 = vmatprep.mubr.msk.bf16.mxu0 %vm373_vm9, %v370_v17  ;;  %v385_v18 = vpop.permute.xlu1 %384 }
 0x16d   :  { %v381_v19 = vpop.permute.xlu0 %380  ;;  %634 = vrot.lane.b32.xlu1 %v6940_v62, %s6752_s18 }
 0x16e   :  { %v394_v34 = vsel %vm363_vm7, %v381_v19, %v385_v18 }
 0x16f   :  { %630 = vrot.lane.b32.xlu0 %v6968_v9, %s6761_s23  ;;  %v387_v20 = vpop.permute.xlu1 %386 }
 0x171   :  { %v383_v21 = vpop.permute.xlu0 %382  ;;  %612 = vrot.lane.b32.xlu1 %v6996_v12, %s6765_s25 }
 0x172   :  { %v397_v40 = vsel %vm363_vm7, %v383_v21, %v387_v20 }
 0x173   :  { %636 = vrot.lane.b32.xlu0 %v6946_v2, %s6766_s26  ;;  %v411_v22 = vpop.permute.xlu1 %410 }
 0x175   :  { %v389_v23 = vpop.permute.xlu0 %388  ;;  %638 = vrot.lane.b32.xlu1 %v6996_v12, %s6766_s26 }
 0x176   :  { %v399_v37 = vsel %vm368_vm8, %v394_v34, %v389_v23 }
 0x177   :  { %654 = vrot.lane.b32.xlu0 %v6958_v5, %s6763_s21  ;;  %v413_v24 = vpop.permute.xlu1 %412 }
 0x179   :  { %v407_v25 = vpop.permute.xlu0 %406  ;;  %658 = vrot.lane.b32.xlu1 %v6932_v59, %s6769_s29 }
 0x17a   :  { %v420_v42 = vsel %vm363_vm7, %v407_v25, %v411_v22 }
 0x17b   :  { %656 = vrot.lane.b32.xlu0 %v6968_v9, %s6763_s21  ;;  %v457_v26 = vpop.permute.xlu1 %456 }
 0x17d   :  { %v409_v27 = vpop.permute.xlu0 %408  ;;  %660 = vrot.lane.b32.xlu1 %v6940_v62, %s6769_s29 }
 0x17e   :  { %v423_v50 = vsel %vm363_vm7, %v409_v27, %v413_v24 }
 0x17f   :  { %662 = vrot.lane.b32.xlu0 %v6946_v2, %s6767_s27  ;;  %v7110_v28 = vpop.permute.xlu1 %458 }
 0x181   :  { %v415_v29 = vpop.permute.xlu0 %414  ;;  %664 = vrot.lane.b32.xlu1 %v6996_v12, %s6767_s27 }
 0x182   :  { %v425_v46 = vsel %vm368_vm8, %v420_v42, %v415_v29 }
 0x183   :  { %680 = vrot.lane.b32.xlu0 %v6958_v5, %s6757_s1  ;;  %v7116_v30 = vpop.permute.xlu1 %482 }
 0x185   :  { %v433_v31 = vpop.permute.xlu0 %432  ;;  %684 = vrot.lane.b32.xlu1 %v6932_v59, %s6758_s19 }
 0x186   :  { %v441_v52 = vsel %vm363_vm7, %v433_v31, %v6932_v59 }
 0x187   :  { %682 = vrot.lane.b32.xlu0 %v6968_v9, %s6757_s1  ;;  %v362_v33 = vpop.permute.xlu1 %361 }
 0x188   :  { %v372_v35 = vsel %vm368_vm8, %v367_v32, %v362_v33 }
 0x189   :  { %v437_v36 = vpop.permute.xlu0 %436  ;;  %686 = vrot.lane.b32.xlu1 %v6940_v62, %s6758_s19  ;;  %5971 = vmatmul.mubr.msk.bf16.vlgmr.msra.gmra.mxu0 %vm373_vm9, %v372_v35 }
 0x18a   :  { %5974 = vmatprep.mubr.msk.bf16.mxu0 %vm373_vm9, %v399_v37  ;;  %v445_v56 = vsel %vm368_vm8, %v441_v52, %v437_v36 }
 0x18b   :  { %688 = vrot.lane.b32.xlu0 %v6946_v2, %s6768_s3  ;;  %v7133_v38 = vpop.permute.xlu1 %484 }
 0x18d   :  { %v453_v39 = vpop.permute.xlu0 %452  ;;  %690 = vrot.lane.b32.xlu1 %v6996_v12, %s6768_s3 }
 0x18e   :  { %v466_v6 = vsel %vm363_vm7, %v453_v39, %v457_v26 }
 0x18f   :  { %708 = vrot.lane.b32.xlu0 %v6958_v5, %s6759_s22  ;;  %v391_v41 = vpop.permute.xlu1 %390 }
 0x190   :  { %v401_v43 = vsel %vm368_vm8, %v397_v40, %v391_v41 }
 0x191   :  { %v455_v44 = vpop.permute.xlu0 %454  ;;  %710 = vrot.lane.b32.xlu1 %v325_v45, %s6759_s22  ;;  %5975 = vmatmul.mubr.msk.bf16.gmra.mxu0 %vm373_vm9, %v401_v43 }
 0x192   :  { %5978 = vmatprep.mubr.msk.bf16.mxu0 %vm373_vm9, %v425_v46  ;;  %v469_v63 = vsel %vm363_vm7, %v455_v44, %v7110_v28 }
 0x193   :  { %721 = vrot.lane.b32.xlu0 %v6932_v59, %s6761_s23  ;;  %v509_v47 = vpop.permute.xlu1 %508 }
 0x195   :  { %v461_v48 = vpop.permute.xlu0 %460  ;;  %723 = vrot.lane.b32.xlu1 %v337_v49, %s6761_s23 }
 0x196   :  { %v471_v11 = vsel %vm368_vm8, %v466_v6, %v461_v48 }
 0x197   :  { %712 = vrot.lane.b32.xlu0 %v6968_v9, %s6759_s22  ;;  %v417_v51 = vpop.permute.xlu1 %416 }
 0x198   :  { %v427_v53 = vsel %vm368_vm8, %v423_v50, %v417_v51 }
 0x199   :  { %v479_v54 = vpop.permute.xlu0 %478  ;;  %714 = vrot.lane.b32.xlu1 %v326_v55, %s6759_s22  ;;  %5979 = vmatmul.mubr.msk.bf16.gmra.mxu0 %vm373_vm9, %v427_v53 }
 0x19a   :  { %5982 = vmatprep.mubr.msk.bf16.mxu0 %vm373_vm9, %v445_v56  ;;  %v492_v16 = vsel %vm363_vm7, %v479_v54, %v7116_v30 }
 0x19b   :  { %725 = vrot.lane.b32.xlu0 %v6940_v62, %s6761_s23  ;;  %v435_v57 = vpop.permute.xlu1 %434 }
 0x19c   :  { %v443_v0 = vsel %vm363_vm7, %v435_v57, %v6940_v62 }
 0x19d   :  { %v481_v58 = vpop.permute.xlu0 %480  ;;  %727 = vrot.lane.b32.xlu1 %v338_v60, %s6761_s23 }
 0x19e   :  { %v495_v21 = vsel %vm363_vm7, %v481_v58, %v7133_v38 }
 0x19f   :  { %734 = vrot.lane.b32.xlu0 %v6946_v2, %s6752_s18  ;;  %v439_v3 = vpop.permute.xlu1 %438 }
 0x1a0   :  { %v447_v7 = vsel %vm368_vm8, %v443_v0, %v439_v3 }
 0x1a1   :  { %v487_v8 = vpop.permute.xlu0 %486  ;;  %736 = vrot.lane.b32.xlu1 %v349_v10, %s6752_s18  ;;  %5983 = vmatmul.mubr.msk.bf16.gmra.mxu0 %vm373_vm9, %v447_v7 }
 0x1a2   :  { %5986 = vmatprep.mubr.msk.bf16.mxu0 %vm373_vm9, %v471_v11  ;;  %v497_v19 = vsel %vm368_vm8, %v492_v16, %v487_v8 }
 0x1a3   :  { %738 = vrot.lane.b32.xlu0 %v6996_v12, %s6752_s18  ;;  %v511_v61 = vpop.permute.xlu1 %510 }
 0x1a5   :  { %v505_v13 = vpop.permute.xlu0 %504  ;;  %740 = vrot.lane.b32.xlu1 %v350_v14, %s6752_s18 }
 0x1a6   :  { %v514_v20 = vsel %vm363_vm7, %v505_v13, %v509_v47 }
 0x1a7   :  { %759 = vrot.lane.b32.xlu0 %v6958_v5, %s6750_s28  ;;  %v463_v15 = vpop.permute.xlu1 %462 }
 0x1a8   :  { %v473_v17 = vsel %vm368_vm8, %v469_v63, %v463_v15 }
 0x1a9   :  { %v507_v18 = vpop.permute.xlu0 %506  ;;  %761 = vrot.lane.b32.xlu1 %v325_v45, %s6750_s28  ;;  %5987 = vmatmul.mubr.msk.bf16.gmra.mxu0 %vm373_vm9, %v473_v17 }
 0x1aa   :  { %5990 = vmatprep.mubr.msk.bf16.mxu0 %vm373_vm9, %v497_v19  ;;  %v517_v26 = vsel %vm363_vm7, %v507_v18, %v511_v61 }
 0x1ab   :  { %770 = vrot.lane.b32.xlu0 %v6932_v59, %s6763_s21  ;;  %v529_v4 = vpop.permute.xlu1 %528  ;;  %v518_v59 = vsel %vm368_vm8, %v514_v20, %v6946_v2  ;;  %v519_v30 = vsel %vm368_vm8, %v517_v26, %v6996_v12 }
 0x1ad   :  { %v525_v5 = vpop.permute.xlu0 %524  ;;  %772 = vrot.lane.b32.xlu1 %v337_v49, %s6763_s21 }
 0x1ae   :  { %v538_v28 = vsel %vm363_vm7, %v525_v5, %v529_v4 }
 0x1af   :  { %763 = vrot.lane.b32.xlu0 %v6968_v9, %s6750_s28  ;;  %v489_v22 = vpop.permute.xlu1 %488 }
 0x1b0   :  { %v499_v23 = vsel %vm368_vm8, %v495_v21, %v489_v22 }
 0x1b1   :  { %v527_v24 = vpop.permute.xlu0 %526  ;;  %765 = vrot.lane.b32.xlu1 %v326_v55, %s6750_s28  ;;  %5991 = vmatmul.mubr.msk.bf16.gmra.mxu0 %vm373_vm9, %v499_v23 }
 0x1b2   :  { %5994 = vmatprep.mubr.msk.bf16.mxu0 %vm373_vm9, %v518_v59 }
 0x1b3   :  { %774 = vrot.lane.b32.xlu0 %v6940_v62, %s6763_s21  ;;  %v531_v9 = vpop.permute.xlu1 %530 }
 0x1b4   :  { %v541_v32 = vsel %vm363_vm7, %v527_v24, %v531_v9 }
 0x1b5   :  { %v533_v25 = vpop.permute.xlu0 %532  ;;  %776 = vrot.lane.b32.xlu1 %v338_v60, %s6763_s21 }
 0x1b6   :  { %v543_v62 = vsel %vm368_vm8, %v538_v28, %v533_v25 }
 0x1b7   :  { %781 = vrot.lane.b32.xlu0 %v6946_v2, %s6769_s29  ;;  %v555_v27 = vpop.permute.xlu1 %554 }
 0x1b9   :  { %v551_v29 = vpop.permute.xlu0 %550  ;;  %783 = vrot.lane.b32.xlu1 %v349_v10, %s6769_s29  ;;  %5995 = vmatmul.mubr.msk.bf16.gmra.mxu0 %vm373_vm9, %v519_v30 }
 0x1ba   :  { %5998 = vmatprep.mubr.msk.bf16.mxu0 %vm373_vm9, %v543_v62  ;;  %v564_v34 = vsel %vm363_vm7, %v551_v29, %v555_v27 }
 0x1bb   :  { %785 = vrot.lane.b32.xlu0 %v6996_v12, %s6769_s29  ;;  %v557_v31 = vpop.permute.xlu1 %556 }
 0x1bd   :  { %v553_v2 = vpop.permute.xlu0 %552  ;;  %787 = vrot.lane.b32.xlu1 %v350_v14, %s6769_s29 }
 0x1be   :  { %v567_v39 = vsel %vm363_vm7, %v553_v2, %v557_v31 }
 0x1bf   :  { %v535_v33 = vpop.permute.xlu1 %534 }
 0x1c0   :  { %v545_v35 = vsel %vm368_vm8, %v541_v32, %v535_v33 }
 0x1c1   :  { %v559_v36 = vpop.permute.xlu0 %558  ;;  %5999 = vmatmul.mubr.msk.bf16.gmra.mxu0 %vm373_vm9, %v545_v35 }
 0x1c2   :  { %v569_v37 = vsel %vm368_vm8, %v564_v34, %v559_v36 }
 0x1c3   :  { %6002 = vmatprep.mubr.msk.bf16.mxu0 %vm373_vm9, %v569_v37  ;;  %v581_v12 = vpop.permute.xlu1 %580 }
 0x1c5   :  { %v577_v38 = vpop.permute.xlu0 %576 }
 0x1c6   :  { %v590_v44 = vsel %vm363_vm7, %v577_v38, %v581_v12 }
 0x1c7   :  { %v561_v40 = vpop.permute.xlu1 %560 }
 0x1c8   :  { %v571_v41 = vsel %vm368_vm8, %v567_v39, %v561_v40 }
 0x1c9   :  { %v579_v42 = vpop.permute.xlu0 %578  ;;  %6003 = vmatmul.mubr.msk.bf16.gmra.mxu0 %vm373_vm9, %v571_v41 }
 0x1cb   :  { %v583_v43 = vpop.permute.xlu1 %582 }
 0x1cc   :  { %v593_v47 = vsel %vm363_vm7, %v579_v42, %v583_v43 }
 0x1cd   :  { %v585_v45 = vpop.permute.xlu0 %584 }
 0x1ce   :  { %v595_v46 = vsel %vm368_vm8, %v590_v44, %v585_v45 }
 0x1cf   :  { %6006 = vmatprep.mubr.msk.bf16.mxu0 %vm373_vm9, %v595_v46  ;;  %v587_v48 = vpop.permute.xlu1 %586 }
 0x1d0   :  { %v597_v49 = vsel %vm368_vm8, %v593_v47, %v587_v48 }
 0x1d1   :  { %v603_v50 = vpop.permute.xlu0 %602  ;;  %6007 = vmatmul.mubr.msk.bf16.gmra.mxu0 %vm373_vm9, %v597_v49 }
 0x1d3   :  { %v607_v51 = vpop.permute.xlu1 %606 }
 0x1d4   :  { %v616_v54 = vsel %vm363_vm7, %v603_v50, %v607_v51 }
 0x1d5   :  { %v605_v52 = vpop.permute.xlu0 %604 }
 0x1d7   :  { %v609_v53 = vpop.permute.xlu1 %608 }
 0x1d8   :  { %v619_v3 = vsel %vm363_vm7, %v605_v52, %v609_v53 }
 0x1d9   :  { %v611_v55 = vpop.permute.xlu0 %610 }
 0x1da   :  { %v621_v56 = vsel %vm368_vm8, %v616_v54, %v611_v55 }
 0x1db   :  { %6010 = vmatprep.mubr.msk.bf16.mxu0 %vm373_vm9, %v621_v56  ;;  %v633_v57 = vpop.permute.xlu1 %632 }
 0x1dd   :  { %v629_v58 = vpop.permute.xlu0 %628 }
 0x1de   :  { %v642_v7 = vsel %vm363_vm7, %v629_v58, %v633_v57 }
 0x1df   :  { %v635_v60 = vpop.permute.xlu1 %634 }
 0x1e1   :  { %v631_v0 = vpop.permute.xlu0 %630 }
 0x1e2   :  { %v645_v14 = vsel %vm363_vm7, %v631_v0, %v635_v60  ;;  %v6770_v60 = vmov 1983009808  }
 0x1e3   :  { %v613_v6 = vpop.permute.xlu1 %612  ;;  %v1548_v0 = vunpack.c.l.s4 %v6770_v60 }
 0x1e4   :  { %v623_v8 = vsel %vm368_vm8, %v619_v3, %v613_v6 }
 0x1e5   :  { %v637_v10 = vpop.permute.xlu0 %636  ;;  %6011 = vmatmul.mubr.msk.bf16.gmra.mxu0 %vm373_vm9, %v623_v8 }
 0x1e6   :  { %v647_v11 = vsel %vm368_vm8, %v642_v7, %v637_v10  ;;  %v1549_v7 = vunpack.c.0.s8 %v1548_v0 }
 0x1e7   :  { %6014 = vmatprep.mubr.msk.bf16.mxu0 %vm373_vm9, %v647_v11  ;;  %v639_v61 = vpop.permute.xlu1 %638 }
 0x1e8   :  { %v649_v15 = vsel %vm368_vm8, %v645_v14, %v639_v61  ;;  %v7284_v14 = vld [vmem:[%s9687_s4] sm:$0xff] }
 0x1e9   :  { %v655_v13 = vpop.permute.xlu0 %654 }
 0x1eb   :  { %v659_v63 = vpop.permute.xlu1 %658 }
 0x1ec   :  { %v668_v18 = vsel %vm363_vm7, %v655_v13, %v659_v63  ;;  %v7278_v13 = vsub.s32 %v1549_v7, %v6887_v1 }
 0x1ed   :  { %v657_v16 = vpop.permute.xlu0 %656  ;;  %6015 = vmatmul.mubr.msk.bf16.gmra.mxu0 %vm373_vm9, %v649_v15 }
 0x1ef   :  { %v661_v17 = vpop.permute.xlu1 %660 }
 0x1f0   :  { %v671_v5 = vsel %vm363_vm7, %v657_v16, %v661_v17  ;;  %v7289_v17 = vrot.slane %v7284_v14, %v7278_v13 }
 0x1f1   :  { %v663_v19 = vpop.permute.xlu0 %662 }
 0x1f2   :  { %v673_v4 = vsel %vm368_vm8, %v668_v18, %v663_v19 }
 0x1f3   :  { %6018 = vmatprep.mubr.msk.bf16.mxu0 %vm373_vm9, %v673_v4  ;;  %v665_v20 = vpop.permute.xlu1 %664 }
 0x1f4   :  { %v675_v21 = vsel %vm368_vm8, %v671_v5, %v665_v20  ;;  %v1561_v5 = vcombine.high %v7289_v17, %v7289_v17 }
 0x1f5   :  { %v681_v22 = vpop.permute.xlu0 %680  ;;  %6019 = vmatmul.mubr.msk.bf16.gmra.mxu0 %vm373_vm9, %v675_v21 }
 0x1f6   :  { %v7297_v20 = vand.u32 4294901760, %v1561_v5 }
 0x1f7   :  { %v685_v23 = vpop.permute.xlu1 %684 }
 0x1f8   :  { %v694_v9 = vsel %vm363_vm7, %v681_v22, %v685_v23  ;;  %9909 = vst [vmem:[#allocation25_spill] sm:$0xff] %v7297_v20  ;;  %v7300_v21 = vsub.f32 %v1561_v5, %v7297_v20 }
 0x1f9   :  { %v683_v24 = vpop.permute.xlu0 %682 }
 0x1fa   :  { %9910 = vst [vmem:[#allocation26_spill] sm:$0xff] %v7300_v21  ;;  %v9699_v22 = vand.u32 4294901760, %v7300_v21 }
 0x1fb   :  { %v687_v59 = vpop.permute.xlu1 %686 }
 0x1fc   :  { %v697_v27 = vsel %vm363_vm7, %v683_v24, %v687_v59  ;;  %v1666_v23 = vsub.f32 %v7300_v21, %v9699_v22 }
 0x1fd   :  { %v689_v25 = vpop.permute.xlu0 %688 }
 0x1fe   :  { %v699_v26 = vsel %vm368_vm8, %v694_v9, %v689_v25  ;;  %v1667_v24 = vand.u32 4294901760, %v1666_v23 }
 0x1ff   :  { %6022 = vmatprep.mubr.msk.bf16.mxu0 %vm373_vm9, %v699_v26  ;;  %v691_v28 = vpop.permute.xlu1 %690 }
 0x200   :  { %v701_v29 = vsel %vm368_vm8, %v697_v27, %v691_v28  ;;  %1668 = vmatprep.mubr.f32.mxu1 %v1667_v24 }
 0x201   :  { %v709_v30 = vpop.permute.xlu0 %708  ;;  %6023 = vmatmul.mubr.msk.bf16.gmra.mxu0 %vm373_vm9, %v701_v29 }
 0x203   :  { %v711_v62 = vpop.permute.xlu1 %710 }
 0x204   :  { %v717_v12 = vsel %vm716_vm11, %v709_v30, %v711_v62 }
 0x205   :  { %v722_v31 = vpop.permute.xlu0 %721 }
 0x207   :  { %v724_v2 = vpop.permute.xlu1 %723 }
 0x208   :  { %v730_v37 = vsel %vm729_vm10, %v722_v31, %v724_v2 }
 0x209   :  { %v713_v32 = vpop.permute.xlu0 %712  ;;  %v747_v39 = vsel %vm363_vm7, %v717_v12, %v730_v37 }
 0x20b   :  { %v715_v33 = vpop.permute.xlu1 %714 }
 0x20c   :  { %v718_v44 = vsel %vm716_vm11, %v713_v32, %v715_v33 }
 0x20d   :  { %v726_v34 = vpop.permute.xlu0 %725 }
 0x20f   :  { %v728_v35 = vpop.permute.xlu1 %727 }
 0x210   :  { %v731_v42 = vsel %vm729_vm10, %v726_v34, %v728_v35 }
 0x211   :  { %v735_v36 = vpop.permute.xlu0 %734  ;;  %v750_v46 = vsel %vm363_vm7, %v718_v44, %v731_v42 }
 0x213   :  { %v737_v38 = vpop.permute.xlu1 %736 }
 0x214   :  { %v743_v40 = vsel %vm742_vm12, %v735_v36, %v737_v38 }
 0x215   :  { %v739_v41 = vpop.permute.xlu0 %738  ;;  %v752_v43 = vsel %vm368_vm8, %v747_v39, %v743_v40 }
 0x216   :  { %6026 = vmatprep.mubr.msk.bf16.mxu0 %vm373_vm9, %v752_v43 }
 0x217   :  { %v741_v45 = vpop.permute.xlu1 %740 }
 0x218   :  { %v744_v47 = vsel %vm742_vm12, %v739_v41, %v741_v45 }
 0x219   :  { %v760_v48 = vpop.permute.xlu0 %759  ;;  %v754_v49 = vsel %vm368_vm8, %v750_v46, %v744_v47 }
 0x21a   :  { %6027 = vmatmul.mubr.msk.bf16.gmra.mxu0 %vm373_vm9, %v754_v49 }
 0x21b   :  { %v762_v50 = vpop.permute.xlu1 %761 }
 0x21c   :  { %v768_v3 = vsel %vm319_vm6, %v760_v48, %v762_v50 }
 0x21d   :  { %v771_v51 = vpop.permute.xlu0 %770 }
 0x21f   :  { %v773_v52 = vpop.permute.xlu1 %772 }
 0x220   :  { %v779_v57 = vsel %vm778_vm13, %v771_v51, %v773_v52 }
 0x221   :  { %v764_v53 = vpop.permute.xlu0 %763  ;;  %v794_v8 = vsel %vm363_vm7, %v768_v3, %v779_v57 }
 0x223   :  { %v766_v54 = vpop.permute.xlu1 %765 }
 0x224   :  { %v769_v63 = vsel %vm319_vm6, %v764_v53, %v766_v54 }
 0x225   :  { %v775_v55 = vpop.permute.xlu0 %774 }
 0x227   :  { %v777_v56 = vpop.permute.xlu1 %776 }
 0x228   :  { %v780_v11 = vsel %vm778_vm13, %v775_v55, %v777_v56 }
 0x229   :  { %v782_v58 = vpop.permute.xlu0 %781  ;;  %v797_v18 = vsel %vm363_vm7, %v769_v63, %v780_v11 }
 0x22b   :  { %v784_v6 = vpop.permute.xlu1 %783 }
 0x22c   :  { %v790_v10 = vsel %vm789_vm14, %v782_v58, %v784_v6 }
 0x22d   :  { %v799_v61 = vsel %vm368_vm8, %v794_v8, %v790_v10  ;;  %v786_v15 = vpop.permute.xlu0 %785 }
 0x22e   :  { %6030 = vmatprep.mubr.msk.bf16.mxu0 %vm373_vm9, %v799_v61 }
 0x22f   :  { %v788_v16 = vpop.permute.xlu1 %787 }
 0x230   :  { %v791_v19 = vsel %vm789_vm14, %v786_v15, %v788_v16 }
 0x231   :  { %v801_v4 = vsel %vm368_vm8, %v797_v18, %v791_v19 }
 0x232   :  { %6031 = vmatmul.mubr.msk.bf16.gmra.mxu0 %vm373_vm9, %v801_v4 }
 0x233   :  { %2318 = vmatprep.mubr.f32.mxu0 %v7297_v20 }
 0x249   :  { %v5972_v59 = vpop.f32.mrf.mxu0 }
 0x24a   :  { %v1226_v26 = vrot.slane %v5972_v59, 1 }
 0x24b   :  { %v7307_v9 = vpop.f32.mrf.mxu0 }
 0x24c   :  { %9911 = vst [vmem:[#allocation27_spill] sm:$0xff] %v7307_v9  ;;  %v9700_v29 = vrot.slane %v7307_v9, 1 }
 0x24d   :  { %v5973_v25 = vpop.f32.mrf.mxu0 }
 0x24e   :  { %v1228_v27 = vrot.slane %v5973_v25, 1 }
 0x24f   :  { %v907_v28 = vpop.f32.mrf.mxu0 }
 0x250   :  { %v1229_v30 = vsel %vm281_vm0, %v1226_v26, %v1228_v27  ;;  %v1224_v62 = vrot.slane %v907_v28, 1 }
 0x251   :  { %v7311_v31 = vmax.f32 %v5972_v59, %v1229_v30  ;;  %v5976_v2 = vpop.f32.mrf.mxu0 }
 0x252   :  { %v1225_v32 = vsel %vm281_vm0, %v9700_v29, %v1224_v62  ;;  %v1227_v33 = vsel %vm281_vm0, %v1224_v62, %v1226_v26  ;;  %v1234_v38 = vrot.slane %v5976_v2, 1 }
 0x253   :  { %v7318_v34 = vmax.f32 %v7307_v9, %v1225_v32  ;;  %v7320_v35 = vmax.f32 %v907_v28, %v1227_v33  ;;  %v920_v36 = vpop.f32.mrf.mxu0 }
 0x254   :  { %v1230_v37 = vrot.slane %v920_v36, 1 }
 0x255   :  { %9912 = vst [vmem:[#allocation28_spill] sm:$0xff] %v7318_v34  ;;  %9913 = vst [vmem:[#allocation29_spill] sm:$0xff] %v7320_v35  ;;  %v5977_v12 = vpop.f32.mrf.mxu0 }
 0x256   :  { %v1231_v39 = vsel %vm281_vm0, %v1228_v27, %v1230_v37  ;;  %v1236_v40 = vrot.slane %v5977_v12, 1 }
 0x257   :  { %v7323_v41 = vmax.f32 %v5973_v25, %v1231_v39  ;;  %v923_v42 = vpop.f32.mrf.mxu0 }
 0x258   :  { %v1237_v43 = vsel %vm281_vm0, %v1234_v38, %v1236_v40  ;;  %v1232_v44 = vrot.slane %v923_v42, 1 }
 0x259   :  { %9914 = vst [vmem:[#allocation30_spill] sm:$0xff] %v7323_v41  ;;  %v7326_v45 = vmax.f32 %v5976_v2, %v1237_v43  ;;  %v5980_v46 = vpop.f32.mrf.mxu0 }
 0x25a   :  { %v1233_v47 = vsel %vm281_vm0, %v1230_v37, %v1232_v44  ;;  %v1235_v48 = vsel %vm281_vm0, %v1232_v44, %v1234_v38  ;;  %v1242_v54 = vrot.slane %v5980_v46, 1 }
 0x25b   :  { %v7330_v49 = vmax.f32 %v920_v36, %v1233_v47  ;;  %v7332_v50 = vmax.f32 %v923_v42, %v1235_v48  ;;  %v936_v51 = vpop.f32.mrf.mxu0 }
 0x25c   :  { %v1238_v52 = vrot.slane %v936_v51, 1 }
 0x25d   :  { %9915 = vst [vmem:[#allocation31_spill] sm:$0xff] %v7330_v49  ;;  %9916 = vst [vmem:[#allocation32_spill] sm:$0xff] %v7332_v50  ;;  %v5981_v53 = vpop.f32.mrf.mxu0 }
 0x25e   :  { %v1239_v55 = vsel %vm281_vm0, %v1236_v40, %v1238_v52  ;;  %v1244_v56 = vrot.slane %v5981_v53, 1 }
 0x25f   :  { %v7335_v57 = vmax.f32 %v5977_v12, %v1239_v55  ;;  %v939_v58 = vpop.f32.mrf.mxu0 }
 0x260   :  { %v1245_v60 = vsel %vm281_vm0, %v1242_v54, %v1244_v56  ;;  %v1240_v0 = vrot.slane %v939_v58, 1 }
 0x261   :  { %v1426_v3 = vmax.f32 %v5980_v46, %v1245_v60  ;;  %v5984_v6 = vpop.f32.mrf.mxu0 }
 0x262   :  { %v1241_v7 = vsel %vm281_vm0, %v1238_v52, %v1240_v0  ;;  %v1243_v8 = vsel %vm281_vm0, %v1240_v0, %v1242_v54  ;;  %v1250_v38 = vrot.slane %v5984_v6, 1 }
 0x263   :  { %v7341_v10 = vmax.f32 %v7326_v45, %v1426_v3  ;;  %v1424_v11 = vmax.f32 %v936_v51, %v1241_v7  ;;  %v1425_v61 = vmax.f32 %v939_v58, %v1243_v8  ;;  %v952_v63 = vpop.f32.mrf.mxu0  ;;  %v7374_v51 = vand.u32 4294901760, %v7289_v17 }
 0x264   :  { %v1246_v15 = vrot.slane %v952_v63, 1 }
 0x265   :  { %9917 = vst [vmem:[#allocation33_spill] sm:$0xff] %v7341_v10  ;;  %v7344_v16 = vmax.f32 %v7330_v49, %v1424_v11  ;;  %v7347_v18 = vmax.f32 %v7332_v50, %v1425_v61  ;;  %v5985_v19 = vpop.f32.mrf.mxu0  ;;  %9920 = vst [vmem:[#allocation36_spill] sm:$0xff] %v7374_v51 }
 0x266   :  { %v1247_v4 = vsel %vm281_vm0, %v1244_v56, %v1246_v15  ;;  %v1252_v36 = vrot.slane %v5985_v19, 1 }
 0x267   :  { %9918 = vst [vmem:[#allocation34_spill] sm:$0xff] %v7344_v16  ;;  %9919 = vst [vmem:[#allocation35_spill] sm:$0xff] %v7347_v18  ;;  %v1427_v5 = vmax.f32 %v5981_v53, %v1247_v4  ;;  %v955_v23 = vpop.f32.mrf.mxu0  ;;  %v7389_v4 = vsub.f32 %v7289_v17, %v7374_v51 }
 0x268   :  { %v1253_v42 = vsel %vm281_vm0, %v1250_v38, %v1252_v36  ;;  %v1248_v43 = vrot.slane %v955_v23, 1 }
 0x269   :  { %v7351_v24 = vmax.f32 %v7335_v57, %v1427_v5  ;;  %v5988_v59 = vpop.f32.mrf.mxu0  ;;  %v1430_v54 = vmax.f32 %v5984_v6, %v1253_v42  ;;  %9921 = vst [vmem:[#allocation37_spill] sm:$0xff] %v7389_v4 }
 0x26a   :  { %v1258_v44 = vrot.slane %v5988_v59, 1  ;;  %v1249_v56 = vsel %vm281_vm0, %v1246_v15, %v1248_v43  ;;  %v1251_v58 = vsel %vm281_vm0, %v1248_v43, %v1250_v38 }
 0x26b   :  { %v968_v25 = vpop.f32.mrf.mxu0  ;;  %v1428_v15 = vmax.f32 %v952_v63, %v1249_v56  ;;  %v1429_v42 = vmax.f32 %v955_v23, %v1251_v58  ;;  %v7397_v43 = vmax.f32 %v1426_v3, %v1430_v54  ;;  %v7411_v63 = vmax.f32 %v7323_v41, %v7335_v57 }
 0x26c   :  { %v1254_v37 = vrot.slane %v968_v25, 1  ;;  %v7414_v23 = vand.u32 4294901760, %v7347_v18  ;;  %v7417_v3 = vand.u32 4294901760, %v7341_v10  ;;  %v7429_v57 = vand.u32 4294901760, %v7351_v24 }
 0x26d   :  { %v5989_v26 = vpop.f32.mrf.mxu0  ;;  %9924 = vst [vmem:[#allocation40_spill] sm:$0xff] %v7411_v63  ;;  %v7437_v58 = vand.u32 4294901760, %v7397_v43 }
 0x26e   :  { %v1260_v39 = vrot.slane %v5989_v26, 1  ;;  %v1255_v47 = vsel %vm281_vm0, %v1252_v36, %v1254_v37  ;;  %9925 = vst [vmem:[#allocation41_spill] sm:$0xff] %v7414_v23  ;;  %9926 = vst [vmem:[#allocation42_spill] sm:$0xff] %v7417_v3 }
 0x26f   :  { %v971_v27 = vpop.f32.mrf.mxu0  ;;  %v1431_v60 = vmax.f32 %v5985_v19, %v1255_v47  ;;  %9927 = vst [vmem:[#allocation43_spill] sm:$0xff] %v7429_v57  ;;  %9929 = vst [vmem:[#allocation45_spill] sm:$0xff] %v7437_v58 }
 0x270   :  { %v1256_v46 = vrot.slane %v971_v27, 1  ;;  %v1261_v52 = vsel %vm281_vm0, %v1258_v44, %v1260_v39 }
 0x271   :  { %v7353_v28 = vpop.f32.mrf.mxu0  ;;  %v7383_v7 = vmax.f32 %v5988_v59, %v1261_v52  ;;  %v7399_v59 = vmax.f32 %v1427_v5, %v1431_v60 }
 0x272   :  { %v1259_v0 = vsel %vm281_vm0, %v1256_v46, %v1258_v44  ;;  %v1257_v36 = vsel %vm281_vm0, %v1254_v37, %v1256_v46 }
 0x273   :  { %v7355_v30 = vpop.f32.mrf.mxu0  ;;  %v7395_v38 = vmax.f32 %v971_v27, %v1259_v0  ;;  %v7402_v44 = vmax.f32 %v1430_v54, %v7383_v7  ;;  %v7404_v17 = vmax.f32 %v968_v25, %v1257_v36  ;;  %v7421_v25 = vmax.f32 %v1424_v11, %v1428_v15 }
 0x274   :  { %v9701_v53 = vrot.slane %v7355_v30, 1  ;;  %v7434_v56 = vand.u32 4294901760, %v7399_v59 }
 0x275   :  { %v7357_v62 = vpop.f32.mrf.mxu0  ;;  %9922 = vst [vmem:[#allocation38_spill] sm:$0xff] %v7395_v38  ;;  %9923 = vst [vmem:[#allocation39_spill] sm:$0xff] %v7404_v17  ;;  %v7426_v27 = vmax.f32 %v1429_v42, %v7395_v38  ;;  %v7440_v11 = vmax.f32 %v1428_v15, %v7404_v17 }
 0x276   :  { %v1263_v6 = vsel %vm281_vm0, %v1260_v39, %v9701_v53  ;;  %9928 = vst [vmem:[#allocation44_spill] sm:$0xff] %v7434_v56 }
 0x277   :  { %v7359_v2 = vpop.f32.mrf.mxu0  ;;  %v7406_v47 = vmax.f32 %v5989_v26, %v1263_v6  ;;  %v7423_v26 = vmax.f32 %v1425_v61, %v1429_v42  ;;  %v7444_v6 = vand.u32 4294901760, %v7402_v44  ;;  %v7448_v5 = vand.u32 4294901760, %v7426_v27 }
 0x279   :  { %v7361_v32 = vpop.f32.mrf.mxu0  ;;  %v1495_v61 = vmax.f32 %v1431_v60, %v7406_v47  ;;  %9930 = vst [vmem:[#allocation46_spill] sm:$0xff] %v7444_v6  ;;  %9931 = vst [vmem:[#allocation47_spill] sm:$0xff] %v7448_v5 }
 0x27a   :  { %v1274_v51 = vrot.slane %v7361_v32, 1 }
 0x27b   :  { %v7363_v33 = vpop.f32.mrf.mxu0  ;;  %v7458_v49 = vand.u32 4294901760, %v1495_v61 }
 0x27c   :  { %v1270_v50 = vrot.slane %v7363_v33, 1 }
 0x27d   :  { %v7365_v12 = vpop.f32.mrf.mxu0  ;;  %9932 = vst [vmem:[#allocation48_spill] sm:$0xff] %v7458_v49 }
 0x27e   :  { %v1276_v52 = vrot.slane %v7365_v12, 1 }
 0x27f   :  { %v7367_v40 = vpop.f32.mrf.mxu0 }
 0x280   :  { %v1272_v38 = vrot.slane %v7367_v40, 1 }
 0x281   :  { %v7371_v48 = vpop.f32.mrf.mxu0 }
 0x282   :  { %v1282_v42 = vrot.slane %v7371_v48, 1 }
 0x283   :  { %v7378_v55 = vpop.f32.mrf.mxu0 }
 0x284   :  { %v1278_v1 = vrot.slane %v7378_v55, 1 }
 0x285   :  { %v7385_v8 = vpop.f32.mrf.mxu0 }
 0x286   :  { %v1284_v54 = vrot.slane %v7385_v8, 1 }
 0x287   :  { %v1019_v19 = vpop.f32.mrf.mxu0 }
 0x288   :  { %v1280_v0 = vrot.slane %v1019_v19, 1  ;;  %v1285_v41 = vsel %vm281_vm0, %v1282_v42, %v1284_v54 }
 0x289   :  { %v6004_v37 = vpop.f32.mrf.mxu0  ;;  %v1446_v18 = vmax.f32 %v7371_v48, %v1285_v41 }
 0x28a   :  { %v1290_v22 = vrot.slane %v6004_v37, 1  ;;  %v1283_v20 = vsel %vm281_vm0, %v1280_v0, %v1282_v42  ;;  %v1281_v15 = vsel %vm281_vm0, %v1278_v1, %v1280_v0  ;;  %v1279_v0 = vsel %vm281_vm0, %v1276_v52, %v1278_v1 }
 0x28b   :  { %v1032_v39 = vpop.f32.mrf.mxu0 }
 0x28c   :  { %v1286_v29 = vrot.slane %v1032_v39, 1 }
 0x28d   :  { %v6005_v36 = vpop.f32.mrf.mxu0 }
 0x28e   :  { %v1292_v46 = vrot.slane %v6005_v36, 1  ;;  %v1287_v53 = vsel %vm281_vm0, %v1284_v54, %v1286_v29  ;;  %v1444_v54 = vmax.f32 %v7378_v55, %v1281_v15  ;;  %v7482_v55 = vsub.f32 %v1495_v61, %v7458_v49 }
 0x28f   :  { %v1035_v60 = vpop.f32.mrf.mxu0 }
 0x290   :  { %v1293_v9 = vsel %vm281_vm0, %v1290_v22, %v1292_v46  ;;  %v1288_v21 = vrot.slane %v1035_v60, 1 }
 0x291   :  { %v1450_v4 = vmax.f32 %v6004_v37, %v1293_v9  ;;  %v6008_v34 = vpop.f32.mrf.mxu0  ;;  %v1277_v9 = vsel %vm281_vm0, %v1274_v51, %v1276_v52  ;;  %v1445_v37 = vmax.f32 %v1019_v19, %v1283_v20  ;;  %v1273_v20 = vsel %vm281_vm0, %v1270_v50, %v1272_v38 }
 0x292   :  { %v1289_v17 = vsel %vm281_vm0, %v1286_v29, %v1288_v21  ;;  %v1291_v35 = vsel %vm281_vm0, %v1288_v21, %v1290_v22  ;;  %v1447_v29 = vmax.f32 %v7385_v8, %v1287_v53  ;;  %v1298_v16 = vrot.slane %v6008_v34, 1 }
 0x293   :  { %v1449_v23 = vmax.f32 %v1035_v60, %v1291_v35  ;;  %v1048_v42 = vpop.f32.mrf.mxu0  ;;  %v1448_v63 = vmax.f32 %v1032_v39, %v1289_v17  ;;  %v1510_v21 = vmax.f32 %v1446_v18, %v1450_v4  ;;  %v7476_v48 = vmax.f32 %v7361_v32, %v1277_v9 }
 0x294   :  { %v1294_v10 = vrot.slane %v1048_v42, 1  ;;  %v1443_v53 = vmax.f32 %v7365_v12, %v1279_v0  ;;  %v1275_v39 = vsel %vm281_vm0, %v1272_v38, %v1274_v51 }
 0x295   :  { %v7471_v22 = vpop.f32.mrf.mxu0  ;;  %v1509_v3 = vmax.f32 %v1445_v37, %v1449_v23  ;;  %v1508_v8 = vmax.f32 %v1444_v54, %v1448_v63 }
 0x296   :  { %v1295_v41 = vsel %vm281_vm0, %v1292_v46, %v1294_v10  ;;  %v9727_v35 = vrot.slane %v7471_v22, 1  ;;  %v1507_v15 = vmax.f32 %v1443_v53, %v1447_v29 }
 0x297   :  { %v7479_v19 = vmax.f32 %v6005_v36, %v1295_v41  ;;  %v1051_v1 = vpop.f32.mrf.mxu0  ;;  %v7492_v36 = vand.u32 4294901760, %v1510_v21  ;;  %v7494_v60 = vand.u32 4294901760, %v1509_v3 }
 0x298   :  { %v1301_v17 = vsel %vm281_vm0, %v1298_v16, %v9727_v35  ;;  %v1296_v46 = vrot.slane %v1051_v1, 1 }
 0x299   :  { %v1511_v32 = vmax.f32 %v1447_v29, %v7479_v19  ;;  %v7490_v52 = vmax.f32 %v6008_v34, %v1301_v17  ;;  %9934 = vst [vmem:[#allocation50_spill] sm:$0xff] %v7492_v36  ;;  %9935 = vst [vmem:[#allocation51_spill] sm:$0xff] %v7494_v60  ;;  %v9939_v34 = vrot.slane %v7357_v62, 1  ;;  %v1441_v29 = vmax.f32 %v7367_v40, %v1275_v39 }
 0x29a   :  { %v1297_v61 = vsel %vm281_vm0, %v1294_v10, %v1296_v46  ;;  %v1299_v12 = vsel %vm281_vm0, %v1296_v46, %v1298_v16  ;;  %v1506_v17 = vmax.f32 %v7476_v48, %v1446_v18  ;;  %v7512_v10 = vand.u32 4294901760, %v1508_v8 }
 0x29b   :  { %9933 = vst [vmem:[#allocation49_spill] sm:$0xff] %v7490_v52  ;;  %v7499_v9 = vmax.f32 %v1450_v4, %v7490_v52  ;;  %v7501_v0 = vmax.f32 %v1048_v42, %v1297_v61  ;;  %v7503_v41 = vmax.f32 %v1051_v1, %v1299_v12  ;;  %v7505_v51 = vand.u32 4294901760, %v1511_v32 }
 0x29c   :  { %v1271_v38 = vsel %vm281_vm0, %v9939_v34, %v1270_v50  ;;  %9940 = vst [vmem:[#allocation55_spill] sm:$0xff] %v7512_v10  ;;  %v7525_v1 = vsub.f32 %v1510_v21, %v7492_v36  ;;  %v9943_v50 = vmov %v9939_v34  ;;  %v9944_v18 = vrot.slane %v7353_v28, 1 }
 0x29d   :  { %9936 = vst [vmem:[#allocation52_spill] sm:$0xff] %v7499_v9  ;;  %9937 = vst [vmem:[#allocation53_spill] sm:$0xff] %v7501_v0  ;;  %v7515_v16 = vmax.f32 %v1448_v63, %v7501_v0  ;;  %v7518_v4 = vmax.f32 %v1449_v23, %v7503_v41  ;;  %5318 = vmatprep.subr.mxu1 %v7505_v51  ;;  %v7522_v42 = vsub.f32 %v1511_v32, %v7505_v51 }
 0x29e   :  { %9938 = vst [vmem:[#allocation54_spill] sm:$0xff] %v7503_v41  ;;  %v1269_v40 = vsel %vm281_vm0, %v9944_v18, %v9943_v50  ;;  %v7533_v63 = vmax.f32 %v7363_v33, %v1273_v20  ;;  %5319 = vmatpush3.msra.mxu1 %v7458_v49  ;;  %v7537_v23 = vand.u32 4294901760, %v7440_v11  ;;  %v7541_v46 = vsub.f32 %v7402_v44, %v7444_v6 }
 0x29f   :  { %9941 = vst [vmem:[#allocation56_spill] sm:$0xff] %v7515_v16  ;;  %9942 = vst [vmem:[#allocation57_spill] sm:$0xff] %v7518_v4  ;;  %v1505_v21 = vmax.f32 %v1441_v29, %v1445_v37  ;;  %v7544_v39 = vsub.f32 %v1509_v3, %v7494_v60  ;;  %5320 = vmatprep.subr.mxu1 %v7492_v36  ;;  %v9726_v32 = vand.u32 4294901760, %v7522_v42  ;;  %v7548_v61 = vand.u32 4294901760, %v1507_v15 }
 0x2a0   :  { %9945 = vst [vmem:[#allocation58_spill] sm:$0xff] %v7537_v23  ;;  %v7552_v33 = vsub.f32 %v7426_v27, %v7448_v5  ;;  %v9947_v20 = vmov %v9944_v18  ;;  %v9948_v12 = vrot.slane %v7359_v2, 1  ;;  %v1439_v37 = vmax.f32 %v7357_v62, %v1271_v38  ;;  %5321 = vmatpush3.msra.mxu1 %v7444_v6 }
 0x2a1   :  { %9946 = vst [vmem:[#allocation59_spill] sm:$0xff] %v7548_v61  ;;  %v9730_v3 = vand.u32 4294901760, %v7482_v55  ;;  %v1504_v34 = vmax.f32 %v7533_v63, %v1444_v54  ;;  %5322 = vmatprep.subr.mxu1 %v7494_v60  ;;  %5458 = vmatprep.subr.mxu0 %v9726_v32  ;;  %v9728_v27 = vand.u32 4294901760, %v7525_v1  ;;  %v7567_v50 = vand.u32 4294901760, %v1506_v17 }
 0x2a2   :  { %v1267_v44 = vsel %vm281_vm0, %v9948_v12, %v9947_v20  ;;  %v7570_v18 = vsub.f32 %v1508_v8, %v7512_v10  ;;  %v1438_v62 = vmax.f32 %v7353_v28, %v1269_v40  ;;  %v9950_v38 = vmov %v9948_v12  ;;  %5323 = vmatpush3.msra.mxu1 %v7448_v5 }
 0x2a3   :  { %9949 = vst [vmem:[#allocation60_spill] sm:$0xff] %v7567_v50  ;;  %v9951_v20 = vrot.slane %v7355_v30, 1  ;;  %5459 = vmatpush3.msra.mxu0 %v9730_v3  ;;  %v9729_v12 = vand.u32 4294901760, %v7541_v46  ;;  %v7584_v32 = vsub.f32 %v7440_v11, %v7537_v23  ;;  %v1503_v8 = vmax.f32 %v1439_v37, %v1443_v53  ;;  %5324 = vmatprep.subr.mxu1 %v7512_v10 }
 0x2a4   :  { %v7586_v35 = vand.u32 4294901760, %v1505_v21  ;;  %5460 = vmatprep.subr.mxu0 %v9728_v27  ;;  %v9731_v28 = vand.u32 4294901760, %v7544_v39  ;;  %v7593_v40 = vsub.f32 %v1507_v15, %v7548_v61  ;;  %5325 = vmatpush3.msra.mxu1 %v7537_v23  ;;  %v9732_v11 = vand.u32 4294901760, %v7552_v33 }
 0x2a5   :  { %v1265_v54 = vsel %vm281_vm0, %v9951_v20, %v9950_v38  ;;  %v7596_v38 = vand.u32 4294901760, %v7423_v26  ;;  %v7599_v20 = vmax.f32 %v7359_v2, %v1267_v44  ;;  %5461 = vmatpush3.msra.mxu0 %v9729_v12  ;;  %v7607_v53 = vsub.f32 %v7399_v59, %v7434_v56  ;;  %v7610_v27 = vpop.f32.mrf.mxu0  ;;  %5326 = vmatprep.subr.mxu1 %v7548_v61 }
 0x2a6   :  { %9952 = vst [vmem:[#allocation61_spill] sm:$0xff] %v7586_v35  ;;  %v1502_v15 = vmax.f32 %v1438_v62, %v7476_v48  ;;  %5462 = vmatprep.subr.mxu0 %v9731_v28  ;;  %v7616_v44 = vand.u32 4294901760, %v1504_v34  ;;  %v7619_v12 = vsub.f32 %v1506_v17, %v7567_v50  ;;  %v7622_v3 = vmax.f32 %v7355_v30, %v1265_v54 }
 0x2a7   :  { %9953 = vst [vmem:[#allocation62_spill] sm:$0xff] %v7596_v38  ;;  %5327 = vmatpush3.msra.mxu1 %v7434_v56  ;;  %5463 = vmatpush3.msra.mxu0 %v9732_v11  ;;  %v7629_v48 = vand.u32 4294901760, %v7421_v25  ;;  %v7633_v28 = vsub.f32 %v7397_v43, %v7437_v58  ;;  %v1501_v17 = vmax.f32 %v7599_v20, %v1441_v29  ;;  %v7639_v30 = vpop.f32.mrf.mxu0  ;;  %v9956_v54 = vand.u32 4294901760, %v7570_v18 }
 0x2a8   :  { %9954 = vst [vmem:[#allocation63_spill] sm:$0xff] %v7616_v44  ;;  %v7637_v2 = vsub.f32 %v1505_v21, %v7586_v35  ;;  %5328 = vmatprep.subr.mxu1 %v7567_v50  ;;  %v7645_v59 = vand.u32 4294901760, %v1503_v8  ;;  %v7649_v43 = vsub.f32 %v7423_v26, %v7596_v38  ;;  %v9958_v21 = vand.u32 4294901760, %v7584_v32 }
 0x2a9   :  { %9955 = vst [vmem:[#allocation64_spill] sm:$0xff] %v7629_v48  ;;  %5464 = vmatprep.subr.mxu0 %v9956_v54  ;;  %5329 = vmatpush3.msra.mxu1 %v7437_v58  ;;  %v9959_v54 = vcombine.high %v7284_v14, %v7284_v14  ;;  %v1500_v4 = vmax.f32 %v7622_v3, %v7533_v63  ;;  %v9961_v26 = vand.u32 4294901760, %v7593_v40  ;;  %v7668_v9 = vand.u32 4294901760, %v1502_v15  ;;  %v9992_v58 = vld [vmem:[#allocation28_spill] sm:$0xff] }
 0x2aa   :  { %9957 = vst [vmem:[#allocation65_spill] sm:$0xff] %v7645_v59  ;;  %5465 = vmatpush3.msra.mxu0 %v9958_v21  ;;  %5330 = vmatprep.subr.mxu1 %v7586_v35  ;;  %v7671_v21 = vsub.f32 %v1504_v34, %v7616_v44  ;;  %v1499_v16 = vmax.f32 %v7406_v47, %v1439_v37  ;;  %v9964_v14 = vrot.slane %v7471_v22, 1  ;;  %v7687_v34 = vand.u32 4294901760, %v1501_v17 }
 0x2ab   :  { %v7660_v11 = vrot.slane %v9959_v54, %v7278_v13  ;;  %5466 = vmatprep.subr.mxu0 %v9961_v26  ;;  %9962 = vst [vmem:[#allocation67_spill] sm:$0xff] %v7668_v9  ;;  %v9963_v13 = vrot.slane %v7639_v30, 1  ;;  %5331 = vmatpush3.msra.mxu1 %v7596_v38  ;;  %v9965_v54 = vand.u32 4294901760, %v7607_v53  ;;  %v9736_v26 = vand.u32 4294901760, %v7633_v28 }
 0x2ac   :  { %v7685_v29 = vsub.f32 %v7421_v25, %v7629_v48  ;;  %9966 = vst [vmem:[#allocation68_spill] sm:$0xff] %v7687_v34  ;;  %5332 = vmatprep.subr.mxu1 %v7616_v44  ;;  %v9968_v37 = vand.u32 4294901760, %v7619_v12  ;;  %v9741_v25 = vand.u32 4294901760, %v7649_v43  ;;  %v9984_v44 = vld [vmem:[#allocation32_spill] sm:$0xff]  ;;  %v10015_v60 = vand.u32 4294901760, %v7584_v32 }
 0x2ad   :  { %9960 = vst [vmem:[#allocation66_spill] sm:$0xff] %v7660_v11  ;;  %v1303_v63 = vsel %vm281_vm0, %v9964_v14, %v9963_v13  ;;  %5467 = vmatpush3.msra.mxu0 %v9965_v54  ;;  %v9738_v13 = vand.u32 4294901760, %v7637_v2  ;;  %v7697_v14 = vsub.f32 %v1503_v8, %v7645_v59  ;;  %v1498_v54 = vmax.f32 %v7383_v7, %v1438_v62  ;;  %v9974_v7 = vld [vmem:[#allocation33_spill] sm:$0xff] }
 0x2ae   :  { %v7690_v47 = vmax.f32 %v7471_v22, %v1303_v63  ;;  %5468 = vmatprep.subr.mxu0 %v9968_v37  ;;  %5333 = vmatpush3.msra.mxu1 %v7629_v48  ;;  %v7706_v22 = vsub.f32 %v7351_v24, %v7429_v57  ;;  %v1562_v63 = vcombine.high %v7660_v11, %v7660_v11  ;;  %v7718_v62 = vand.u32 4294901760, %v1500_v4  ;;  %v7754_v48 = vpop.f32.mrf.mxu0 }
 0x2af   :  { %5469 = vmatpush3.msra.mxu0 %v9736_v26  ;;  %5334 = vmatprep.subr.mxu1 %v7645_v59  ;;  %v7721_v37 = vsub.f32 %v1502_v15, %v7668_v9  ;;  %v1482_v24 = vmax.f32 %v7311_v31, %v7326_v45  ;;  %v9971_v26 = vld [vmem:[#allocation34_spill] sm:$0xff]  ;;  %v7737_v15 = vsub.f32 %v1501_v17, %v7687_v34  ;;  %v9975_v45 = vand.u32 4294901760, %v7671_v21  ;;  %v9980_v59 = vld [vmem:[#allocation35_spill] sm:$0xff] }
 0x2b0   :  { %9967 = vst [vmem:[#allocation69_spill] sm:$0xff] %v7690_v47  ;;  %v7712_v8 = vmax.f32 %v7479_v19, %v7690_v47  ;;  %5470 = vmatprep.subr.mxu0 %v9738_v13  ;;  %9970 = vst [vmem:[#allocation71_spill] sm:$0xff] %v7718_v62  ;;  %5335 = vmatpush3.msra.mxu1 %v7429_v57  ;;  %v9973_v13 = vld [vmem:[#allocation42_spill] sm:$0xff]  ;;  %v9977_v19 = vld [vmem:[#allocation40_spill] sm:$0xff]  ;;  %v9989_v35 = vand.u32 4294901760, %v7706_v22 }
 0x2b1   :  { %5471 = vmatpush3.msra.mxu0 %v9741_v25  ;;  %v7734_v0 = vsub.f32 %v9974_v7, %v9973_v13  ;;  %5336 = vmatprep.subr.mxu1 %v7668_v9  ;;  %v7743_v25 = vand.u32 4294901760, %v1499_v16  ;;  %v7746_v11 = vand.u32 4294901760, %v9977_v19  ;;  %v9979_v57 = vld [vmem:[#allocation41_spill] sm:$0xff]  ;;  %v9981_v7 = vld [vmem:[#allocation38_spill] sm:$0xff]  ;;  %v7760_v9 = vand.u32 4294901760, %v1562_v63 }
 0x2b2   :  { %9969 = vst [vmem:[#allocation70_spill] sm:$0xff] %v7712_v8  ;;  %v7730_v8 = vand.u32 4294901760, %v9971_v26  ;;  %5472 = vmatprep.subr.mxu0 %v9975_v45  ;;  %v7750_v52 = vsub.f32 %v9980_v59, %v9979_v57  ;;  %v1497_v17 = vmax.f32 %v9981_v7, %v7599_v20  ;;  %5337 = vmatpush3.msra.mxu1 %v9973_v13  ;;  %v9982_v45 = vand.u32 4294901760, %v7685_v29  ;;  %v9985_v47 = vld [vmem:[#allocation29_spill] sm:$0xff]  ;;  %v9991_v20 = vld [vmem:[#allocation31_spill] sm:$0xff] }
 0x2b3   :  { %9976 = vst [vmem:[#allocation33_spill] sm:$0xff] %v7743_v25  ;;  %9978 = vst [vmem:[#allocation40_spill] sm:$0xff] %v7746_v11  ;;  %v1481_v38 = vmax.f32 %v9985_v47, %v9984_v44  ;;  %5338 = vmatprep.subr.mxu1 %v7687_v34  ;;  %v9986_v59 = vand.u32 4294901760, %v7697_v14  ;;  %v7768_v7 = vand.u32 4294901760, %v1498_v54  ;;  %v7771_v13 = vsub.f32 %v1500_v4, %v7718_v62 }
 0x2b4   :  { %9972 = vst [vmem:[#allocation34_spill] sm:$0xff] %v7730_v8  ;;  %5473 = vmatpush3.msra.mxu0 %v9982_v45  ;;  %9983 = vst [vmem:[#allocation35_spill] sm:$0xff] %v7760_v9  ;;  %v9988_v45 = vld [vmem:[#allocation39_spill] sm:$0xff]  ;;  %5339 = vmatpush3.msra.mxu1 %v9979_v57  ;;  %v7779_v34 = vand.u32 4294901760, %v1482_v24  ;;  %v1480_v4 = vmax.f32 %v9992_v58, %v9991_v20  ;;  %v7794_v44 = vand.u32 4294901760, %v1497_v17  ;;  %v7796_v57 = vpop.f32.mrf.mxu0  ;;  %v9998_v20 = vld [vmem:[#allocation37_spill] sm:$0xff] }
 0x2b5   :  { %5474 = vmatprep.subr.mxu0 %v9986_v59  ;;  %9987 = vst [vmem:[#allocation38_spill] sm:$0xff] %v7768_v7  ;;  %v1496_v41 = vmax.f32 %v9988_v45, %v7622_v3  ;;  %v7783_v59 = vsub.f32 %v9971_v26, %v7730_v8  ;;  %5340 = vmatprep.subr.mxu1 %v7718_v62  ;;  %v9993_v3 = vand.u32 4294901760, %v7721_v37  ;;  %v9776_v45 = vand.u32 4294901760, %v7737_v15 }
 0x2b6   :  { %5475 = vmatpush3.msra.mxu0 %v9989_v35  ;;  %9990 = vst [vmem:[#allocation32_spill] sm:$0xff] %v7779_v34  ;;  %v7792_v35 = vsub.f32 %v1499_v16, %v7743_v25  ;;  %9994 = vst [vmem:[#allocation39_spill] sm:$0xff] %v7794_v44  ;;  %5341 = vmatpush3.msra.mxu1 %v7730_v8  ;;  %v9995_v26 = vand.u32 4294901760, %v7734_v0  ;;  %v7804_v62 = vsub.f32 %v9977_v19, %v7746_v11  ;;  %v7842_v56 = vpop.f32.mrf.mxu0 }
 0x2b7   :  { %5476 = vmatprep.subr.mxu0 %v9993_v3  ;;  %v7807_v3 = vsub.f32 %v1562_v63, %v7760_v9  ;;  %v7809_v16 = vand.u32 4294901760, %v1481_v38  ;;  %5342 = vmatprep.subr.mxu1 %v7743_v25  ;;  %v9781_v8 = vand.u32 4294901760, %v7771_v13  ;;  %v9999_v50 = vand.u32 4294901760, %v9998_v20 }
 0x2b8   :  { %5477 = vmatpush3.msra.mxu0 %v9995_v26  ;;  %v7816_v26 = vsub.f32 %v1498_v54, %v7768_v7  ;;  %5343 = vmatpush3.msra.mxu1 %v7746_v11  ;;  %v10000_v63 = vand.u32 4294901760, %v7750_v52  ;;  %v7825_v25 = vand.u32 4294901760, %v1496_v41  ;;  %v10003_v11 = vand.u32 4294901760, %v7522_v42 }
 0x2b9   :  { %9996 = vst [vmem:[#allocation31_spill] sm:$0xff] %v7807_v3  ;;  %9997 = vst [vmem:[#allocation72_spill] sm:$0xff] %v7809_v16  ;;  %5478 = vmatprep.subr.mxu0 %v9776_v45  ;;  %v1672_v19 = vsub.f32 %v9998_v20, %v9999_v50  ;;  %v7828_v45 = vsub.f32 %v1482_v24, %v7779_v34  ;;  %5344 = vmatprep.subr.mxu1 %v7768_v7  ;;  %v7834_v50 = vand.u32 4294901760, %v1480_v4 }
 0x2ba   :  { %5479 = vmatpush3.msra.mxu0 %v10000_v63  ;;  %10001 = vst [vmem:[#allocation37_spill] sm:$0xff] %v7825_v25  ;;  %v1795_v63 = vsub.f32 %v7522_v42, %v10003_v11  ;;  %v7840_v9 = vsub.f32 %v1497_v17, %v7794_v44  ;;  %5345 = vmatpush3.msra.mxu1 %v7779_v34  ;;  %v10004_v24 = vand.u32 4294901760, %v7783_v59  ;;  %v10005_v54 = vand.u32 4294901760, %v7482_v55 }
 0x2bb   :  { %5480 = vmatprep.subr.mxu0 %v9781_v8  ;;  %10002 = vst [vmem:[#allocation73_spill] sm:$0xff] %v7834_v50  ;;  %v7853_v11 = vsub.f32 %v1481_v38, %v7809_v16  ;;  %5346 = vmatprep.subr.mxu1 %v7794_v44  ;;  %v10006_v17 = vand.u32 4294901760, %v7792_v35  ;;  %v9796_v34 = vand.u32 4294901760, %v7816_v26  ;;  %v1673_v23 = vand.u32 4294901760, %v1672_v19 }
 0x2bc   :  { %5481 = vmatpush3.msra.mxu0 %v10004_v24  ;;  %v1683_v7 = vsub.f32 %v7482_v55, %v10005_v54  ;;  %v10007_v24 = vand.u32 4294901760, %v7525_v1  ;;  %5347 = vmatpush3.msra.mxu1 %v7809_v16  ;;  %v10008_v54 = vand.u32 4294901760, %v7804_v62  ;;  %v7867_v61 = vsub.f32 %v1496_v41, %v7825_v25  ;;  %v7881_v16 = vpop.f32.mrf.mxu0 }
 0x2bd   :  { %5482 = vmatprep.subr.mxu0 %v10006_v17  ;;  %v10009_v44 = vand.u32 4294901760, %v7541_v46  ;;  %5348 = vmatprep.subr.mxu1 %v7825_v25  ;;  %v1796_v19 = vand.u32 4294901760, %v1795_v63  ;;  %v10011_v41 = vand.u32 4294901760, %v7828_v45 }
 0x2be   :  { %v1802_v8 = vsub.f32 %v7525_v1, %v10007_v24  ;;  %5483 = vmatpush3.msra.mxu0 %v10008_v54  ;;  %v7876_v24 = vsub.f32 %v1480_v4, %v7834_v50  ;;  %v10010_v54 = vand.u32 4294901760, %v7544_v39  ;;  %5349 = vmatpush3.msra.mxu1 %v7834_v50  ;;  %v1684_v25 = vand.u32 4294901760, %v1683_v7 }
 0x2bf   :  { %v1690_v17 = vsub.f32 %v7541_v46, %v10009_v44  ;;  %5484 = vmatprep.subr.mxu0 %v9796_v34  ;;  %v9805_v44 = vand.u32 4294901760, %v7840_v9  ;;  %v10012_v34 = vand.u32 4294901760, %v7552_v33  ;;  %v10013_v4 = vand.u32 4294901760, %v7807_v3  ;;  %1674 = vmatmul.mubr.f32.vlgmr.msra.gmra.mxu1 %v1673_v23 }
 0x2c0   :  { %v1809_v38 = vsub.f32 %v7544_v39, %v10010_v54  ;;  %5485 = vmatpush3.msra.mxu0 %v10011_v41  ;;  %5353 = vmatprep.subr.mxu1 %v1796_v19  ;;  %v9806_v54 = vand.u32 4294901760, %v7853_v11  ;;  %v1803_v5 = vand.u32 4294901760, %v1802_v8  ;;  %v10014_v50 = vand.u32 4294901760, %v7570_v18 }
 0x2c1   :  { %v1697_v63 = vsub.f32 %v7552_v33, %v10012_v34  ;;  %v2528_v10 = vsub.f32 %v7807_v3, %v10013_v4  ;;  %5486 = vmatprep.subr.mxu0 %v9805_v44  ;;  %5354 = vmatpush3.msra.mxu1 %v1684_v25  ;;  %v9809_v7 = vand.u32 4294901760, %v7867_v61  ;;  %v1691_v34 = vand.u32 4294901760, %v1690_v17  ;;  %v7909_v44 = vpop.f32.mrf.mxu0 }
 0x2c2   :  { %v1816_v41 = vsub.f32 %v7570_v18, %v10014_v50  ;;  %v1704_v4 = vsub.f32 %v7584_v32, %v10015_v60  ;;  %5487 = vmatpush3.msra.mxu0 %v9806_v54  ;;  %5355 = vmatprep.subr.mxu1 %v1803_v5  ;;  %v9810_v23 = vand.u32 4294901760, %v7876_v24  ;;  %v1810_v8 = vand.u32 4294901760, %v1809_v38 }
 0x2c3   :  { %v10016_v50 = vand.u32 4294901760, %v7593_v40  ;;  %5488 = vmatprep.subr.mxu0 %v9809_v7  ;;  %5356 = vmatpush3.msra.mxu1 %v1691_v34  ;;  %v1698_v25 = vand.u32 4294901760, %v1697_v63  ;;  %v10017_v60 = vand.u32 4294901760, %v7607_v53  ;;  %v2529_v54 = vand.u32 4294901760, %v2528_v10  ;;  %v10020_v34 = vld [vmem:[#allocation25_spill] sm:$0xff] }
 0x2c4   :  { %5489 = vmatpush3.msra.mxu0 %v9810_v23  ;;  %5357 = vmatprep.subr.mxu1 %v1810_v8  ;;  %v1817_v5 = vand.u32 4294901760, %v1816_v41  ;;  %v10018_v38 = vand.u32 4294901760, %v7619_v12  ;;  %v1705_v3 = vand.u32 4294901760, %v1704_v4  ;;  %v10019_v7 = vand.u32 4294901760, %v7633_v28  ;;  %v10022_v8 = vld [vmem:[#allocation36_spill] sm:$0xff]  ;;  %v7929_v41 = vpop.f32.mrf.mxu0 }
 0x2c5   :  { %v1823_v19 = vsub.f32 %v7593_v40, %v10016_v50  ;;  %v1711_v17 = vsub.f32 %v7607_v53, %v10017_v60  ;;  %5358 = vmatpush3.msra.mxu1 %v1698_v25  ;;  %1904 = vmatprep.mubr.f32.mxu1 %v10020_v34  ;;  %v10021_v10 = vand.u32 4294901760, %v7637_v2  ;;  %v10023_v4 = vand.u32 4294901760, %v7649_v43 }
 0x2c6   :  { %v1830_v50 = vsub.f32 %v7619_v12, %v10018_v38  ;;  %v1718_v63 = vsub.f32 %v7633_v28, %v10019_v7  ;;  %5359 = vmatprep.subr.mxu1 %v1817_v5  ;;  %2320 = vmatmul.mubr.f32.vlgmr.msra.gmra.mxu0 %v10022_v8  ;;  %v10024_v5 = vand.u32 4294901760, %v7671_v21 }
 0x2c7   :  { %v1824_v60 = vand.u32 4294901760, %v1823_v19  ;;  %v1837_v23 = vsub.f32 %v7637_v2, %v10021_v10  ;;  %5360 = vmatpush3.msra.mxu1 %v1705_v3  ;;  %v1712_v38 = vand.u32 4294901760, %v1711_v17  ;;  %v1725_v25 = vsub.f32 %v7649_v43, %v10023_v4  ;;  %2530 = vmatprep.mubr.f32.mxu0 %v2529_v54  ;;  %v7943_v4 = vpop.f32.mrf.mxu0 }
 0x2c8   :  { %v1831_v7 = vand.u32 4294901760, %v1830_v50  ;;  %v1844_v19 = vsub.f32 %v7671_v21, %v10024_v5  ;;  %v1719_v34 = vand.u32 4294901760, %v1718_v63  ;;  %v10025_v10 = vand.u32 4294901760, %v7685_v29 }
 0x2c9   :  { %5361 = vmatprep.subr.mxu1 %v1824_v60  ;;  %v1838_v3 = vand.u32 4294901760, %v1837_v23  ;;  %v10026_v17 = vand.u32 4294901760, %v7697_v14  ;;  %v1726_v54 = vand.u32 4294901760, %v1725_v25  ;;  %v10027_v50 = vand.u32 4294901760, %v7706_v22  ;;  %v7957_v36 = vpop.f32.mrf.mxu0 }
 0x2ca   :  { %5362 = vmatpush3.msra.mxu1 %v1712_v38  ;;  %v1732_v6 = vsub.f32 %v7685_v29, %v10025_v10  ;;  %v1845_v63 = vand.u32 4294901760, %v1844_v19  ;;  %v10028_v38 = vand.u32 4294901760, %v7721_v37 }
 0x2cb   :  { %5363 = vmatprep.subr.mxu1 %v1831_v7  ;;  %v1851_v58 = vsub.f32 %v7697_v14, %v10026_v17  ;;  %v1739_v60 = vsub.f32 %v7706_v22, %v10027_v50  ;;  %v10029_v7 = vand.u32 4294901760, %v7734_v0  ;;  %v7971_v47 = vpop.f32.mrf.mxu0 }
 0x2cc   :  { %5364 = vmatpush3.msra.mxu1 %v1719_v34  ;;  %v1858_v5 = vsub.f32 %v7721_v37, %v10028_v38  ;;  %v1733_v23 = vand.u32 4294901760, %v1732_v6  ;;  %v10030_v34 = vand.u32 4294901760, %v7737_v15 }
 0x2cd   :  { %5365 = vmatprep.subr.mxu1 %v1838_v3  ;;  %v1746_v10 = vsub.f32 %v7734_v0, %v10029_v7  ;;  %v1852_v17 = vand.u32 4294901760, %v1851_v58  ;;  %v1740_v19 = vand.u32 4294901760, %v1739_v60  ;;  %v10031_v3 = vand.u32 4294901760, %v7750_v52  ;;  %v7985_v49 = vpop.f32.mrf.mxu0 }
 0x2ce   :  { %5366 = vmatpush3.msra.mxu1 %v1726_v54  ;;  %v1865_v25 = vsub.f32 %v7737_v15, %v10030_v34  ;;  %v1859_v6 = vand.u32 4294901760, %v1858_v5  ;;  %v10032_v54 = vand.u32 4294901760, %v7771_v13  ;;  %v10034_v60 = vand.u32 4294901760, %v7792_v35 }
 0x2cf   :  { %5367 = vmatprep.subr.mxu1 %v1845_v63  ;;  %v1753_v50 = vsub.f32 %v7750_v52, %v10031_v3  ;;  %v1747_v58 = vand.u32 4294901760, %v1746_v10  ;;  %v10033_v63 = vand.u32 4294901760, %v7783_v59 }
 0x2d0   :  { %5368 = vmatpush3.msra.mxu1 %v1733_v23  ;;  %v1872_v38 = vsub.f32 %v7771_v13, %v10032_v54  ;;  %v1866_v34 = vand.u32 4294901760, %v1865_v25  ;;  %v1879_v23 = vsub.f32 %v7792_v35, %v10034_v60 }
 0x2d1   :  { %5369 = vmatprep.subr.mxu1 %v1852_v17  ;;  %v1760_v7 = vsub.f32 %v7783_v59, %v10033_v63  ;;  %v1754_v5 = vand.u32 4294901760, %v1753_v50  ;;  %v10035_v17 = vand.u32 4294901760, %v7804_v62  ;;  %v10038_v50 = vand.u32 4294901760, %v7840_v9 }
 0x2d2   :  { %5370 = vmatpush3.msra.mxu1 %v1740_v19  ;;  %v1873_v10 = vand.u32 4294901760, %v1872_v38  ;;  %v10036_v19 = vand.u32 4294901760, %v7816_v26  ;;  %v1880_v60 = vand.u32 4294901760, %v1879_v23 }
 0x2d3   :  { %5371 = vmatprep.subr.mxu1 %v1859_v6  ;;  %v1767_v3 = vsub.f32 %v7804_v62, %v10035_v17  ;;  %v1761_v25 = vand.u32 4294901760, %v1760_v7  ;;  %v10037_v6 = vand.u32 4294901760, %v7828_v45 }
 0x2d4   :  { %5372 = vmatpush3.msra.mxu1 %v1747_v58  ;;  %v1886_v54 = vsub.f32 %v7816_v26, %v10036_v19  ;;  %v1893_v58 = vsub.f32 %v7840_v9, %v10038_v50 }
 0x2d5   :  { %5373 = vmatprep.subr.mxu1 %v1866_v34  ;;  %v1774_v63 = vsub.f32 %v7828_v45, %v10037_v6  ;;  %v1768_v38 = vand.u32 4294901760, %v1767_v3  ;;  %v10039_v34 = vand.u32 4294901760, %v7853_v11  ;;  %v10041_v6 = vand.u32 4294901760, %v7876_v24 }
 0x2d6   :  { %5374 = vmatpush3.msra.mxu1 %v1754_v5  ;;  %v1887_v7 = vand.u32 4294901760, %v1886_v54  ;;  %v10040_v5 = vand.u32 4294901760, %v7867_v61  ;;  %v1894_v3 = vand.u32 4294901760, %v1893_v58 }
 0x2d7   :  { %5375 = vmatprep.subr.mxu1 %v1873_v10  ;;  %v1781_v17 = vsub.f32 %v7853_v11, %v10039_v34  ;;  %v7993_v10 = vpop.f32.mrf.mxu0  ;;  %v1775_v23 = vand.u32 4294901760, %v1774_v63  ;;  %v1788_v50 = vsub.f32 %v7876_v24, %v10041_v6 }
 0x2d8   :  { %5376 = vmatpush3.msra.mxu1 %v1761_v25  ;;  %v1900_v19 = vsub.f32 %v7867_v61, %v10040_v5 }
 0x2d9   :  { %5377 = vmatprep.subr.mxu1 %v1880_v60  ;;  %v1782_v25 = vand.u32 4294901760, %v1781_v17  ;;  %v7998_v60 = vpop.f32.mrf.mxu0  ;;  %v1789_v54 = vand.u32 4294901760, %v1788_v50 }
 0x2da   :  { %5378 = vmatpush3.msra.mxu1 %v1768_v38  ;;  %v1901_v34 = vand.u32 4294901760, %v1900_v19  ;;  %v10042_v38 = vld [vmem:[#allocation26_spill] sm:$0xff] }
 0x2db   :  { %5379 = vmatprep.subr.mxu1 %v1887_v7  ;;  %v8002_v63 = vpop.f32.mrf.mxu0 }
 0x2dc   :  { %5380 = vmatpush3.msra.mxu1 %v1775_v23 }
 0x2dd   :  { %5381 = vmatprep.subr.mxu1 %v1894_v3  ;;  %v8009_v58 = vpop.f32.mrf.mxu0 }
 0x2de   :  { %5382 = vmatpush3.msra.mxu1 %v1782_v25 }
 0x2df   :  { %5383 = vmatprep.subr.mxu1 %v1901_v34  ;;  %v8013_v17 = vpop.f32.mrf.mxu0 }
 0x2e0   :  { %5384 = vmatpush3.msra.mxu1 %v1789_v54 }
 0x2e1   :  { %1906 = vmatmul.mubr.f32.vlgmr.msra.gmra.mxu1 %v10022_v8  ;;  %5388 = vmatprep.subr.mxu1 %v7522_v42  ;;  %v10065_v8 = vld [vmem:[#allocation60_spill] sm:$0xff] }
 0x2e2   :  { %5389 = vmatpush3.msra.mxu1 %v7482_v55  ;;  %2041 = vmatprep.mubr.f32.mxu1 %v10042_v38  ;;  %v8019_v55 = vpop.f32.mrf.mxu0 }
 0x2e3   :  { %5390 = vmatprep.subr.mxu1 %v7525_v1  ;;  %v1308_v1 = vrot.slane %v7754_v48, 1 }
 0x2e4   :  { %5391 = vmatpush3.msra.mxu1 %v7541_v46  ;;  %v8025_v42 = vpop.f32.mrf.mxu0  ;;  %v1316_v46 = vrot.slane %v7909_v44, 1 }
 0x2e5   :  { %5392 = vmatprep.subr.mxu1 %v7544_v39  ;;  %v1324_v39 = vrot.slane %v7971_v47, 1 }
 0x2e6   :  { %5393 = vmatpush3.msra.mxu1 %v7552_v33  ;;  %v9817_v33 = vrot.slane %v7998_v60, 1 }
 0x2e7   :  { %5394 = vmatprep.subr.mxu1 %v7570_v18  ;;  %v8036_v18 = vpop.f32.mrf.mxu0 }
 0x2e8   :  { %5395 = vmatpush3.msra.mxu1 %v7584_v32  ;;  %v1306_v32 = vrot.slane %v7610_v27, 1 }
 0x2e9   :  { %5396 = vmatprep.subr.mxu1 %v7593_v40  ;;  %v1322_v40 = vrot.slane %v7943_v4, 1 }
 0x2ea   :  { %5397 = vmatpush3.msra.mxu1 %v7607_v53  ;;  %v1318_v53 = vrot.slane %v7957_v36, 1 }
 0x2eb   :  { %5398 = vmatprep.subr.mxu1 %v7619_v12  ;;  %v1314_v12 = vrot.slane %v7842_v56, 1 }
 0x2ec   :  { %5399 = vmatpush3.msra.mxu1 %v7633_v28  ;;  %v1312_v28 = vrot.slane %v7929_v41, 1  ;;  %v1319_v7 = vsel %vm281_vm0, %v1316_v46, %v1318_v53 }
 0x2ed   :  { %5400 = vmatprep.subr.mxu1 %v7637_v2  ;;  %v1310_v2 = vrot.slane %v7881_v16, 1 }
 0x2ee   :  { %5401 = vmatpush3.msra.mxu1 %v7649_v43 }
 0x2ef   :  { %5402 = vmatprep.subr.mxu1 %v7671_v21  ;;  %v1325_v21 = vsel %vm281_vm0, %v1322_v40, %v1324_v39  ;;  %v1313_v25 = vsel %vm281_vm0, %v1310_v2, %v1312_v28 }
 0x2f0   :  { %5403 = vmatpush3.msra.mxu1 %v7685_v29  ;;  %v1309_v29 = vsel %vm281_vm0, %v1306_v32, %v1308_v1  ;;  %v8069_v23 = vmax.f32 %v7943_v4, %v1325_v21  ;;  %v1463_v4 = vmax.f32 %v7909_v44, %v1319_v7  ;;  %v10048_v7 = vand.u32 4294901760, %v10042_v38  ;;  %v10051_v38 = vld [vmem:[#allocation28_spill] sm:$0xff] }
 0x2f1   :  { %5404 = vmatprep.subr.mxu1 %v7697_v14  ;;  %v1320_v14 = vrot.slane %v7985_v49, 1  ;;  %v8062_v5 = vmax.f32 %v7610_v27, %v1309_v29 }
 0x2f2   :  { %5405 = vmatpush3.msra.mxu1 %v7706_v22  ;;  %v6032_v43 = vpop.f32.mrf.mxu0  ;;  %v1327_v22 = vsel %vm281_vm0, %v1324_v39, %v9817_v33 }
 0x2f3   :  { %5406 = vmatprep.subr.mxu1 %v7721_v37  ;;  %v1323_v6 = vsel %vm281_vm0, %v1320_v14, %v1322_v40  ;;  %v8074_v50 = vmax.f32 %v7971_v47, %v1327_v22  ;;  %v1321_v34 = vsel %vm281_vm0, %v1318_v53, %v1320_v14  ;;  %v1340_v40 = vrot.slane %v8025_v42, 1 }
 0x2f4   :  { %5407 = vmatpush3.msra.mxu1 %v7734_v0  ;;  %v1317_v0 = vsel %vm281_vm0, %v1314_v12, %v1316_v46  ;;  %v1144_v37 = vpop.f32.mrf.mxu0  ;;  %v8094_v44 = vmax.f32 %v7985_v49, %v1323_v6  ;;  %v1338_v49 = vrot.slane %v8013_v17, 1 }
 0x2f5   :  { %5408 = vmatprep.subr.mxu1 %v7737_v15  ;;  %v1315_v15 = vsel %vm281_vm0, %v1312_v28, %v1314_v12  ;;  %v8066_v19 = vmax.f32 %v7842_v56, %v1317_v0  ;;  %v1336_v0 = vrot.slane %v8036_v18, 1 }
 0x2f6   :  { %5409 = vmatpush3.msra.mxu1 %v7750_v52  ;;  %v1304_v52 = vrot.slane %v7796_v57, 1  ;;  %v8079_v56 = vmax.f32 %v7929_v41, %v1315_v15  ;;  %v1341_v6 = vsel %vm281_vm0, %v1338_v49, %v1340_v40 }
 0x2f7   :  { %5410 = vmatprep.subr.mxu1 %v7771_v13  ;;  %v1311_v13 = vsel %vm281_vm0, %v1308_v1, %v1310_v2  ;;  %v10043_v1 = vld [vmem:[#allocation27_spill] sm:$0xff]  ;;  %v8091_v41 = vmax.f32 %v8066_v19, %v8069_v23  ;;  %v8105_v2 = vmax.f32 %v7957_v36, %v1321_v34  ;;  %v10046_v36 = vrot.slane %v7639_v30, 1  ;;  %v10052_v34 = vld [vmem:[#allocation46_spill] sm:$0xff] }
 0x2f8   :  { %5411 = vmatpush3.msra.mxu1 %v7783_v59  ;;  %v6033_v59 = vpop.f32.mrf.mxu0  ;;  %v10044_v46 = vrot.slane %v10043_v1, 1  ;;  %v1307_v22 = vsel %vm281_vm0, %v1304_v52, %v1306_v32  ;;  %v10050_v32 = vld [vmem:[#allocation50_spill] sm:$0xff] }
 0x2f9   :  { %5412 = vmatprep.subr.mxu1 %v7792_v35  ;;  %v1346_v35 = vrot.slane %v6032_v43, 1  ;;  %v1348_v3 = vrot.slane %v6033_v59, 1  ;;  %v8168_v1 = vmax.f32 %v7796_v57, %v1307_v22  ;;  %v1328_v22 = vrot.slane %v8009_v58, 1 }
 0x2fa   :  { %5413 = vmatpush3.msra.mxu1 %v7804_v62  ;;  %v1147_v54 = vpop.f32.mrf.mxu0  ;;  %v1342_v62 = vrot.slane %v1144_v37, 1 }
 0x2fb   :  { %5414 = vmatprep.subr.mxu1 %v7816_v26  ;;  %v1349_v47 = vsel %vm281_vm0, %v1346_v35, %v1348_v3  ;;  %v1415_v39 = vsel %vm281_vm0, %v1348_v3, %v10044_v46  ;;  %v1344_v26 = vrot.slane %v1147_v54, 1  ;;  %v1474_v46 = vmax.f32 %v8013_v17, %v1341_v6  ;;  %v10061_v6 = vld [vmem:[#allocation59_spill] sm:$0xff] }
 0x2fc   :  { %5415 = vmatpush3.msra.mxu1 %v7828_v45  ;;  %v1478_v12 = vmax.f32 %v6032_v43, %v1349_v47  ;;  %v1479_v28 = vmax.f32 %v6033_v59, %v1415_v39  ;;  %v8098_v45 = vmax.f32 %v1463_v4, %v8074_v50  ;;  %v1343_v21 = vsel %vm281_vm0, %v1340_v40, %v1342_v62  ;;  %v10055_v40 = vld [vmem:[#allocation47_spill] sm:$0xff] }
 0x2fd   :  { %5416 = vmatprep.subr.mxu1 %v7840_v9  ;;  %v1345_v53 = vsel %vm281_vm0, %v1342_v62, %v1344_v26  ;;  %v1347_v9 = vsel %vm281_vm0, %v1344_v26, %v1346_v35  ;;  %v8136_v59 = vmax.f32 %v8079_v56, %v8094_v44  ;;  %v10049_v35 = vld [vmem:[#allocation29_spill] sm:$0xff]  ;;  %v1475_v3 = vmax.f32 %v8025_v42, %v1343_v21 }
 0x2fe   :  { %5417 = vmatpush3.msra.mxu1 %v7853_v11  ;;  %v8109_v43 = vmax.f32 %v1478_v12, %v7311_v31  ;;  %v10045_v11 = vld [vmem:[#allocation30_spill] sm:$0xff]  ;;  %v8117_v14 = vmax.f32 %v1144_v37, %v1345_v53  ;;  %v1305_v31 = vsel %vm281_vm0, %v10046_v36, %v1304_v52  ;;  %v10047_v37 = vld [vmem:[#allocation48_spill] sm:$0xff]  ;;  %v1459_v52 = vmax.f32 %v7754_v48, %v1311_v13  ;;  %v10053_v13 = vld [vmem:[#allocation51_spill] sm:$0xff] }
 0x2ff   :  { %5418 = vmatprep.subr.mxu1 %v7867_v61  ;;  %v8112_v29 = vmax.f32 %v1479_v28, %v10045_v11  ;;  %v1477_v61 = vmax.f32 %v1147_v54, %v1347_v9  ;;  %v1334_v47 = vrot.slane %v8019_v55, 1  ;;  %v1339_v48 = vsel %vm281_vm0, %v1336_v0, %v1338_v49  ;;  %v10057_v11 = vld [vmem:[#allocation55_spill] sm:$0xff] }
 0x300   :  { %5419 = vmatpush3.msra.mxu1 %v7876_v24  ;;  %v1460_v24 = vmax.f32 %v7881_v16, %v1313_v25  ;;  %v8144_v16 = vand.u32 4294901760, %v8098_v45  ;;  %v8150_v25 = vmax.f32 %v8117_v14, %v10051_v38  ;;  %v8155_v54 = vand.u32 4294901760, %v8109_v43  ;;  %v10063_v38 = vld [vmem:[#allocation44_spill] sm:$0xff] }
 0x301   :  { %2044 = vmatmul.mubr.f32.vlgmr.msra.gmra.mxu1 %v9998_v20  ;;  %5423 = vmatprep.subr.mxu1 %v7505_v51  ;;  %v8129_v15 = vand.u32 4294901760, %v8112_v29  ;;  %v8140_v27 = vmax.f32 %v1477_v61, %v10049_v35  ;;  %v8165_v42 = vand.u32 4294901760, %v8091_v41  ;;  %v8171_v39 = vmax.f32 %v1475_v3, %v1479_v28 }
 0x302   :  { %5424 = vmatpush3.msra.mxu1 %v10047_v37  ;;  %2148 = vmatprep.mubr.f32.mxu1 %v10048_v7  ;;  %v8158_v62 = vmax.f32 %v1460_v24, %v8105_v2  ;;  %v8178_v53 = vmax.f32 %v1459_v52, %v1463_v4  ;;  %v8181_v9 = vand.u32 4294901760, %v8136_v59  ;;  %v1332_v49 = vrot.slane %v8002_v63, 1  ;;  %v10060_v4 = vld [vmem:[#allocation58_spill] sm:$0xff] }
 0x303   :  { %5425 = vmatprep.subr.mxu1 %v10050_v32  ;;  %5528 = vmatprep.subr.mxu0 %v8129_v15  ;;  %10054 = vst [vmem:[#allocation26_spill] sm:$0xff] %v8171_v39  ;;  %v8174_v26 = vand.u32 4294901760, %v8140_v27  ;;  %v1337_v57 = vsel %vm281_vm0, %v1334_v47, %v1336_v0  ;;  %v8189_v17 = vmax.f32 %v8062_v5, %v8066_v19  ;;  %v8197_v36 = vand.u32 4294901760, %v8150_v25 }
 0x304   :  { %5426 = vmatpush3.msra.mxu1 %v10052_v34  ;;  %5529 = vmatpush3.msra.mxu0 %v8144_v16  ;;  %10056 = vst [vmem:[#allocation27_spill] sm:$0xff] %v8178_v53  ;;  %v1473_v28 = vmax.f32 %v8036_v18, %v1339_v48  ;;  %v8192_v21 = vmax.f32 %v1474_v46, %v1478_v12  ;;  %v1330_v0 = vrot.slane %v7993_v10, 1  ;;  %v8205_v18 = vand.u32 4294901760, %v8158_v62 }
 0x305   :  { %5427 = vmatprep.subr.mxu1 %v10053_v13  ;;  %5530 = vmatprep.subr.mxu0 %v8155_v54  ;;  %10058 = vst [vmem:[#allocation30_spill] sm:$0xff] %v8189_v17  ;;  %v1335_v7 = vsel %vm281_vm0, %v1332_v49, %v1334_v47  ;;  %v1472_v19 = vmax.f32 %v8019_v55, %v1337_v57  ;;  %v8209_v12 = vand.u32 4294901760, %v8171_v39  ;;  %v8224_v55 = vand.u32 4294901760, %v8178_v53  ;;  %v10068_v39 = vld [vmem:[#allocation45_spill] sm:$0xff] }
 0x306   :  { %5428 = vmatpush3.msra.mxu1 %v10055_v40  ;;  %5531 = vmatpush3.msra.mxu0 %v8165_v42  ;;  %10059 = vst [vmem:[#allocation48_spill] sm:$0xff] %v8192_v21  ;;  %v8211_v35 = vmax.f32 %v1473_v28, %v1477_v61  ;;  %v1456_v47 = vmax.f32 %v7639_v30, %v1305_v31  ;;  %v8233_v30 = vand.u32 4294901760, %v8192_v21  ;;  %v10072_v21 = vld [vmem:[#allocation62_spill] sm:$0xff] }
 0x307   :  { %5429 = vmatprep.subr.mxu1 %v10057_v11  ;;  %5532 = vmatprep.subr.mxu0 %v8174_v26  ;;  %v8218_v48 = vmax.f32 %v8168_v1, %v8079_v56  ;;  %v1333_v33 = vsel %vm281_vm0, %v1330_v0, %v1332_v49  ;;  %10066 = vst [vmem:[#allocation28_spill] sm:$0xff] %v8224_v55  ;;  %v10070_v49 = vld [vmem:[#allocation61_spill] sm:$0xff] }
 0x308   :  { %5430 = vmatpush3.msra.mxu1 %v10060_v4  ;;  %5533 = vmatpush3.msra.mxu0 %v8181_v9  ;;  %10062 = vst [vmem:[#allocation29_spill] sm:$0xff] %v8211_v35  ;;  %v1471_v61 = vmax.f32 %v8002_v63, %v1335_v7  ;;  %v8228_v57 = vmax.f32 %v1472_v19, %v8117_v14  ;;  %v8241_v63 = vand.u32 4294901760, %v8189_v17  ;;  %v8247_v53 = vand.u32 4294901760, %v8211_v35  ;;  %v10079_v35 = vld [vmem:[#allocation64_spill] sm:$0xff] }
 0x309   :  { %5431 = vmatprep.subr.mxu1 %v10061_v6  ;;  %5534 = vmatprep.subr.mxu0 %v8197_v36  ;;  %10064 = vst [vmem:[#allocation50_spill] sm:$0xff] %v8218_v48  ;;  %v8235_v56 = vmax.f32 %v1456_v47, %v1460_v24  ;;  %v1331_v31 = vsel %vm281_vm0, %v1328_v22, %v1330_v0  ;;  %v10073_v24 = vld [vmem:[#allocation69_spill] sm:$0xff]  ;;  %v10076_v17 = vrot.slane %v7998_v60, 1 }
 0x30a   :  { %5432 = vmatpush3.msra.mxu1 %v10063_v38  ;;  %5535 = vmatpush3.msra.mxu0 %v8205_v18  ;;  %10067 = vst [vmem:[#allocation46_spill] sm:$0xff] %v8228_v57  ;;  %v1470_v14 = vmax.f32 %v7993_v10, %v1333_v33  ;;  %v8244_v7 = vmax.f32 %v1471_v61, %v1475_v3  ;;  %v10077_v10 = vld [vmem:[#allocation63_spill] sm:$0xff] }
 0x30b   :  { %5433 = vmatprep.subr.mxu1 %v10065_v8  ;;  %5536 = vmatprep.subr.mxu0 %v8209_v12  ;;  %10069 = vst [vmem:[#allocation51_spill] sm:$0xff] %v8235_v56  ;;  %v8252_v0 = vmax.f32 %v10073_v24, %v1459_v52  ;;  %v1469_v33 = vmax.f32 %v8009_v58, %v1331_v31  ;;  %v8268_v52 = vand.u32 4294901760, %v8228_v57  ;;  %v10081_v24 = vld [vmem:[#allocation49_spill] sm:$0xff]  ;;  %v10086_v31 = vld [vmem:[#allocation43_spill] sm:$0xff] }
 0x30c   :  { %5434 = vmatpush3.msra.mxu1 %v10068_v39  ;;  %5537 = vmatpush3.msra.mxu0 %v8224_v55  ;;  %10071 = vst [vmem:[#allocation47_spill] sm:$0xff] %v8244_v7  ;;  %v1329_v55 = vsel %vm281_vm0, %v10076_v17, %v1328_v22  ;;  %v8263_v3 = vmax.f32 %v1470_v14, %v1474_v46  ;;  %v10083_v17 = vld [vmem:[#allocation65_spill] sm:$0xff]  ;;  %v8277_v22 = vand.u32 4294901760, %v8235_v56  ;;  %v8285_v57 = vand.u32 4294901760, %v8244_v7  ;;  %v10092_v56 = vld [vmem:[#allocation67_spill] sm:$0xff] }
 0x30d   :  { %5435 = vmatprep.subr.mxu1 %v10070_v49  ;;  %5538 = vmatprep.subr.mxu0 %v8233_v30  ;;  %10074 = vst [vmem:[#allocation55_spill] sm:$0xff] %v8252_v0  ;;  %v8255_v49 = vand.u32 4294901760, %v8218_v48  ;;  %10080 = vst [vmem:[#allocation44_spill] sm:$0xff] %v8268_v52  ;;  %v8272_v48 = vmax.f32 %v10081_v24, %v8062_v5  ;;  %v1468_v58 = vmax.f32 %v7998_v60, %v1329_v55  ;;  %v10088_v5 = vld [vmem:[#allocation66_spill] sm:$0xff]  ;;  %vm4688_vm0 = vcmask 1041409  }
 0x30e   :  { %5436 = vmatpush3.msra.mxu1 %v10072_v21  ;;  %5539 = vmatpush3.msra.mxu0 %v8241_v63  ;;  %10078 = vst [vmem:[#allocation59_spill] sm:$0xff] %v8263_v3  ;;  %10084 = vst [vmem:[#allocation45_spill] sm:$0xff] %v8277_v22  ;;  %v8280_v46 = vmax.f32 %v1469_v33, %v1473_v28  ;;  %v8288_v24 = vand.u32 4294901760, %v10088_v5  ;;  %v8297_v60 = vand.u32 4294901760, %v8252_v0  ;;  %v10095_v55 = vld [vmem:[#allocation42_spill] sm:$0xff]  ;;  %v8304_v7 = vand.u32 4294901760, %v8263_v3 }
 0x30f   :  { %10075 = vst [vmem:[#allocation58_spill] sm:$0xff] %v8255_v49  ;;  %5437 = vmatprep.subr.mxu1 %v10077_v10  ;;  %5540 = vmatprep.subr.mxu0 %v8247_v53  ;;  %10082 = vst [vmem:[#allocation60_spill] sm:$0xff] %v8272_v48  ;;  %v8299_v28 = vmax.f32 %v1468_v58, %v1472_v19  ;;  %v8315_v19 = vmax.f32 %v8074_v50, %v1471_v61  ;;  %v10106_v3 = vld [vmem:[#allocation71_spill] sm:$0xff]  ;;  %v10108_v61 = vld [vmem:[#allocation34_spill] sm:$0xff] }
 0x310   :  { %5438 = vmatpush3.msra.mxu1 %v10079_v35  ;;  %5541 = vmatpush3.msra.mxu0 %v8255_v49  ;;  %10085 = vst [vmem:[#allocation62_spill] sm:$0xff] %v8280_v46  ;;  %10087 = vst [vmem:[#allocation69_spill] sm:$0xff] %v8285_v57  ;;  %v8318_v0 = vand.u32 4294901760, %v8280_v46  ;;  %v8332_v50 = vmax.f32 %v8069_v23, %v1470_v14  ;;  %v10121_v14 = vld [vmem:[#allocation52_spill] sm:$0xff] }
 0x311   :  { %5439 = vmatprep.subr.mxu1 %v10083_v17  ;;  %5542 = vmatprep.subr.mxu0 %v8268_v52  ;;  %10089 = vst [vmem:[#allocation63_spill] sm:$0xff] %v8288_v24  ;;  %v10090_v17 = vld [vmem:[#allocation54_spill] sm:$0xff]  ;;  %10093 = vst [vmem:[#allocation49_spill] sm:$0xff] %v8297_v60  ;;  %v10097_v52 = vld [vmem:[#allocation53_spill] sm:$0xff]  ;;  %v8337_v46 = vand.u32 4294901760, %v8299_v28  ;;  %v8350_v23 = vand.u32 4294901760, %v8315_v19 }
 0x312   :  { %5440 = vmatpush3.msra.mxu1 %v10086_v31  ;;  %v8292_v49 = vmax.f32 %v10090_v17, %v8168_v1  ;;  %5543 = vmatpush3.msra.mxu0 %v8277_v22  ;;  %10094 = vst [vmem:[#allocation66_spill] sm:$0xff] %v8299_v28  ;;  %10096 = vst [vmem:[#allocation54_spill] sm:$0xff] %v8304_v7  ;;  %v8307_v31 = vmax.f32 %v10097_v52, %v1456_v47  ;;  %v10099_v1 = vld [vmem:[#allocation68_spill] sm:$0xff]  ;;  %v8312_v17 = vand.u32 4294901760, %v8272_v48  ;;  %v10110_v48 = vld [vmem:[#allocation33_spill] sm:$0xff] }
 0x313   :  { %5441 = vmatprep.subr.mxu1 %v10092_v56  ;;  %5544 = vmatprep.subr.mxu0 %v8285_v57  ;;  %10101 = vst [vmem:[#allocation53_spill] sm:$0xff] %v8315_v19  ;;  %10102 = vst [vmem:[#allocation68_spill] sm:$0xff] %v8318_v0  ;;  %v10103_v57 = vld [vmem:[#allocation41_spill] sm:$0xff]  ;;  %v8324_v47 = vsub.f32 %v10088_v5, %v8288_v24  ;;  %v8345_v24 = vmax.f32 %v8094_v44, %v1469_v33  ;;  %v10115_v28 = vld [vmem:[#allocation38_spill] sm:$0xff]  ;;  %v8361_v44 = vand.u32 4294901760, %v8332_v50 }
 0x314   :  { %10091 = vst [vmem:[#allocation64_spill] sm:$0xff] %v8292_v49  ;;  %5442 = vmatpush3.msra.mxu1 %v10095_v55  ;;  %10098 = vst [vmem:[#allocation67_spill] sm:$0xff] %v8307_v31  ;;  %5545 = vmatpush3.msra.mxu0 %v8297_v60  ;;  %v8327_v52 = vand.u32 4294901760, %v8292_v49  ;;  %v8342_v5 = vand.u32 4294901760, %v8307_v31  ;;  %v10113_v49 = vld [vmem:[#allocation40_spill] sm:$0xff]  ;;  %v8364_v33 = vmax.f32 %v8105_v2, %v1468_v58  ;;  %v10120_v19 = vld [vmem:[#allocation39_spill] sm:$0xff] }
 0x315   :  { %5443 = vmatprep.subr.mxu1 %v10099_v1  ;;  %10100 = vst [vmem:[#allocation42_spill] sm:$0xff] %v8312_v17  ;;  %5546 = vmatprep.subr.mxu0 %v8304_v7  ;;  %10104 = vst [vmem:[#allocation41_spill] sm:$0xff] %v8324_v47  ;;  %v10118_v31 = vld [vmem:[#allocation32_spill] sm:$0xff]  ;;  %v10126_v2 = vld [vmem:[#allocation37_spill] sm:$0xff] }
 0x316   :  { %5444 = vmatpush3.msra.mxu1 %v10103_v57  ;;  %10105 = vst [vmem:[#allocation74_spill] sm:$0xff] %v8327_v52  ;;  %5547 = vmatpush3.msra.mxu0 %v8312_v17  ;;  %10107 = vst [vmem:[#allocation71_spill] sm:$0xff] %v8332_v50  ;;  %v10125_v50 = vand.u32 4294901760, %v8324_v47  ;;  %v10127_v58 = vld [vmem:[#allocation57_spill] sm:$0xff] }
 0x317   :  { %5445 = vmatprep.subr.mxu1 %v10106_v3  ;;  %5548 = vmatprep.subr.mxu0 %v8318_v0  ;;  %10109 = vst [vmem:[#allocation34_spill] sm:$0xff] %v8337_v46  ;;  %10111 = vst [vmem:[#allocation75_spill] sm:$0xff] %v8342_v5 }
 0x318   :  { %5446 = vmatpush3.msra.mxu1 %v10108_v61  ;;  %5549 = vmatpush3.msra.mxu0 %v8327_v52  ;;  %10112 = vst [vmem:[#allocation76_spill] sm:$0xff] %v8345_v24  ;;  %10114 = vst [vmem:[#allocation40_spill] sm:$0xff] %v8350_v23 }
 0x319   :  { %5447 = vmatprep.subr.mxu1 %v10110_v48  ;;  %5550 = vmatprep.subr.mxu0 %v8337_v46  ;;  %v10116_v48 = vld [vmem:[#allocation70_spill] sm:$0xff]  ;;  %10119 = vst [vmem:[#allocation32_spill] sm:$0xff] %v8361_v44 }
 0x31a   :  { %5448 = vmatpush3.msra.mxu1 %v10113_v49  ;;  %5551 = vmatpush3.msra.mxu0 %v8342_v5  ;;  %v8356_v52 = vand.u32 4294901760, %v10116_v48  ;;  %v8372_v48 = vand.u32 4294901760, %v8345_v24  ;;  %v10124_v5 = vld [vmem:[#allocation72_spill] sm:$0xff]  ;;  %v10130_v24 = vand.u32 4294901760, %v9998_v20  ;;  %v8401_v20 = vsub.f32 %v8112_v29, %v8129_v15 }
 0x31b   :  { %5449 = vmatprep.subr.mxu1 %v10115_v28  ;;  %5552 = vmatprep.subr.mxu0 %v8350_v23  ;;  %v8369_v28 = vand.u32 4294901760, %v10121_v14  ;;  %v2534_v23 = vsub.f32 %v8324_v47, %v10125_v50  ;;  %v10129_v14 = vld [vmem:[#allocation73_spill] sm:$0xff]  ;;  %v10132_v50 = vld [vmem:[#allocation56_spill] sm:$0xff]  ;;  %v8420_v29 = vsub.f32 %v8091_v41, %v8165_v42  ;;  %v8438_v41 = vsub.f32 %v8150_v25, %v8197_v36 }
 0x31c   :  { %10117 = vst [vmem:[#allocation77_spill] sm:$0xff] %v8356_v52  ;;  %5450 = vmatpush3.msra.mxu1 %v10118_v31  ;;  %5553 = vmatpush3.msra.mxu0 %v8356_v52  ;;  %10123 = vst [vmem:[#allocation78_spill] sm:$0xff] %v8372_v48  ;;  %v8382_v52 = vand.u32 4294901760, %v10127_v58  ;;  %v8395_v47 = vand.u32 4294901760, %v10132_v50  ;;  %v10135_v25 = vld [vmem:[#allocation61_spill] sm:$0xff] }
 0x31d   :  { %5451 = vmatprep.subr.mxu1 %v10120_v19  ;;  %10122 = vst [vmem:[#allocation39_spill] sm:$0xff] %v8369_v28  ;;  %5554 = vmatprep.subr.mxu0 %v8361_v44  ;;  %v8390_v44 = vand.u32 4294901760, %v8364_v33  ;;  %v2535_v58 = vand.u32 4294901760, %v2534_v23  ;;  %v10143_v23 = vld [vmem:[#allocation65_spill] sm:$0xff] }
 0x31e   :  { %5452 = vmatpush3.msra.mxu1 %v10124_v5  ;;  %5555 = vmatpush3.msra.mxu0 %v8369_v28  ;;  %10128 = vst [vmem:[#allocation72_spill] sm:$0xff] %v8382_v52  ;;  %10133 = vst [vmem:[#allocation73_spill] sm:$0xff] %v8395_v47 }
 0x31f   :  { %5453 = vmatprep.subr.mxu1 %v10126_v2  ;;  %5556 = vmatprep.subr.mxu0 %v8372_v48  ;;  %10131 = vst [vmem:[#allocation37_spill] sm:$0xff] %v8390_v44 }
 0x320   :  { %5454 = vmatpush3.msra.mxu1 %v10129_v14  ;;  %5557 = vmatpush3.msra.mxu0 %v8382_v52 }
 0x321   :  { %2152 = vmatmul.mubr.f32.vlgmr.msra.gmra.mxu1 %v10130_v24  ;;  %5493 = vmatprep.subr.mxu1 %v7505_v51  ;;  %v8409_v51 = vsub.f32 %v8098_v45, %v8144_v16  ;;  %v8426_v45 = vsub.f32 %v8140_v27, %v8174_v26  ;;  %v10134_v27 = vld [vmem:[#allocation26_spill] sm:$0xff] }
 0x322   :  { %5494 = vmatpush3.msra.mxu1 %v10047_v37  ;;  %5558 = vmatprep.subr.mxu0 %v8390_v44  ;;  %v8414_v37 = vsub.f32 %v8109_v43, %v8155_v54  ;;  %v8430_v43 = vsub.f32 %v8136_v59, %v8181_v9  ;;  %v8444_v59 = vsub.f32 %v8158_v62, %v8205_v18 }
 0x323   :  { %5495 = vmatprep.subr.mxu1 %v10050_v32  ;;  %5559 = vmatpush3.msra.mxu0 %v8395_v47  ;;  %v8450_v32 = vsub.f32 %v10134_v27, %v8209_v12  ;;  %v10146_v27 = vld [vmem:[#allocation46_spill] sm:$0xff] }
 0x324   :  { %5496 = vmatpush3.msra.mxu1 %v10052_v34  ;;  %5598 = vmatprep.subr.mxu0 %v8401_v20  ;;  %v10136_v34 = vld [vmem:[#allocation28_spill] sm:$0xff] }
 0x325   :  { %5497 = vmatprep.subr.mxu1 %v10053_v13  ;;  %2536 = vmatmul.mubr.f32.vlgmr.msra.gmra.mxu0 %v2535_v58  ;;  %v10137_v13 = vld [vmem:[#allocation27_spill] sm:$0xff]  ;;  %v10145_v58 = vld [vmem:[#allocation44_spill] sm:$0xff] }
 0x326   :  { %5498 = vmatpush3.msra.mxu1 %v10055_v40  ;;  %5599 = vmatpush3.msra.mxu0 %v8409_v51  ;;  %v8456_v40 = vsub.f32 %v10137_v13, %v10136_v34 }
 0x327   :  { %5499 = vmatprep.subr.mxu1 %v10057_v11  ;;  %5600 = vmatprep.subr.mxu0 %v8414_v37 }
 0x328   :  { %5500 = vmatpush3.msra.mxu1 %v10060_v4  ;;  %5601 = vmatpush3.msra.mxu0 %v8420_v29  ;;  %v10140_v4 = vld [vmem:[#allocation29_spill] sm:$0xff] }
 0x329   :  { %5501 = vmatprep.subr.mxu1 %v10061_v6  ;;  %5602 = vmatprep.subr.mxu0 %v8426_v45  ;;  %v8474_v6 = vsub.f32 %v10140_v4, %v8247_v53 }
 0x32a   :  { %5502 = vmatpush3.msra.mxu1 %v10063_v38  ;;  %5603 = vmatpush3.msra.mxu0 %v8430_v43  ;;  %v10142_v38 = vld [vmem:[#allocation50_spill] sm:$0xff] }
 0x32b   :  { %5503 = vmatprep.subr.mxu1 %v10065_v8  ;;  %5604 = vmatprep.subr.mxu0 %v8438_v41  ;;  %v10138_v8 = vld [vmem:[#allocation48_spill] sm:$0xff] }
 0x32c   :  { %5504 = vmatpush3.msra.mxu1 %v10068_v39  ;;  %5605 = vmatpush3.msra.mxu0 %v8444_v59  ;;  %v8462_v62 = vsub.f32 %v10138_v8, %v8233_v30  ;;  %v10139_v39 = vld [vmem:[#allocation30_spill] sm:$0xff]  ;;  %v10148_v8 = vld [vmem:[#allocation69_spill] sm:$0xff] }
 0x32d   :  { %5505 = vmatprep.subr.mxu1 %v10135_v25  ;;  %5606 = vmatprep.subr.mxu0 %v8450_v32  ;;  %v8468_v11 = vsub.f32 %v10139_v39, %v8241_v63  ;;  %v8486_v25 = vsub.f32 %v10146_v27, %v10145_v58  ;;  %v10149_v39 = vld [vmem:[#allocation47_spill] sm:$0xff] }
 0x32e   :  { %5506 = vmatpush3.msra.mxu1 %v10072_v21  ;;  %5607 = vmatpush3.msra.mxu0 %v8456_v40  ;;  %v10141_v21 = vld [vmem:[#allocation58_spill] sm:$0xff]  ;;  %v8498_v4 = vsub.f32 %v10149_v39, %v10148_v8  ;;  %v10155_v39 = vld [vmem:[#allocation64_spill] sm:$0xff]  ;;  %v10184_v8 = vand.u32 4294901760, %v8462_v62 }
 0x32f   :  { %5507 = vmatprep.subr.mxu1 %v10077_v10  ;;  %5608 = vmatprep.subr.mxu0 %v8462_v62  ;;  %v8478_v24 = vsub.f32 %v10142_v38, %v10141_v21  ;;  %v10144_v10 = vld [vmem:[#allocation43_spill] sm:$0xff] }
 0x330   :  { %5508 = vmatpush3.msra.mxu1 %v10079_v35  ;;  %5609 = vmatpush3.msra.mxu0 %v8468_v11  ;;  %v10147_v35 = vld [vmem:[#allocation51_spill] sm:$0xff] }
 0x331   :  { %5509 = vmatprep.subr.mxu1 %v10143_v23  ;;  %5610 = vmatprep.subr.mxu0 %v8474_v6  ;;  %v8492_v13 = vsub.f32 %v10147_v35, %v8277_v22  ;;  %v10150_v38 = vld [vmem:[#allocation55_spill] sm:$0xff]  ;;  %v10186_v22 = vand.u32 4294901760, %v8468_v11 }
 0x332   :  { %5510 = vmatpush3.msra.mxu1 %v10144_v10  ;;  %5611 = vmatpush3.msra.mxu0 %v8478_v24  ;;  %v8504_v23 = vsub.f32 %v10150_v38, %v8297_v60 }
 0x333   :  { %5511 = vmatprep.subr.mxu1 %v10092_v56  ;;  %5612 = vmatprep.subr.mxu0 %v8486_v25  ;;  %v10151_v56 = vld [vmem:[#allocation59_spill] sm:$0xff] }
 0x334   :  { %5512 = vmatpush3.msra.mxu1 %v10095_v55  ;;  %5613 = vmatpush3.msra.mxu0 %v8492_v13  ;;  %v8510_v10 = vsub.f32 %v10151_v56, %v8304_v7  ;;  %v10152_v55 = vld [vmem:[#allocation60_spill] sm:$0xff]  ;;  %v10156_v56 = vld [vmem:[#allocation33_spill] sm:$0xff] }
 0x335   :  { %5513 = vmatprep.subr.mxu1 %v10099_v1  ;;  %5614 = vmatprep.subr.mxu0 %v8498_v4  ;;  %v8516_v27 = vsub.f32 %v10152_v55, %v8312_v17  ;;  %v10153_v1 = vld [vmem:[#allocation62_spill] sm:$0xff] }
 0x336   :  { %5514 = vmatpush3.msra.mxu1 %v10103_v57  ;;  %5615 = vmatpush3.msra.mxu0 %v8504_v23  ;;  %v8522_v35 = vsub.f32 %v10153_v1, %v8318_v0  ;;  %v10154_v57 = vld [vmem:[#allocation74_spill] sm:$0xff]  ;;  %v10160_v0 = vld [vmem:[#allocation67_spill] sm:$0xff] }
 0x337   :  { %5515 = vmatprep.subr.mxu1 %v10106_v3  ;;  %5616 = vmatprep.subr.mxu0 %v8510_v10  ;;  %v8526_v38 = vsub.f32 %v10155_v39, %v10154_v57  ;;  %v10158_v39 = vld [vmem:[#allocation38_spill] sm:$0xff]  ;;  %v10159_v57 = vld [vmem:[#allocation75_spill] sm:$0xff]  ;;  %v10162_v3 = vld [vmem:[#allocation53_spill] sm:$0xff] }
 0x338   :  { %5516 = vmatpush3.msra.mxu1 %v10108_v61  ;;  %5617 = vmatpush3.msra.mxu0 %v8516_v27  ;;  %v10157_v61 = vld [vmem:[#allocation66_spill] sm:$0xff]  ;;  %v8542_v17 = vsub.f32 %v10160_v0, %v10159_v57  ;;  %v10167_v1 = vld [vmem:[#allocation71_spill] sm:$0xff] }
 0x339   :  { %5517 = vmatprep.subr.mxu1 %v10156_v56  ;;  %5618 = vmatprep.subr.mxu0 %v8522_v35  ;;  %v8535_v55 = vsub.f32 %v10157_v61, %v8337_v46  ;;  %v10164_v46 = vld [vmem:[#allocation70_spill] sm:$0xff]  ;;  %v10165_v56 = vand.u32 4294901760, %v8401_v20 }
 0x33a   :  { %5518 = vmatpush3.msra.mxu1 %v10113_v49  ;;  %5619 = vmatpush3.msra.mxu0 %v8526_v38  ;;  %v10161_v49 = vld [vmem:[#allocation40_spill] sm:$0xff] }
 0x33b   :  { %5519 = vmatprep.subr.mxu1 %v10158_v39  ;;  %5620 = vmatprep.subr.mxu0 %v8535_v55  ;;  %v8549_v61 = vsub.f32 %v10162_v3, %v10161_v49  ;;  %v10163_v39 = vld [vmem:[#allocation77_spill] sm:$0xff]  ;;  %v2657_v57 = vsub.f32 %v8401_v20, %v10165_v56  ;;  %v10166_v3 = vld [vmem:[#allocation32_spill] sm:$0xff] }
 0x33c   :  { %5520 = vmatpush3.msra.mxu1 %v10118_v31  ;;  %5621 = vmatpush3.msra.mxu0 %v8542_v17  ;;  %v8556_v0 = vsub.f32 %v10164_v46, %v10163_v39  ;;  %v8566_v49 = vsub.f32 %v10167_v1, %v10166_v3  ;;  %v10169_v56 = vld [vmem:[#allocation52_spill] sm:$0xff] }
 0x33d   :  { %5521 = vmatprep.subr.mxu1 %v10120_v19  ;;  %5622 = vmatprep.subr.mxu0 %v8549_v61  ;;  %v10168_v19 = vand.u32 4294901760, %v8409_v51  ;;  %v8576_v31 = vsub.f32 %v10169_v56, %v8369_v28  ;;  %v10173_v28 = vld [vmem:[#allocation57_spill] sm:$0xff]  ;;  %v2658_v1 = vand.u32 4294901760, %v2657_v57  ;;  %v10179_v57 = vand.u32 4294901760, %v8444_v59 }
 0x33e   :  { %5522 = vmatpush3.msra.mxu1 %v10124_v5  ;;  %5623 = vmatpush3.msra.mxu0 %v8556_v0  ;;  %v10170_v5 = vand.u32 4294901760, %v8414_v37  ;;  %v8594_v60 = vsub.f32 %v10173_v28, %v8382_v52  ;;  %v8606_v28 = vsub.f32 %v8364_v33, %v8390_v44  ;;  %v10177_v52 = vand.u32 4294901760, %v8430_v43  ;;  %v10185_v33 = vld [vmem:[#allocation41_spill] sm:$0xff] }
 0x33f   :  { %v2545_v7 = vsub.f32 %v8409_v51, %v10168_v19  ;;  %5523 = vmatprep.subr.mxu1 %v10126_v2  ;;  %5624 = vmatprep.subr.mxu0 %v8566_v49  ;;  %v10171_v19 = vld [vmem:[#allocation76_spill] sm:$0xff]  ;;  %v10172_v2 = vand.u32 4294901760, %v8420_v29  ;;  %v10182_v44 = vand.u32 4294901760, %v8456_v40 }
 0x340   :  { %v2664_v39 = vsub.f32 %v8414_v37, %v10170_v5  ;;  %5524 = vmatpush3.msra.mxu1 %v10129_v14  ;;  %v8586_v46 = vsub.f32 %v10171_v19, %v8372_v48  ;;  %5625 = vmatpush3.msra.mxu0 %v8576_v31  ;;  %v10174_v5 = vld [vmem:[#allocation25_spill] sm:$0xff]  ;;  %v10175_v14 = vand.u32 4294901760, %v8426_v45  ;;  %v8615_v48 = vsub.f32 %v10132_v50, %v8395_v47 }
 0x341   :  { %v2552_v3 = vsub.f32 %v8420_v29, %v10172_v2  ;;  %2422 = vmatprep.mubr.f32.mxu1 %v10174_v5  ;;  %v10176_v2 = vld [vmem:[#allocation36_spill] sm:$0xff]  ;;  %v2546_v56 = vand.u32 4294901760, %v2545_v7  ;;  %v2559_v5 = vsub.f32 %v8430_v43, %v10177_v52  ;;  %5563 = vmatprep.subr.mxu1 %v2658_v1  ;;  %v10178_v7 = vand.u32 4294901760, %v8438_v41 }
 0x342   :  { %v2671_v19 = vsub.f32 %v8426_v45, %v10175_v14  ;;  %5626 = vmatprep.subr.mxu0 %v8586_v46  ;;  %2424 = vmatmul.mubr.f32.vlgmr.msra.gmra.mxu1 %v10176_v2  ;;  %v2665_v14 = vand.u32 4294901760, %v2664_v39  ;;  %v2566_v1 = vsub.f32 %v8444_v59, %v10179_v57  ;;  %v10180_v47 = vand.u32 4294901760, %v8450_v32 }
 0x343   :  { %5627 = vmatpush3.msra.mxu0 %v8594_v60  ;;  %v2678_v2 = vsub.f32 %v8438_v41, %v10178_v7  ;;  %5564 = vmatpush3.msra.mxu1 %v2546_v56  ;;  %v2553_v52 = vand.u32 4294901760, %v2552_v3  ;;  %v10181_v56 = vld [vmem:[#allocation31_spill] sm:$0xff]  ;;  %v2560_v3 = vand.u32 4294901760, %v2559_v5  ;;  %v2573_v57 = vsub.f32 %v8456_v40, %v10182_v44 }
 0x344   :  { %5628 = vmatprep.subr.mxu0 %v8606_v28  ;;  %5565 = vmatprep.subr.mxu1 %v2665_v14  ;;  %v2672_v50 = vand.u32 4294901760, %v2671_v19  ;;  %v2685_v7 = vsub.f32 %v8450_v32, %v10180_v47  ;;  %v10183_v14 = vand.u32 4294901760, %v8401_v20  ;;  %v2692_v47 = vsub.f32 %v8462_v62, %v10184_v8 }
 0x345   :  { %5629 = vmatpush3.msra.mxu0 %v8615_v48  ;;  %5566 = vmatpush3.msra.mxu1 %v2553_v52  ;;  %v2679_v19 = vand.u32 4294901760, %v2678_v2  ;;  %v2705_v52 = vand.u32 4294901760, %v8486_v25  ;;  %v2567_v5 = vand.u32 4294901760, %v2566_v1  ;;  %v2580_v44 = vsub.f32 %v8468_v11, %v10186_v22 }
 0x346   :  { %2903 = vmatprep.mubr.f32.mxu0 %v10181_v56  ;;  %5668 = vmatprep.subr.mxu0 %v10183_v14  ;;  %v10187_v20 = vand.u32 4294901760, %v8409_v51  ;;  %v2686_v2 = vand.u32 4294901760, %v2685_v7  ;;  %v2712_v14 = vand.u32 4294901760, %v8498_v4  ;;  %v2574_v1 = vand.u32 4294901760, %v2573_v57 }
 0x347   :  { %5567 = vmatprep.subr.mxu1 %v2672_v50  ;;  %2906 = vmatmul.mubr.f32.vlgmr.msra.gmra.mxu0 %v10185_v33  ;;  %v10188_v50 = vand.u32 4294901760, %v8474_v6  ;;  %v10190_v22 = vand.u32 4294901760, %v8478_v24  ;;  %v2600_v51 = vand.u32 4294901760, %v8504_v23  ;;  %v2693_v7 = vand.u32 4294901760, %v2692_v47 }
 0x348   :  { %5568 = vmatpush3.msra.mxu1 %v2560_v3  ;;  %5669 = vmatpush3.msra.mxu0 %v10187_v20  ;;  %v10189_v3 = vand.u32 4294901760, %v8414_v37  ;;  %v2706_v20 = vsub.f32 %v8486_v25, %v2705_v52  ;;  %v2719_v37 = vand.u32 4294901760, %v8510_v10  ;;  %v2581_v57 = vand.u32 4294901760, %v2580_v44 }
 0x349   :  { %5569 = vmatprep.subr.mxu1 %v2679_v19  ;;  %v2699_v8 = vsub.f32 %v8474_v6, %v10188_v50  ;;  %v2587_v39 = vsub.f32 %v8478_v24, %v10190_v22  ;;  %v10191_v19 = vand.u32 4294901760, %v8420_v29  ;;  %v10193_v50 = vand.u32 4294901760, %v8492_v13 }
 0x34a   :  { %5670 = vmatprep.subr.mxu0 %v10189_v3  ;;  %5570 = vmatpush3.msra.mxu1 %v2567_v5  ;;  %v10192_v5 = vand.u32 4294901760, %v8426_v45  ;;  %v2607_v29 = vand.u32 4294901760, %v8516_v27  ;;  %v2713_v22 = vsub.f32 %v8498_v4, %v2712_v14  ;;  %v2726_v45 = vand.u32 4294901760, %v8522_v35 }
 0x34b   :  { %5671 = vmatpush3.msra.mxu0 %v10191_v19  ;;  %5571 = vmatprep.subr.mxu1 %v2686_v2  ;;  %v2594_v3 = vsub.f32 %v8492_v13, %v10193_v50  ;;  %v10194_v2 = vand.u32 4294901760, %v8430_v43  ;;  %v2700_v47 = vand.u32 4294901760, %v2699_v8  ;;  %v2588_v44 = vand.u32 4294901760, %v2587_v39 }
 0x34c   :  { %5672 = vmatprep.subr.mxu0 %v10192_v5  ;;  %5572 = vmatpush3.msra.mxu1 %v2574_v1  ;;  %v10195_v1 = vand.u32 4294901760, %v8438_v41  ;;  %v2601_v19 = vsub.f32 %v8504_v23, %v2600_v51  ;;  %v2614_v43 = vand.u32 4294901760, %v8526_v38  ;;  %v2707_v8 = vand.u32 4294901760, %v2706_v20 }
 0x34d   :  { %5673 = vmatpush3.msra.mxu0 %v10194_v2  ;;  %5573 = vmatprep.subr.mxu1 %v2693_v7  ;;  %v10196_v7 = vand.u32 4294901760, %v8444_v59  ;;  %v2720_v5 = vsub.f32 %v8510_v10, %v2719_v37  ;;  %v2733_v41 = vand.u32 4294901760, %v8535_v55  ;;  %v2595_v39 = vand.u32 4294901760, %v2594_v3 }
 0x34e   :  { %5674 = vmatprep.subr.mxu0 %v10195_v1  ;;  %5574 = vmatpush3.msra.mxu1 %v2581_v57  ;;  %v10197_v57 = vand.u32 4294901760, %v8450_v32  ;;  %v2608_v50 = vsub.f32 %v8516_v27, %v2607_v29  ;;  %v2621_v59 = vand.u32 4294901760, %v8542_v17  ;;  %v10198_v2 = vand.u32 4294901760, %v8456_v40 }
 0x34f   :  { %5675 = vmatpush3.msra.mxu0 %v10196_v7  ;;  %5575 = vmatprep.subr.mxu1 %v2700_v47  ;;  %v2714_v20 = vand.u32 4294901760, %v2713_v22  ;;  %v2727_v47 = vsub.f32 %v8522_v35, %v2726_v45  ;;  %v2740_v32 = vand.u32 4294901760, %v8549_v61  ;;  %v10199_v1 = vand.u32 4294901760, %v8462_v62 }
 0x350   :  { %5676 = vmatprep.subr.mxu0 %v10197_v57  ;;  %5576 = vmatpush3.msra.mxu1 %v2588_v44  ;;  %v2602_v3 = vand.u32 4294901760, %v2601_v19  ;;  %v2615_v44 = vsub.f32 %v8526_v38, %v2614_v43  ;;  %v2628_v40 = vand.u32 4294901760, %v8556_v0  ;;  %v10200_v7 = vand.u32 4294901760, %v8468_v11  ;;  %v10205_v38 = vld [vmem:[#allocation63_spill] sm:$0xff] }
 0x351   :  { %5677 = vmatpush3.msra.mxu0 %v10198_v2  ;;  %5577 = vmatprep.subr.mxu1 %v2707_v8  ;;  %v2721_v22 = vand.u32 4294901760, %v2720_v5  ;;  %v2734_v8 = vsub.f32 %v8535_v55, %v2733_v41  ;;  %v2747_v62 = vand.u32 4294901760, %v8566_v49  ;;  %v10201_v57 = vand.u32 4294901760, %v8474_v6 }
 0x352   :  { %5678 = vmatprep.subr.mxu0 %v10199_v1  ;;  %5578 = vmatpush3.msra.mxu1 %v2595_v39  ;;  %v2609_v19 = vand.u32 4294901760, %v2608_v50  ;;  %v2622_v39 = vsub.f32 %v8542_v17, %v2621_v59  ;;  %v2635_v2 = vand.u32 4294901760, %v8576_v31  ;;  %v10202_v11 = vand.u32 4294901760, %v8478_v24 }
 0x353   :  { %5679 = vmatpush3.msra.mxu0 %v10200_v7  ;;  %5579 = vmatprep.subr.mxu1 %v2714_v20  ;;  %v2728_v5 = vand.u32 4294901760, %v2727_v47  ;;  %v2741_v20 = vsub.f32 %v8549_v61, %v2740_v32  ;;  %v2754_v1 = vand.u32 4294901760, %v8586_v46  ;;  %v2616_v6 = vand.u32 4294901760, %v2615_v44  ;;  %v10218_v7 = vld [vmem:[#allocation32_spill] sm:$0xff] }
 0x354   :  { %5680 = vmatprep.subr.mxu0 %v10201_v57  ;;  %5580 = vmatpush3.msra.mxu1 %v2602_v3  ;;  %v2629_v50 = vsub.f32 %v8556_v0, %v2628_v40  ;;  %v2642_v17 = vand.u32 4294901760, %v8594_v60  ;;  %v10203_v3 = vand.u32 4294901760, %v8492_v13  ;;  %v2735_v24 = vand.u32 4294901760, %v2734_v8  ;;  %v10220_v8 = vld [vmem:[#allocation78_spill] sm:$0xff]  ;;  %v10222_v57 = vld [vmem:[#allocation37_spill] sm:$0xff] }
 0x355   :  { %5681 = vmatpush3.msra.mxu0 %v10202_v11  ;;  %5581 = vmatprep.subr.mxu1 %v2721_v22  ;;  %v2748_v47 = vsub.f32 %v8566_v49, %v2747_v62  ;;  %v2761_v61 = vand.u32 4294901760, %v8606_v28  ;;  %v2623_v25 = vand.u32 4294901760, %v2622_v39  ;;  %v2649_v0 = vand.u32 4294901760, %v8615_v48  ;;  %v10219_v22 = vld [vmem:[#allocation39_spill] sm:$0xff] }
 0x356   :  { %5682 = vmatprep.subr.mxu0 %v2705_v52  ;;  %5582 = vmatpush3.msra.mxu1 %v2609_v19  ;;  %v2636_v52 = vsub.f32 %v8576_v31, %v2635_v2  ;;  %v2742_v13 = vand.u32 4294901760, %v2741_v20  ;;  %v2755_v44 = vsub.f32 %v8586_v46, %v2754_v1  ;;  %v2630_v49 = vand.u32 4294901760, %v2629_v50  ;;  %v10223_v19 = vld [vmem:[#allocation73_spill] sm:$0xff] }
 0x357   :  { %5683 = vmatpush3.msra.mxu0 %v10203_v3  ;;  %5583 = vmatprep.subr.mxu1 %v2728_v5  ;;  %v2643_v4 = vsub.f32 %v8594_v60, %v2642_v17  ;;  %v2749_v31 = vand.u32 4294901760, %v2748_v47  ;;  %v2650_v46 = vsub.f32 %v8615_v48, %v2649_v0  ;;  %v10204_v48 = vld [vmem:[#allocation35_spill] sm:$0xff]  ;;  %v10206_v55 = vand.u32 4294901760, %v10181_v56  ;;  %v10208_v56 = vld [vmem:[#allocation69_spill] sm:$0xff] }
 0x358   :  { %5684 = vmatprep.subr.mxu0 %v2712_v14  ;;  %5584 = vmatpush3.msra.mxu1 %v2616_v6  ;;  %v2762_v14 = vsub.f32 %v8606_v28, %v2761_v61  ;;  %v2637_v23 = vand.u32 4294901760, %v2636_v52  ;;  %v2756_v10 = vand.u32 4294901760, %v2755_v44  ;;  %v10207_v28 = vld [vmem:[#allocation45_spill] sm:$0xff]  ;;  %v10224_v39 = vand.u32 4294901760, %v10185_v33 }
 0x359   :  { %5685 = vmatpush3.msra.mxu0 %v2600_v51  ;;  %5585 = vmatprep.subr.mxu1 %v2735_v24  ;;  %v2644_v60 = vand.u32 4294901760, %v2643_v4  ;;  %v2651_v35 = vand.u32 4294901760, %v2650_v46  ;;  %v10209_v51 = vld [vmem:[#allocation49_spill] sm:$0xff] }
 0x35a   :  { %5686 = vmatprep.subr.mxu0 %v2719_v37  ;;  %5586 = vmatpush3.msra.mxu1 %v2623_v25  ;;  %v2763_v27 = vand.u32 4294901760, %v2762_v14  ;;  %v10210_v37 = vld [vmem:[#allocation54_spill] sm:$0xff] }
 0x35b   :  { %5687 = vmatpush3.msra.mxu0 %v2607_v29  ;;  %5587 = vmatprep.subr.mxu1 %v2742_v13  ;;  %v10211_v29 = vld [vmem:[#allocation42_spill] sm:$0xff] }
 0x35c   :  { %5688 = vmatprep.subr.mxu0 %v2726_v45  ;;  %5588 = vmatpush3.msra.mxu1 %v2630_v49  ;;  %v10212_v45 = vld [vmem:[#allocation68_spill] sm:$0xff] }
 0x35d   :  { %5689 = vmatpush3.msra.mxu0 %v2614_v43  ;;  %5589 = vmatprep.subr.mxu1 %v2749_v31  ;;  %v10213_v43 = vld [vmem:[#allocation74_spill] sm:$0xff] }
 0x35e   :  { %5690 = vmatprep.subr.mxu0 %v2733_v41  ;;  %5590 = vmatpush3.msra.mxu1 %v2637_v23  ;;  %v10214_v41 = vld [vmem:[#allocation34_spill] sm:$0xff] }
 0x35f   :  { %5691 = vmatpush3.msra.mxu0 %v2621_v59  ;;  %5591 = vmatprep.subr.mxu1 %v2756_v10  ;;  %v10215_v59 = vld [vmem:[#allocation75_spill] sm:$0xff] }
 0x360   :  { %5692 = vmatprep.subr.mxu0 %v2740_v32  ;;  %5592 = vmatpush3.msra.mxu1 %v2644_v60  ;;  %v10216_v32 = vld [vmem:[#allocation40_spill] sm:$0xff] }
 0x361   :  { %5693 = vmatpush3.msra.mxu0 %v2628_v40  ;;  %5593 = vmatprep.subr.mxu1 %v2763_v27  ;;  %v10217_v40 = vld [vmem:[#allocation77_spill] sm:$0xff] }
 0x362   :  { %5694 = vmatprep.subr.mxu0 %v2747_v62  ;;  %5594 = vmatpush3.msra.mxu1 %v2651_v35  ;;  %v10221_v62 = vld [vmem:[#allocation72_spill] sm:$0xff] }
 0x363   :  { %5695 = vmatpush3.msra.mxu0 %v2635_v2  ;;  %2766 = vmatprep.mubr.f32.mxu1 %v10204_v48 }
 0x364   :  { %5696 = vmatprep.subr.mxu0 %v2754_v1  ;;  %2768 = vmatmul.mubr.f32.vlgmr.msra.gmra.mxu1 %v10205_v38 }
 0x365   :  { %5633 = vmatprep.subr.mxu1 %v8129_v15  ;;  %5697 = vmatpush3.msra.mxu0 %v2642_v17 }
 0x366   :  { %5634 = vmatpush3.msra.mxu1 %v8144_v16  ;;  %5698 = vmatprep.subr.mxu0 %v2761_v61 }
 0x367   :  { %5635 = vmatprep.subr.mxu1 %v8155_v54  ;;  %5699 = vmatpush3.msra.mxu0 %v2649_v0 }
 0x368   :  { %5636 = vmatpush3.msra.mxu1 %v8165_v42  ;;  %3010 = vmatprep.mubr.f32.mxu1 %v10206_v55 }
 0x369   :  { %5637 = vmatprep.subr.mxu1 %v8174_v26  ;;  %3180 = vmatprep.mubr.f32.mxu0 %v10204_v48 }
 0x36a   :  { %5638 = vmatpush3.msra.mxu1 %v8181_v9  ;;  %3182 = vmatmul.mubr.f32.vlgmr.msra.gmra.mxu0 %v10205_v38 }
 0x36b   :  { %5639 = vmatprep.subr.mxu1 %v8197_v36 }
 0x36c   :  { %5640 = vmatpush3.msra.mxu1 %v8205_v18 }
 0x36d   :  { %5641 = vmatprep.subr.mxu1 %v8209_v12 }
 0x36e   :  { %5642 = vmatpush3.msra.mxu1 %v10136_v34 }
 0x36f   :  { %5643 = vmatprep.subr.mxu1 %v8233_v30 }
 0x370   :  { %5644 = vmatpush3.msra.mxu1 %v8241_v63 }
 0x371   :  { %5645 = vmatprep.subr.mxu1 %v8247_v53 }
 0x372   :  { %5646 = vmatpush3.msra.mxu1 %v10141_v21 }
 0x373   :  { %5647 = vmatprep.subr.mxu1 %v10145_v58 }
 0x374   :  { %5648 = vmatpush3.msra.mxu1 %v10207_v28 }
 0x375   :  { %5649 = vmatprep.subr.mxu1 %v10208_v56 }
 0x376   :  { %5650 = vmatpush3.msra.mxu1 %v10209_v51 }
 0x377   :  { %5651 = vmatprep.subr.mxu1 %v10210_v37 }
 0x378   :  { %5652 = vmatpush3.msra.mxu1 %v10211_v29 }
 0x379   :  { %5653 = vmatprep.subr.mxu1 %v10212_v45 }
 0x37a   :  { %5654 = vmatpush3.msra.mxu1 %v10213_v43 }
 0x37b   :  { %5655 = vmatprep.subr.mxu1 %v10214_v41 }
 0x37c   :  { %5656 = vmatpush3.msra.mxu1 %v10215_v59 }
 0x37d   :  { %5657 = vmatprep.subr.mxu1 %v10216_v32 }
 0x37e   :  { %5658 = vmatpush3.msra.mxu1 %v10217_v40 }
 0x37f   :  { %5659 = vmatprep.subr.mxu1 %v10218_v7 }
 0x380   :  { %5660 = vmatpush3.msra.mxu1 %v10219_v22 }
 0x381   :  { %5661 = vmatprep.subr.mxu1 %v10220_v8 }
 0x382   :  { %5662 = vmatpush3.msra.mxu1 %v10221_v62 }
 0x383   :  { %5663 = vmatprep.subr.mxu1 %v10222_v57 }
 0x384   :  { %5664 = vmatpush3.msra.mxu1 %v10223_v19 }
 0x385   :  { %3014 = vmatmul.mubr.f32.vlgmr.msra.gmra.mxu1 %v10224_v39  ;;  %5703 = vmatprep.subr.mxu1 %v8129_v15  ;;  %v3339_v15 = vld [vmem:[%s9692_s9 + $0x78] sm:$0xff] }
 0x386   :  { %5704 = vmatpush3.msra.mxu1 %v8144_v16  ;;  %3284 = vmatprep.mubr.f32.mxu1 %v10204_v48  ;;  %v3338_v16 = vld [vmem:[%s9692_s9 + $0x70] sm:$0xff]  ;;  %v3332_v48 = vld [vmem:[%s9692_s9 + $0x40] sm:$0xff] }
 0x387   :  { %5705 = vmatprep.subr.mxu1 %v8155_v54  ;;  %v3337_v54 = vld [vmem:[%s9692_s9 + $0x68] sm:$0xff] }
 0x388   :  { %5706 = vmatpush3.msra.mxu1 %v8165_v42  ;;  %v6771_v42 = vmov 0.0  }
 0x389   :  { %5707 = vmatprep.subr.mxu1 %v8174_v26  ;;  %v8833_v26 = vand.u32 4294901760, %v3339_v15  ;;  %6034 = vmatprep.subr.mxu0 %v6771_v42 }
 0x38a   :  { %5708 = vmatpush3.msra.mxu1 %v8181_v9  ;;  %v8837_v9 = vand.u32 4294901760, %v3337_v54  ;;  %6066 = vmatprep.mubr.msk.f32.mxu0 %vm6772_vm15, %v6771_v42 }
 0x38b   :  { %5709 = vmatprep.subr.mxu1 %v8197_v36  ;;  %v3336_v36 = vld [vmem:[%s9692_s9 + $0x60] sm:$0xff]  ;;  %6035 = vmatpush3.msra.mxu0 %v8833_v26 }
 0x38c   :  { %5710 = vmatpush3.msra.mxu1 %v8205_v18  ;;  %v3335_v18 = vld [vmem:[%s9692_s9 + $0x58] sm:$0xff]  ;;  %v8865_v2 = vsub.f32 %v3337_v54, %v8837_v9  ;;  %6036 = vmatprep.subr.mxu0 %v6771_v42 }
 0x38d   :  { %5711 = vmatprep.subr.mxu1 %v8209_v12  ;;  %v3334_v12 = vld [vmem:[%s9692_s9 + $0x50] sm:$0xff] }
 0x38e   :  { %5712 = vmatpush3.msra.mxu1 %v10136_v34  ;;  %v8853_v34 = vand.u32 4294901760, %v3334_v12  ;;  %v3448_v50 = vand.u32 4294901760, %v8865_v2 }
 0x38f   :  { %5713 = vmatprep.subr.mxu1 %v8233_v30  ;;  %v8849_v30 = vand.u32 4294901760, %v3336_v36 }
 0x390   :  { %5714 = vmatpush3.msra.mxu1 %v8241_v63  ;;  %v8851_v63 = vand.u32 4294901760, %v3335_v18  ;;  %v8882_v17 = vsub.f32 %v3334_v12, %v8853_v34  ;;  %v3449_v25 = vsub.f32 %v8865_v2, %v3448_v50 }
 0x391   :  { %5715 = vmatprep.subr.mxu1 %v8247_v53  ;;  %v8835_v53 = vand.u32 4294901760, %v3338_v16  ;;  %v8871_v5 = vsub.f32 %v3336_v36, %v8849_v30 }
 0x392   :  { %5716 = vmatpush3.msra.mxu1 %v10141_v21  ;;  %v3333_v21 = vld [vmem:[%s9692_s9 + $0x48] sm:$0xff]  ;;  %v8874_v20 = vsub.f32 %v3335_v18, %v8851_v63  ;;  %v9892_v49 = vand.u32 4294901760, %v8882_v17  ;;  %v3450_v4 = vand.u32 4294901760, %v3449_v25 }
 0x393   :  { %5717 = vmatprep.subr.mxu1 %v10145_v58  ;;  %v8859_v58 = vsub.f32 %v3339_v15, %v8833_v26  ;;  %v8862_v33 = vsub.f32 %v3338_v16, %v8835_v53  ;;  %v8868_v11 = vand.u32 4294901760, %v3333_v21  ;;  %6037 = vmatpush3.msra.mxu0 %v8835_v53  ;;  %v9894_v3 = vand.u32 4294901760, %v8871_v5 }
 0x394   :  { %5718 = vmatpush3.msra.mxu1 %v10207_v28  ;;  %6038 = vmatprep.subr.mxu0 %v6771_v42  ;;  %v9893_v52 = vand.u32 4294901760, %v8874_v20  ;;  %v3470_v46 = vsub.f32 %v8882_v17, %v9892_v49 }
 0x395   :  { %5719 = vmatprep.subr.mxu1 %v10208_v56  ;;  %v3434_v1 = vand.u32 4294901760, %v8859_v58  ;;  %v3441_v6 = vand.u32 4294901760, %v8862_v33  ;;  %v8887_v24 = vsub.f32 %v3333_v21, %v8868_v11  ;;  %6039 = vmatpush3.msra.mxu0 %v8837_v9  ;;  %v3456_v44 = vsub.f32 %v8871_v5, %v9894_v3 }
 0x396   :  { %5720 = vmatpush3.msra.mxu1 %v10209_v51  ;;  %6040 = vmatprep.subr.mxu0 %v6771_v42  ;;  %v3463_v31 = vsub.f32 %v8874_v20, %v9893_v52  ;;  %v3471_v27 = vand.u32 4294901760, %v3470_v46 }
 0x397   :  { %5721 = vmatprep.subr.mxu1 %v10210_v37  ;;  %v3435_v47 = vsub.f32 %v8859_v58, %v3434_v1  ;;  %v3442_v61 = vsub.f32 %v8862_v33, %v3441_v6  ;;  %6041 = vmatpush3.msra.mxu0 %v8849_v30  ;;  %v9891_v14 = vand.u32 4294901760, %v8887_v24  ;;  %v3457_v23 = vand.u32 4294901760, %v3456_v44  ;;  %v3331_v37 = vld [vmem:[%s9692_s9 + $0x38] sm:$0xff] }
 0x398   :  { %5722 = vmatpush3.msra.mxu1 %v10211_v29  ;;  %6042 = vmatprep.subr.mxu0 %v6771_v42  ;;  %v3464_v10 = vand.u32 4294901760, %v3463_v31  ;;  %v3330_v29 = vld [vmem:[%s9692_s9 + $0x30] sm:$0xff] }
 0x399   :  { %5723 = vmatprep.subr.mxu1 %v10212_v45  ;;  %v3436_v0 = vand.u32 4294901760, %v3435_v47  ;;  %v3443_v13 = vand.u32 4294901760, %v3442_v61  ;;  %6043 = vmatpush3.msra.mxu0 %v8851_v63  ;;  %v3477_v60 = vsub.f32 %v8887_v24, %v9891_v14  ;;  %v3329_v45 = vld [vmem:[%s9692_s9 + $0x28] sm:$0xff] }
 0x39a   :  { %5724 = vmatpush3.msra.mxu1 %v10213_v43  ;;  %6044 = vmatprep.subr.mxu0 %v6771_v42  ;;  %v8954_v43 = vand.u32 4294901760, %v3331_v37 }
 0x39b   :  { %5725 = vmatprep.subr.mxu1 %v10214_v41  ;;  %6045 = vmatpush3.msra.mxu0 %v8853_v34  ;;  %v3478_v35 = vand.u32 4294901760, %v3477_v60  ;;  %v8956_v41 = vand.u32 4294901760, %v3330_v29 }
 0x39c   :  { %5726 = vmatpush3.msra.mxu1 %v10215_v59  ;;  %6046 = vmatprep.subr.mxu0 %v6771_v42  ;;  %v8958_v59 = vand.u32 4294901760, %v3329_v45  ;;  %v8986_v39 = vsub.f32 %v3331_v37, %v8954_v43 }
 0x39d   :  { %5727 = vmatprep.subr.mxu1 %v10216_v32  ;;  %6047 = vmatpush3.msra.mxu0 %v8868_v11  ;;  %v3328_v32 = vld [vmem:[%s9692_s9 + $0x20] sm:$0xff]  ;;  %v8989_v15 = vsub.f32 %v3330_v29, %v8956_v41 }
 0x39e   :  { %5728 = vmatpush3.msra.mxu1 %v10217_v40  ;;  %6048 = vmatprep.subr.mxu0 %v6771_v42  ;;  %v3327_v40 = vld [vmem:[%s9692_s9 + $0x18] sm:$0xff]  ;;  %v8992_v16 = vsub.f32 %v3329_v45, %v8958_v59  ;;  %v9889_v21 = vand.u32 4294901760, %v8986_v39 }
 0x39f   :  { %5729 = vmatprep.subr.mxu1 %v10218_v7  ;;  %v3326_v7 = vld [vmem:[%s9692_s9 + $0x10] sm:$0xff]  ;;  %v9888_v47 = vand.u32 4294901760, %v8989_v15 }
 0x3a0   :  { %5730 = vmatpush3.msra.mxu1 %v10219_v22  ;;  %v8973_v22 = vand.u32 4294901760, %v3328_v32  ;;  %v9887_v61 = vand.u32 4294901760, %v8992_v16  ;;  %v3491_v44 = vsub.f32 %v8986_v39, %v9889_v21 }
 0x3a1   :  { %5731 = vmatprep.subr.mxu1 %v10220_v8  ;;  %v8975_v8 = vand.u32 4294901760, %v3327_v40 }
 0x3a2   :  { %5732 = vmatpush3.msra.mxu1 %v10221_v62  ;;  %v8977_v62 = vand.u32 4294901760, %v3326_v7  ;;  %v8998_v36 = vsub.f32 %v3328_v32, %v8973_v22  ;;  %v3505_v31 = vsub.f32 %v8992_v16, %v9887_v61 }
 0x3a3   :  { %5733 = vmatprep.subr.mxu1 %v10222_v57  ;;  %v3325_v57 = vld [vmem:[%s9692_s9 + $0x8] sm:$0xff]  ;;  %v9001_v18 = vsub.f32 %v3327_v40, %v8975_v8 }
 0x3a4   :  { %5734 = vmatpush3.msra.mxu1 %v10223_v19  ;;  %v3324_v19 = vld [vmem:[%s9692_s9] sm:$0xff]  ;;  %v8995_v54 = vand.u32 4294901760, %v3325_v57  ;;  %v9005_v12 = vsub.f32 %v3326_v7, %v8977_v62 }
 0x3a5   :  { %3286 = vmatmul.mubr.f32.vlgmr.msra.gmra.mxu1 %v10205_v38  ;;  %6069 = vmatprep.subr.mxu1 %v6771_v42  ;;  %v8933_v38 = vand.u32 4294901760, %v3332_v48  ;;  %v9011_v25 = vand.u32 4294901760, %v3324_v19 }
 0x3a6   :  { %6070 = vmatpush3.msra.mxu1 %v3436_v0  ;;  %6101 = vmatprep.mubr.msk.f32.mxu1 %vm6772_vm15, %v6771_v42  ;;  %v9886_v0 = vand.u32 4294901760, %v8998_v36  ;;  %v9884_v46 = vand.u32 4294901760, %v9005_v12 }
 0x3a7   :  { %6071 = vmatprep.subr.mxu1 %v6771_v42  ;;  %v8936_v55 = vsub.f32 %v3332_v48, %v8933_v38  ;;  %6049 = vmatpush3.msra.mxu0 %v8933_v38  ;;  %v3506_v48 = vand.u32 4294901760, %v3505_v31 }
 0x3a8   :  { %6072 = vmatpush3.msra.mxu1 %v3443_v13  ;;  %6050 = vmatprep.subr.mxu0 %v6771_v42  ;;  %v9016_v13 = vsub.f32 %v3325_v57, %v8995_v54  ;;  %v3526_v29 = vsub.f32 %v9005_v12, %v9884_v46 }
 0x3a9   :  { %6073 = vmatprep.subr.mxu1 %v6771_v42  ;;  %v9890_v28 = vand.u32 4294901760, %v8936_v55  ;;  %6051 = vmatpush3.msra.mxu0 %v8954_v43 }
 0x3aa   :  { %6074 = vmatpush3.msra.mxu1 %v3450_v4  ;;  %6052 = vmatprep.subr.mxu0 %v6771_v42  ;;  %v3498_v4 = vsub.f32 %v8989_v15, %v9888_v47  ;;  %v3527_v7 = vand.u32 4294901760, %v3526_v29 }
 0x3ab   :  { %6075 = vmatprep.subr.mxu1 %v6771_v42  ;;  %v3484_v56 = vsub.f32 %v8936_v55, %v9890_v28  ;;  %6053 = vmatpush3.msra.mxu0 %v8956_v41 }
 0x3ac   :  { %6076 = vmatpush3.msra.mxu1 %v3457_v23  ;;  %6054 = vmatprep.subr.mxu0 %v6771_v42  ;;  %v9885_v23 = vand.u32 4294901760, %v9001_v18  ;;  %v3499_v60 = vand.u32 4294901760, %v3498_v4  ;;  %v5350_v4 = vpop.f32.mrf.mxu1 }
 0x3ad   :  { %6077 = vmatprep.subr.mxu1 %v6771_v42  ;;  %v3485_v51 = vand.u32 4294901760, %v3484_v56  ;;  %6055 = vmatpush3.msra.mxu0 %v8958_v59 }
 0x3ae   :  { %6078 = vmatpush3.msra.mxu1 %v3464_v10  ;;  %6056 = vmatprep.subr.mxu0 %v6771_v42  ;;  %v3492_v10 = vand.u32 4294901760, %v3491_v44  ;;  %v3519_v56 = vsub.f32 %v9001_v18, %v9885_v23  ;;  %v5351_v31 = vpop.f32.mrf.mxu1 }
 0x3af   :  { %6079 = vmatprep.subr.mxu1 %v6771_v42  ;;  %6057 = vmatpush3.msra.mxu0 %v8973_v22 }
 0x3b0   :  { %6080 = vmatpush3.msra.mxu1 %v3471_v27  ;;  %v3512_v27 = vsub.f32 %v8998_v36, %v9886_v0  ;;  %6058 = vmatprep.subr.mxu0 %v6771_v42  ;;  %v3520_v32 = vand.u32 4294901760, %v3519_v56 }
 0x3b1   :  { %6081 = vmatprep.subr.mxu1 %v6771_v42  ;;  %6059 = vmatpush3.msra.mxu0 %v8975_v8 }
 0x3b2   :  { %6082 = vmatpush3.msra.mxu1 %v3478_v35  ;;  %v9036_v35 = vsub.f32 %v3324_v19, %v9011_v25  ;;  %6060 = vmatprep.subr.mxu0 %v6771_v42  ;;  %v3513_v37 = vand.u32 4294901760, %v3512_v27 }
 0x3b3   :  { %6083 = vmatprep.subr.mxu1 %v6771_v42  ;;  %6061 = vmatpush3.msra.mxu0 %v8977_v62 }
 0x3b4   :  { %6084 = vmatpush3.msra.mxu1 %v3485_v51  ;;  %v9883_v51 = vand.u32 4294901760, %v9016_v13  ;;  %v9882_v45 = vand.u32 4294901760, %v9036_v35  ;;  %6062 = vmatprep.subr.mxu0 %v6771_v42 }
 0x3b5   :  { %6085 = vmatprep.subr.mxu1 %v6771_v42  ;;  %6063 = vmatpush3.msra.mxu0 %v8995_v54 }
 0x3b6   :  { %6086 = vmatpush3.msra.mxu1 %v3492_v10  ;;  %v3533_v40 = vsub.f32 %v9016_v13, %v9883_v51  ;;  %6064 = vmatprep.subr.mxu0 %v6771_v42  ;;  %v3540_v57 = vsub.f32 %v9036_v35, %v9882_v45  ;;  %v5385_v10 = vpop.f32.mrf.mxu1 }
 0x3b7   :  { %6087 = vmatprep.subr.mxu1 %v6771_v42  ;;  %6065 = vmatpush3.msra.mxu0 %v9011_v25 }
 0x3b8   :  { %6088 = vmatpush3.msra.mxu1 %v3499_v60  ;;  %6104 = vmatprep.subr.mxu0 %v6771_v42  ;;  %v3534_v19 = vand.u32 4294901760, %v3533_v40  ;;  %v3541_v44 = vand.u32 4294901760, %v3540_v57  ;;  %v5386_v60 = vpop.f32.mrf.mxu1  ;;  %v5352_v40 = vadd.f32 %v5351_v31, %v5350_v4 }
 0x3b9   :  { %6089 = vmatprep.subr.mxu1 %v6771_v42 }
 0x3ba   :  { %6090 = vmatpush3.msra.mxu1 %v3506_v48 }
 0x3bb   :  { %6091 = vmatprep.subr.mxu1 %v6771_v42 }
 0x3bc   :  { %6092 = vmatpush3.msra.mxu1 %v3513_v37  ;;  %v5387_v37 = vadd.f32 %v5386_v60, %v5385_v10 }
 0x3bd   :  { %6093 = vmatprep.subr.mxu1 %v6771_v42 }
 0x3be   :  { %6094 = vmatpush3.msra.mxu1 %v3520_v32  ;;  %v5490_v32 = vpop.f32.mrf.mxu0  ;;  %v1908_v45 = vadd.f32 %v5387_v37, %v5352_v40 }
 0x3bf   :  { %6095 = vmatprep.subr.mxu1 %v6771_v42 }
 0x3c0   :  { %6096 = vmatpush3.msra.mxu1 %v3527_v7  ;;  %v5491_v51 = vpop.f32.mrf.mxu0 }
 0x3c1   :  { %6097 = vmatprep.subr.mxu1 %v6771_v42  ;;  %v5420_v27 = vpop.f32.mrf.mxu1  ;;  %v5492_v61 = vadd.f32 %v5491_v51, %v5490_v32 }
 0x3c2   :  { %6098 = vmatpush3.msra.mxu1 %v3534_v19 }
 0x3c3   :  { %6099 = vmatprep.subr.mxu1 %v6771_v42  ;;  %v5421_v48 = vpop.f32.mrf.mxu1 }
 0x3c4   :  { %6100 = vmatpush3.msra.mxu1 %v3541_v44  ;;  %v5422_v7 = vadd.f32 %v5421_v48, %v5420_v27 }
 0x3c5   :  { %6139 = vmatprep.subr.mxu1 %v6771_v42 }
 0x3c6   :  { %v2046_v46 = vadd.f32 %v5422_v7, %v1908_v45 }
 0x3e1   :  { %v5455_v56 = vpop.f32.mrf.mxu1 }
 0x3e3   :  { %v5456_v29 = vpop.f32.mrf.mxu1 }
 0x3e4   :  { %v5457_v19 = vadd.f32 %v5456_v29, %v5455_v56 }
 0x3e5   :  { %v5560_v23 = vpop.f32.mrf.mxu0 }
 0x3e6   :  { %v2154_v0 = vadd.f32 %v5457_v19, %v2046_v46  ;;  %v5272_v19 = vld [vmem:[#allocation8] ss:$0 sm:$0xff] }
 0x3e7   :  { %v5561_v28 = vpop.f32.mrf.mxu0 }
 0x3e8   :  { %v2322_v14 = vadd.f32 %v5492_v61, %v2154_v0  ;;  %v5562_v60 = vadd.f32 %v5561_v28, %v5560_v23  ;;  %v5273_v28 = vld [vmem:[#allocation10] ss:$0 sm:$0xff] }
 0x402   :  { %v5525_v57 = vpop.f32.mrf.mxu1 }
 0x404   :  { %v5526_v44 = vpop.f32.mrf.mxu1 }
 0x405   :  { %v5527_v21 = vadd.f32 %v5526_v44, %v5525_v57  ;;  %v5275_v44 = vld [vmem:[#allocation13] ss:$0 sm:$0xff] }
 0x407   :  { %v5630_v52 = vpop.f32.mrf.mxu0  ;;  %v2426_v10 = vadd.f32 %v5527_v21, %v2322_v14 }
 0x409   :  { %v5631_v31 = vpop.f32.mrf.mxu0  ;;  %v2538_v27 = vadd.f32 %v5562_v60, %v2426_v10 }
 0x40a   :  { %v5632_v45 = vadd.f32 %v5631_v31, %v5630_v52 }
 0x424   :  { %v5595_v47 = vpop.f32.mrf.mxu1 }
 0x426   :  { %v5596_v49 = vpop.f32.mrf.mxu1 }
 0x427   :  { %v5597_v4 = vadd.f32 %v5596_v49, %v5595_v47  ;;  %v5274_v47 = vld [vmem:[#allocation11] ss:$0 sm:$0xff] }
 0x429   :  { %v2770_v37 = vadd.f32 %v5597_v4, %v2538_v27 }
 0x42a   :  { %v5700_v56 = vpop.f32.mrf.mxu0 }
 0x42b   :  { %v2908_v46 = vadd.f32 %v5632_v45, %v2770_v37 }
 0x42c   :  { %v5701_v40 = vpop.f32.mrf.mxu0 }
 0x42d   :  { %v5702_v32 = vadd.f32 %v5701_v40, %v5700_v56 }
 0x445   :  { %v5665_v3 = vpop.f32.mrf.mxu1 }
 0x447   :  { %v5666_v48 = vpop.f32.mrf.mxu1 }
 0x448   :  { %v5667_v29 = vadd.f32 %v5666_v48, %v5665_v3 }
 0x44a   :  { %v3016_v51 = vadd.f32 %v5667_v29, %v2908_v46 }
 0x44c   :  { %v3184_v61 = vadd.f32 %v5702_v32, %v3016_v51 }
 0x465   :  { %v5735_v7 = vpop.f32.mrf.mxu1 }
 0x467   :  { %v5736_v57 = vpop.f32.mrf.mxu1 }
 0x468   :  { %v5737_v0 = vadd.f32 %v5736_v57, %v5735_v7 }
 0x46a   :  { %v3288_v14 = vadd.f32 %v5737_v0, %v3184_v61 }
 0x46c   :  { %v3298_v21 = vmul.f32 %v5272_v19, %v3288_v14  ;;  %v4007_v14 = vld [vmem:[%s9695_s12 + $0x48] sm:$0xff] }
 0x46e   :  { %v3306_v49 = vadd.f32 %v5273_v28, %v3298_v21  ;;  %v9329_v28 = vand.u32 4294901760, %v4007_v14  ;;  %v4006_v21 = vld [vmem:[%s9695_s12 + $0x40] sm:$0xff] }
 0x470   :  { %v3307_v23 = vmax.f32 %v3306_v49, 0.0  ;;  %v4005_v49 = vld [vmem:[%s9695_s12 + $0x38] sm:$0xff] }
 0x472   :  { %v3315_v10 = vmul.f32 %v5274_v47, %v3307_v23  ;;  %v4004_v47 = vld [vmem:[%s9695_s12 + $0x30] sm:$0xff]  ;;  %v9341_v23 = vsub.f32 %v4007_v14, %v9329_v28 }
 0x474   :  { %v3323_v60 = vadd.f32 %v5275_v44, %v3315_v10  ;;  %v9343_v44 = vand.u32 4294901760, %v4006_v21  ;;  %v9345_v10 = vand.u32 4294901760, %v4005_v49 }
 0x476   :  { %v9069_v52 = vand.u32 4294901760, %v3323_v60 }
 0x478   :  { %v9072_v3 = vsub.f32 %v3323_v60, %v9069_v52  ;;  %6102 = vmatmul.mubr.f32.vlgmr.msra.gmra.mxu1 %v9069_v52  ;;  %v9347_v60 = vand.u32 4294901760, %v4004_v47 }
 0x479   :  { %6140 = vmatpush3.msra.mxu1 %v8833_v26  ;;  %6171 = vmatprep.mubr.msk.f32.mxu1 %vm6772_vm15, %v6771_v42 }
 0x47a   :  { %6141 = vmatprep.subr.mxu1 %v6771_v42  ;;  %v3423_v4 = vand.u32 4294901760, %v9072_v3 }
 0x47b   :  { %6142 = vmatpush3.msra.mxu1 %v8835_v53 }
 0x47c   :  { %6143 = vmatprep.subr.mxu1 %v6771_v42  ;;  %v3424_v31 = vsub.f32 %v9072_v3, %v3423_v4 }
 0x47d   :  { %6144 = vmatpush3.msra.mxu1 %v8837_v9 }
 0x47e   :  { %6145 = vmatprep.subr.mxu1 %v6771_v42  ;;  %v3425_v27 = vand.u32 4294901760, %v3424_v31  ;;  %v9359_v31 = vsub.f32 %v4004_v47, %v9347_v60 }
 0x47f   :  { %6146 = vmatpush3.msra.mxu1 %v8849_v30 }
 0x480   :  { %6147 = vmatprep.subr.mxu1 %v6771_v42  ;;  %6067 = vmatmul.mubr.f32.vlgmr.msra.gmra.mxu0 %v3425_v27 }
 0x481   :  { %6105 = vmatpush3.msra.mxu0 %v8859_v58  ;;  %6148 = vmatpush3.msra.mxu1 %v8851_v63  ;;  %v10231_v58 = vand.u32 4294901760, %v8989_v15 }
 0x482   :  { %6106 = vmatprep.subr.mxu0 %v6771_v42  ;;  %6149 = vmatprep.subr.mxu1 %v6771_v42 }
 0x483   :  { %6107 = vmatpush3.msra.mxu0 %v8862_v33  ;;  %6150 = vmatpush3.msra.mxu1 %v8853_v34  ;;  %v10232_v33 = vand.u32 4294901760, %v8992_v16 }
 0x484   :  { %6108 = vmatprep.subr.mxu0 %v6771_v42  ;;  %6151 = vmatprep.subr.mxu1 %v6771_v42 }
 0x485   :  { %6109 = vmatpush3.msra.mxu0 %v8865_v2  ;;  %6152 = vmatpush3.msra.mxu1 %v8868_v11  ;;  %v10233_v2 = vand.u32 4294901760, %v8998_v36 }
 0x486   :  { %6110 = vmatprep.subr.mxu0 %v6771_v42  ;;  %6153 = vmatprep.subr.mxu1 %v6771_v42 }
 0x487   :  { %6111 = vmatpush3.msra.mxu0 %v8871_v5  ;;  %6154 = vmatpush3.msra.mxu1 %v8933_v38 }
 0x488   :  { %6112 = vmatprep.subr.mxu0 %v6771_v42  ;;  %6155 = vmatprep.subr.mxu1 %v6771_v42 }
 0x489   :  { %6113 = vmatpush3.msra.mxu0 %v8874_v20  ;;  %6156 = vmatpush3.msra.mxu1 %v8954_v43 }
 0x48a   :  { %6114 = vmatprep.subr.mxu0 %v6771_v42  ;;  %6157 = vmatprep.subr.mxu1 %v6771_v42 }
 0x48b   :  { %6115 = vmatpush3.msra.mxu0 %v8882_v17  ;;  %6158 = vmatpush3.msra.mxu1 %v8956_v41 }
 0x48c   :  { %6116 = vmatprep.subr.mxu0 %v6771_v42  ;;  %6159 = vmatprep.subr.mxu1 %v6771_v42 }
 0x48d   :  { %6117 = vmatpush3.msra.mxu0 %v8887_v24  ;;  %6160 = vmatpush3.msra.mxu1 %v8958_v59 }
 0x48e   :  { %6118 = vmatprep.subr.mxu0 %v6771_v42  ;;  %6161 = vmatprep.subr.mxu1 %v6771_v42 }
 0x48f   :  { %6119 = vmatpush3.msra.mxu0 %v8936_v55  ;;  %6162 = vmatpush3.msra.mxu1 %v8973_v22 }
 0x490   :  { %6120 = vmatprep.subr.mxu0 %v6771_v42  ;;  %6163 = vmatprep.subr.mxu1 %v6771_v42 }
 0x491   :  { %6121 = vmatpush3.msra.mxu0 %v8986_v39  ;;  %6164 = vmatpush3.msra.mxu1 %v8975_v8 }
 0x492   :  { %6122 = vmatprep.subr.mxu0 %v6771_v42  ;;  %6165 = vmatprep.subr.mxu1 %v6771_v42 }
 0x493   :  { %6123 = vmatpush3.msra.mxu0 %v8989_v15  ;;  %6166 = vmatpush3.msra.mxu1 %v8977_v62 }
 0x494   :  { %6124 = vmatprep.subr.mxu0 %v6771_v42  ;;  %6167 = vmatprep.subr.mxu1 %v6771_v42 }
 0x495   :  { %6125 = vmatpush3.msra.mxu0 %v8992_v16  ;;  %6168 = vmatpush3.msra.mxu1 %v8995_v54 }
 0x496   :  { %6126 = vmatprep.subr.mxu0 %v6771_v42  ;;  %6169 = vmatprep.subr.mxu1 %v6771_v42 }
 0x497   :  { %6127 = vmatpush3.msra.mxu0 %v8998_v36  ;;  %6170 = vmatpush3.msra.mxu1 %v9011_v25 }
 0x498   :  { %6128 = vmatprep.subr.mxu0 %v6771_v42  ;;  %6172 = vmatmul.mubr.f32.vlgmr.msra.gmra.mxu1 %v3423_v4  ;;  %v9356_v4 = vsub.f32 %v4005_v49, %v9345_v10 }
 0x499   :  { %6209 = vmatprep.subr.mxu1 %v6771_v42  ;;  %6129 = vmatpush3.msra.mxu0 %v9001_v18 }
 0x49a   :  { %6210 = vmatpush3.msra.mxu1 %v8833_v26  ;;  %6130 = vmatprep.subr.mxu0 %v6771_v42  ;;  %v10225_v26 = vand.u32 4294901760, %v8871_v5  ;;  %v10235_v5 = vand.u32 4294901760, %v9005_v12 }
 0x49b   :  { %6211 = vmatprep.subr.mxu1 %v6771_v42  ;;  %6131 = vmatpush3.msra.mxu0 %v9005_v12 }
 0x49c   :  { %6212 = vmatpush3.msra.mxu1 %v8835_v53  ;;  %6132 = vmatprep.subr.mxu0 %v6771_v42  ;;  %v10226_v53 = vand.u32 4294901760, %v8874_v20  ;;  %v10236_v20 = vand.u32 4294901760, %v9016_v13 }
 0x49d   :  { %6213 = vmatprep.subr.mxu1 %v6771_v42  ;;  %6133 = vmatpush3.msra.mxu0 %v9016_v13 }
 0x49e   :  { %6214 = vmatpush3.msra.mxu1 %v8837_v9  ;;  %6134 = vmatprep.subr.mxu0 %v6771_v42  ;;  %v10227_v9 = vand.u32 4294901760, %v8882_v17  ;;  %v4011_v17 = vld [vmem:[%s9695_s12 + $0x68] sm:$0xff] }
 0x49f   :  { %6215 = vmatprep.subr.mxu1 %v6771_v42  ;;  %6135 = vmatpush3.msra.mxu0 %v9036_v35 }
 0x4a0   :  { %6136 = vmatprep.mubr.msk.f32.mxu0 %vm6772_vm15, %v6771_v42  ;;  %6216 = vmatpush3.msra.mxu1 %v8849_v30  ;;  %v10228_v30 = vand.u32 4294901760, %v8887_v24 }
 0x4a1   :  { %6137 = vmatmul.mubr.f32.vlgmr.msra.gmra.mxu0 %v9072_v3  ;;  %6174 = vmatprep.subr.mxu0 %v6771_v42  ;;  %v9353_v3 = vsub.f32 %v4006_v21, %v9343_v44 }
 0x4a2   :  { %6217 = vmatprep.subr.mxu1 %v6771_v42  ;;  %6175 = vmatpush3.msra.mxu0 %v3434_v1  ;;  %v10237_v1 = vand.u32 4294901760, %v9036_v35 }
 0x4a3   :  { %6218 = vmatpush3.msra.mxu1 %v8851_v63  ;;  %6176 = vmatprep.subr.mxu0 %v6771_v42  ;;  %v10229_v63 = vand.u32 4294901760, %v8936_v55  ;;  %v9249_v55 = vand.u32 4294901760, %v4011_v17 }
 0x4a4   :  { %6219 = vmatprep.subr.mxu1 %v6771_v42  ;;  %6177 = vmatpush3.msra.mxu0 %v3441_v6  ;;  %v4013_v6 = vld [vmem:[%s9695_s12 + $0x78] sm:$0xff] }
 0x4a5   :  { %6220 = vmatpush3.msra.mxu1 %v8853_v34  ;;  %6178 = vmatprep.subr.mxu0 %v6771_v42  ;;  %v10230_v34 = vand.u32 4294901760, %v8986_v39  ;;  %v9245_v24 = vand.u32 4294901760, %v4013_v6  ;;  %v9273_v16 = vsub.f32 %v4011_v17, %v9249_v55 }
 0x4a6   :  { %6221 = vmatprep.subr.mxu1 %v6771_v42  ;;  %6179 = vmatpush3.msra.mxu0 %v3448_v50  ;;  %v4012_v50 = vld [vmem:[%s9695_s12 + $0x70] sm:$0xff] }
 0x4a7   :  { %6222 = vmatpush3.msra.mxu1 %v8868_v11  ;;  %6180 = vmatprep.subr.mxu0 %v6771_v42  ;;  %v10234_v11 = vand.u32 4294901760, %v9001_v18  ;;  %v9267_v39 = vsub.f32 %v4013_v6, %v9245_v24 }
 0x4a8   :  { %6223 = vmatprep.subr.mxu1 %v6771_v42  ;;  %6181 = vmatpush3.msra.mxu0 %v10225_v26  ;;  %v4157_v26 = vand.u32 4294901760, %v9353_v3 }
 0x4a9   :  { %6224 = vmatpush3.msra.mxu1 %v8933_v38  ;;  %6182 = vmatprep.subr.mxu0 %v6771_v42  ;;  %v9247_v38 = vand.u32 4294901760, %v4012_v50  ;;  %v4108_v18 = vand.u32 4294901760, %v9267_v39 }
 0x4aa   :  { %6225 = vmatprep.subr.mxu1 %v6771_v42  ;;  %6183 = vmatpush3.msra.mxu0 %v10226_v53  ;;  %v4164_v53 = vand.u32 4294901760, %v9356_v4 }
 0x4ab   :  { %6226 = vmatpush3.msra.mxu1 %v8954_v43  ;;  %6184 = vmatprep.subr.mxu0 %v6771_v42  ;;  %v4010_v43 = vld [vmem:[%s9695_s12 + $0x60] sm:$0xff]  ;;  %v9270_v15 = vsub.f32 %v4012_v50, %v9247_v38  ;;  %v4109_v48 = vsub.f32 %v9267_v39, %v4108_v18 }
 0x4ac   :  { %6227 = vmatprep.subr.mxu1 %v6771_v42  ;;  %6185 = vmatpush3.msra.mxu0 %v10227_v9  ;;  %v9901_v9 = vand.u32 4294901760, %v9359_v31 }
 0x4ad   :  { %6228 = vmatpush3.msra.mxu1 %v8956_v41  ;;  %6186 = vmatprep.subr.mxu0 %v6771_v42  ;;  %v4009_v41 = vld [vmem:[%s9695_s12 + $0x58] sm:$0xff]  ;;  %v4115_v12 = vand.u32 4294901760, %v9270_v15  ;;  %v4110_v29 = vand.u32 4294901760, %v4109_v48 }
 0x4ae   :  { %6229 = vmatprep.subr.mxu1 %v6771_v42  ;;  %6187 = vmatpush3.msra.mxu0 %v10228_v30 }
 0x4af   :  { %6230 = vmatpush3.msra.mxu1 %v8958_v59  ;;  %6188 = vmatprep.subr.mxu0 %v6771_v42  ;;  %v4008_v59 = vld [vmem:[%s9695_s12 + $0x50] sm:$0xff]  ;;  %v4116_v56 = vsub.f32 %v9270_v15, %v4115_v12 }
 0x4b0   :  { %6231 = vmatprep.subr.mxu1 %v6771_v42  ;;  %6189 = vmatpush3.msra.mxu0 %v10229_v63  ;;  %v4158_v63 = vsub.f32 %v9353_v3, %v4157_v26 }
 0x4b1   :  { %6232 = vmatpush3.msra.mxu1 %v8973_v22  ;;  %6190 = vmatprep.subr.mxu0 %v6771_v42  ;;  %v9260_v22 = vand.u32 4294901760, %v4010_v43  ;;  %v4117_v40 = vand.u32 4294901760, %v4116_v56 }
 0x4b2   :  { %6233 = vmatprep.subr.mxu1 %v6771_v42  ;;  %6191 = vmatpush3.msra.mxu0 %v10230_v34  ;;  %v4165_v34 = vsub.f32 %v9356_v4, %v4164_v53 }
 0x4b3   :  { %6234 = vmatpush3.msra.mxu1 %v8975_v8  ;;  %6192 = vmatprep.subr.mxu0 %v6771_v42  ;;  %v9262_v8 = vand.u32 4294901760, %v4009_v41 }
 0x4b4   :  { %6235 = vmatprep.subr.mxu1 %v6771_v42  ;;  %6193 = vmatpush3.msra.mxu0 %v10231_v58  ;;  %v4172_v58 = vsub.f32 %v9359_v31, %v9901_v9 }
 0x4b5   :  { %6236 = vmatpush3.msra.mxu1 %v8977_v62  ;;  %6194 = vmatprep.subr.mxu0 %v6771_v42  ;;  %v9264_v62 = vand.u32 4294901760, %v4008_v59  ;;  %v9280_v36 = vsub.f32 %v4009_v41, %v9262_v8  ;;  %v3999_v41 = vld [vmem:[%s9695_s12 + $0x8] sm:$0xff] }
 0x4b6   :  { %6237 = vmatprep.subr.mxu1 %v6771_v42  ;;  %6195 = vmatpush3.msra.mxu0 %v10232_v33  ;;  %v4159_v33 = vand.u32 4294901760, %v4158_v63  ;;  %v9412_v56 = vand.u32 4294901760, %v3999_v41 }
 0x4b7   :  { %6238 = vmatpush3.msra.mxu1 %v8995_v54  ;;  %6196 = vmatprep.subr.mxu0 %v6771_v42  ;;  %v9277_v54 = vsub.f32 %v4010_v43, %v9260_v22  ;;  %v9288_v13 = vsub.f32 %v4008_v59, %v9264_v62  ;;  %v4136_v45 = vand.u32 4294901760, %v9280_v36  ;;  %v4000_v43 = vld [vmem:[%s9695_s12 + $0x10] sm:$0xff]  ;;  %v3998_v59 = vld [vmem:[%s9695_s12] sm:$0xff] }
 0x4b8   :  { %6239 = vmatprep.subr.mxu1 %v6771_v42  ;;  %6197 = vmatpush3.msra.mxu0 %v10233_v2  ;;  %v4166_v2 = vand.u32 4294901760, %v4165_v34  ;;  %v9410_v48 = vand.u32 4294901760, %v4000_v43 }
 0x4b9   :  { %6240 = vmatpush3.msra.mxu1 %v9011_v25  ;;  %6241 = vmatprep.mubr.msk.f32.mxu1 %vm6772_vm15, %v6771_v42  ;;  %v4122_v25 = vand.u32 4294901760, %v9273_v16  ;;  %v4129_v35 = vand.u32 4294901760, %v9277_v54  ;;  %v4143_v51 = vand.u32 4294901760, %v9288_v13  ;;  %v4137_v7 = vsub.f32 %v9280_v36, %v4136_v45 }
 0x4ba   :  { %6198 = vmatprep.subr.mxu0 %v6771_v42  ;;  %6242 = vmatmul.mubr.f32.vlgmr.msra.gmra.mxu1 %v9069_v52 }
 0x4bb   :  { %6199 = vmatpush3.msra.mxu0 %v10234_v11  ;;  %6206 = vmatprep.mubr.msk.f32.mxu0 %vm6772_vm15, %v6771_v42  ;;  %v4123_v37 = vsub.f32 %v9273_v16, %v4122_v25  ;;  %v4130_v46 = vsub.f32 %v9277_v54, %v4129_v35  ;;  %v4144_v61 = vsub.f32 %v9288_v13, %v4143_v51  ;;  %v4138_v0 = vand.u32 4294901760, %v4137_v7 }
 0x4bc   :  { %6200 = vmatprep.subr.mxu0 %v6771_v42  ;;  %6279 = vmatprep.subr.mxu1 %v6771_v42  ;;  %v4173_v11 = vand.u32 4294901760, %v4172_v58  ;;  %v9430_v7 = vsub.f32 %v3999_v41, %v9412_v56 }
 0x4bd   :  { %6201 = vmatpush3.msra.mxu0 %v10235_v5  ;;  %6311 = vmatprep.mubr.msk.f32.mxu1 %vm6772_vm15, %v6771_v42  ;;  %v4124_v32 = vand.u32 4294901760, %v4123_v37  ;;  %v4131_v57 = vand.u32 4294901760, %v4130_v46  ;;  %v4145_v19 = vand.u32 4294901760, %v4144_v61  ;;  %v4003_v5 = vld [vmem:[%s9695_s12 + $0x28] sm:$0xff]  ;;  %v9414_v37 = vand.u32 4294901760, %v3998_v59 }
 0x4be   :  { %6202 = vmatprep.subr.mxu0 %v6771_v42  ;;  %6280 = vmatpush3.msra.mxu1 %v4110_v29  ;;  %v9395_v6 = vand.u32 4294901760, %v4003_v5 }
 0x4bf   :  { %6203 = vmatpush3.msra.mxu0 %v10236_v20  ;;  %6281 = vmatprep.subr.mxu1 %v6771_v42  ;;  %v4002_v20 = vld [vmem:[%s9695_s12 + $0x20] sm:$0xff] }
 0x4c0   :  { %6204 = vmatprep.subr.mxu0 %v6771_v42  ;;  %6282 = vmatpush3.msra.mxu1 %v4117_v40  ;;  %v9397_v50 = vand.u32 4294901760, %v4002_v20  ;;  %v9417_v29 = vsub.f32 %v4003_v5, %v9395_v6 }
 0x4c1   :  { %6205 = vmatpush3.msra.mxu0 %v10237_v1  ;;  %6283 = vmatprep.subr.mxu1 %v6771_v42  ;;  %v4001_v1 = vld [vmem:[%s9695_s12 + $0x18] sm:$0xff] }
 0x4c2   :  { %6207 = vmatmul.mubr.f32.vlgmr.msra.gmra.mxu0 %v9069_v52  ;;  %6244 = vmatprep.subr.mxu0 %v6771_v42  ;;  %v4150_v52 = vand.u32 4294901760, %v9341_v23  ;;  %v9399_v17 = vand.u32 4294901760, %v4001_v1  ;;  %v9420_v40 = vsub.f32 %v4002_v20, %v9397_v50 }
 0x4c3   :  { %6276 = vmatprep.mubr.msk.f32.mxu0 %vm6772_vm15, %v6771_v42  ;;  %6245 = vmatpush3.msra.mxu0 %v9245_v24 }
 0x4c4   :  { %6246 = vmatprep.subr.mxu0 %v6771_v42  ;;  %6284 = vmatpush3.msra.mxu1 %v4124_v32  ;;  %v4151_v27 = vsub.f32 %v9341_v23, %v4150_v52  ;;  %v9423_v46 = vsub.f32 %v4001_v1, %v9399_v17  ;;  %v9427_v32 = vsub.f32 %v4000_v43, %v9410_v48  ;;  %v9899_v61 = vand.u32 4294901760, %v9420_v40 }
 0x4c5   :  { %6247 = vmatpush3.msra.mxu0 %v9247_v38  ;;  %6285 = vmatprep.subr.mxu1 %v6771_v42 }
 0x4c6   :  { %6248 = vmatprep.subr.mxu0 %v6771_v42  ;;  %6286 = vmatpush3.msra.mxu1 %v4131_v57  ;;  %v4152_v30 = vand.u32 4294901760, %v4151_v27  ;;  %v9900_v57 = vand.u32 4294901760, %v9417_v29  ;;  %v9897_v14 = vand.u32 4294901760, %v9427_v32  ;;  %v4186_v49 = vsub.f32 %v9420_v40, %v9899_v61  ;;  %v5277_v61 = vld [vmem:[#allocation16] ss:$0 sm:$0xff] }
 0x4c7   :  { %6249 = vmatpush3.msra.mxu0 %v9249_v55  ;;  %6287 = vmatprep.subr.mxu1 %v6771_v42  ;;  %v9896_v27 = vand.u32 4294901760, %v9430_v7 }
 0x4c8   :  { %6250 = vmatprep.subr.mxu0 %v6771_v42  ;;  %6288 = vmatpush3.msra.mxu1 %v4138_v0  ;;  %v9898_v0 = vand.u32 4294901760, %v9423_v46  ;;  %v4179_v21 = vsub.f32 %v9417_v29, %v9900_v57  ;;  %v4187_v63 = vand.u32 4294901760, %v4186_v49  ;;  %v4200_v34 = vsub.f32 %v9427_v32, %v9897_v14 }
 0x4c9   :  { %6251 = vmatpush3.msra.mxu0 %v9260_v22  ;;  %6289 = vmatprep.subr.mxu1 %v6771_v42 }
 0x4ca   :  { %6252 = vmatprep.subr.mxu0 %v6771_v42  ;;  %6290 = vmatpush3.msra.mxu1 %v4145_v19  ;;  %v9438_v19 = vsub.f32 %v3998_v59, %v9414_v37  ;;  %v4193_v47 = vsub.f32 %v9423_v46, %v9898_v0 }
 0x4cb   :  { %6253 = vmatpush3.msra.mxu0 %v9262_v8  ;;  %6291 = vmatprep.subr.mxu1 %v6771_v42 }
 0x4cc   :  { %6254 = vmatprep.subr.mxu0 %v6771_v42  ;;  %6292 = vmatpush3.msra.mxu1 %v4152_v30  ;;  %v4180_v30 = vand.u32 4294901760, %v4179_v21  ;;  %v9895_v58 = vand.u32 4294901760, %v9438_v19 }
 0x4cd   :  { %6255 = vmatpush3.msra.mxu0 %v9264_v62  ;;  %6293 = vmatprep.subr.mxu1 %v6771_v42 }
 0x4ce   :  { %6256 = vmatprep.subr.mxu0 %v6771_v42  ;;  %6294 = vmatpush3.msra.mxu1 %v4159_v33  ;;  %v4194_v33 = vand.u32 4294901760, %v4193_v47  ;;  %v4214_v5 = vsub.f32 %v9438_v19, %v9895_v58 }
 0x4cf   :  { %6257 = vmatpush3.msra.mxu0 %v9329_v28  ;;  %6295 = vmatprep.subr.mxu1 %v6771_v42 }
 0x4d0   :  { %6258 = vmatprep.subr.mxu0 %v6771_v42  ;;  %6296 = vmatpush3.msra.mxu1 %v4166_v2  ;;  %v4207_v2 = vsub.f32 %v9430_v7, %v9896_v27  ;;  %v4215_v1 = vand.u32 4294901760, %v4214_v5 }
 0x4d1   :  { %6259 = vmatpush3.msra.mxu0 %v9343_v44  ;;  %6297 = vmatprep.subr.mxu1 %v6771_v42 }
 0x4d2   :  { %6260 = vmatprep.subr.mxu0 %v6771_v42  ;;  %6298 = vmatpush3.msra.mxu1 %v4173_v11  ;;  %v4201_v11 = vand.u32 4294901760, %v4200_v34  ;;  %v4208_v20 = vand.u32 4294901760, %v4207_v2 }
 0x4d3   :  { %6261 = vmatpush3.msra.mxu0 %v9345_v10  ;;  %6299 = vmatprep.subr.mxu1 %v6771_v42 }
 0x4d4   :  { %6262 = vmatprep.subr.mxu0 %v6771_v42  ;;  %6300 = vmatpush3.msra.mxu1 %v4180_v30 }
 0x4d5   :  { %6263 = vmatpush3.msra.mxu0 %v9347_v60  ;;  %6301 = vmatprep.subr.mxu1 %v6771_v42 }
 0x4d6   :  { %6264 = vmatprep.subr.mxu0 %v6771_v42  ;;  %6302 = vmatpush3.msra.mxu1 %v4187_v63 }
 0x4d7   :  { %6265 = vmatpush3.msra.mxu0 %v9395_v6  ;;  %6303 = vmatprep.subr.mxu1 %v6771_v42 }
 0x4d8   :  { %6266 = vmatprep.subr.mxu0 %v6771_v42  ;;  %6304 = vmatpush3.msra.mxu1 %v4194_v33 }
 0x4d9   :  { %6267 = vmatpush3.msra.mxu0 %v9397_v50  ;;  %6305 = vmatprep.subr.mxu1 %v6771_v42 }
 0x4da   :  { %6268 = vmatprep.subr.mxu0 %v6771_v42  ;;  %6306 = vmatpush3.msra.mxu1 %v4201_v11 }
 0x4db   :  { %6269 = vmatpush3.msra.mxu0 %v9399_v17  ;;  %6307 = vmatprep.subr.mxu1 %v6771_v42 }
 0x4dc   :  { %6270 = vmatprep.subr.mxu0 %v6771_v42  ;;  %6308 = vmatpush3.msra.mxu1 %v4208_v20 }
 0x4dd   :  { %6271 = vmatpush3.msra.mxu0 %v9410_v48  ;;  %6309 = vmatprep.subr.mxu1 %v6771_v42 }
 0x4de   :  { %6272 = vmatprep.subr.mxu0 %v6771_v42  ;;  %6310 = vmatpush3.msra.mxu1 %v4215_v1  ;;  %v5276_v1 = vld [vmem:[#allocation14] ss:$0 sm:$0xff] }
 0x4df   :  { %6273 = vmatpush3.msra.mxu0 %v9412_v56  ;;  %6349 = vmatprep.subr.mxu1 %v6771_v42 }
 0x4e0   :  { %6274 = vmatprep.subr.mxu0 %v6771_v42 }
 0x4e1   :  { %6275 = vmatpush3.msra.mxu0 %v9414_v37 }
 0x4e2   :  { %6314 = vmatprep.subr.mxu0 %v6771_v42 }
 0x538   :  { %v3578_v43 = vpop.f32.mrf.mxu1 }
 0x53a   :  { %v6103_v41 = vpop.f32.mrf.mxu1 }
 0x540   :  { %v3427_v59 = vpop.f32.mrf.mxu0 }
 0x541   :  { %v3579_v33 = vadd.f32 %v3578_v43, %v3427_v59 }
 0x542   :  { %v6068_v21 = vpop.f32.mrf.mxu0 }
 0x558   :  { %v3771_v49 = vpop.f32.mrf.mxu1 }
 0x55a   :  { %v6173_v47 = vpop.f32.mrf.mxu1 }
 0x561   :  { %v3682_v30 = vpop.f32.mrf.mxu0 }
 0x562   :  { %v3683_v11 = vadd.f32 %v3682_v30, %v3579_v33 }
 0x563   :  { %v6138_v63 = vpop.f32.mrf.mxu0 }
 0x564   :  { %v3772_v5 = vadd.f32 %v3771_v49, %v3683_v11 }
 0x57a   :  { %v3977_v34 = vpop.f32.mrf.mxu1 }
 0x57c   :  { %v6243_v2 = vpop.f32.mrf.mxu1 }
 0x582   :  { %v3890_v58 = vpop.f32.mrf.mxu0 }
 0x583   :  { %v3891_v20 = vadd.f32 %v3890_v58, %v3772_v5 }
 0x584   :  { %v6208_v27 = vpop.f32.mrf.mxu0 }
 0x585   :  { %v3978_v14 = vadd.f32 %v3977_v34, %v3891_v20 }
 0x587   :  { %v3981_v0 = vmax.f32 %v3978_v14, 0.0 }
 0x589   :  { %v3989_v57 = vmul.f32 %v5276_v1, %v3981_v0 }
 0x58b   :  { %v3997_v41 = vadd.f32 %v5277_v61, %v3989_v57 }
 0x58d   :  { %v9476_v9 = vand.u32 4294901760, %v3997_v41 }
 0x58f   :  { %6312 = vmatmul.mubr.f32.vlgmr.msra.gmra.mxu1 %v9476_v9  ;;  %v9480_v21 = vsub.f32 %v3997_v41, %v9476_v9 }
 0x590   :  { %6350 = vmatpush3.msra.mxu1 %v9245_v24  ;;  %6381 = vmatprep.mubr.msk.f32.mxu1 %vm6772_vm15, %v6771_v42 }
 0x591   :  { %6351 = vmatprep.subr.mxu1 %v6771_v42  ;;  %v4097_v27 = vand.u32 4294901760, %v9480_v21 }
 0x592   :  { %6352 = vmatpush3.msra.mxu1 %v9247_v38 }
 0x593   :  { %6353 = vmatprep.subr.mxu1 %v6771_v42  ;;  %v4098_v57 = vsub.f32 %v9480_v21, %v4097_v27 }
 0x594   :  { %6354 = vmatpush3.msra.mxu1 %v9249_v55 }
 0x595   :  { %6355 = vmatprep.subr.mxu1 %v6771_v42  ;;  %v4099_v61 = vand.u32 4294901760, %v4098_v57 }
 0x596   :  { %6356 = vmatpush3.msra.mxu1 %v9260_v22 }
 0x597   :  { %6357 = vmatprep.subr.mxu1 %v6771_v42  ;;  %6277 = vmatmul.mubr.f32.vlgmr.msra.gmra.mxu0 %v4099_v61 }
 0x598   :  { %6315 = vmatpush3.msra.mxu0 %v9267_v39  ;;  %6358 = vmatpush3.msra.mxu1 %v9262_v8  ;;  %v10244_v39 = vand.u32 4294901760, %v9438_v19 }
 0x599   :  { %6316 = vmatprep.subr.mxu0 %v6771_v42  ;;  %6359 = vmatprep.subr.mxu1 %v6771_v42 }
 0x59a   :  { %6317 = vmatpush3.msra.mxu0 %v9270_v15  ;;  %6360 = vmatpush3.msra.mxu1 %v9264_v62 }
 0x59b   :  { %6318 = vmatprep.subr.mxu0 %v6771_v42  ;;  %6361 = vmatprep.subr.mxu1 %v6771_v42 }
 0x59c   :  { %6319 = vmatpush3.msra.mxu0 %v9273_v16  ;;  %6362 = vmatpush3.msra.mxu1 %v9329_v28 }
 0x59d   :  { %6320 = vmatprep.subr.mxu0 %v6771_v42  ;;  %6363 = vmatprep.subr.mxu1 %v6771_v42 }
 0x59e   :  { %6321 = vmatpush3.msra.mxu0 %v9277_v54  ;;  %6364 = vmatpush3.msra.mxu1 %v9343_v44 }
 0x59f   :  { %6322 = vmatprep.subr.mxu0 %v6771_v42  ;;  %6365 = vmatprep.subr.mxu1 %v6771_v42 }
 0x5a0   :  { %6323 = vmatpush3.msra.mxu0 %v9280_v36  ;;  %6366 = vmatpush3.msra.mxu1 %v9345_v10 }
 0x5a1   :  { %6324 = vmatprep.subr.mxu0 %v6771_v42  ;;  %6367 = vmatprep.subr.mxu1 %v6771_v42 }
 0x5a2   :  { %6325 = vmatpush3.msra.mxu0 %v9288_v13  ;;  %6368 = vmatpush3.msra.mxu1 %v9347_v60 }
 0x5a3   :  { %6326 = vmatprep.subr.mxu0 %v6771_v42  ;;  %6369 = vmatprep.subr.mxu1 %v6771_v42 }
 0x5a4   :  { %6327 = vmatpush3.msra.mxu0 %v9341_v23  ;;  %6370 = vmatpush3.msra.mxu1 %v9395_v6 }
 0x5a5   :  { %6328 = vmatprep.subr.mxu0 %v6771_v42  ;;  %6371 = vmatprep.subr.mxu1 %v6771_v42 }
 0x5a6   :  { %6329 = vmatpush3.msra.mxu0 %v9353_v3  ;;  %6372 = vmatpush3.msra.mxu1 %v9397_v50 }
 0x5a7   :  { %6330 = vmatprep.subr.mxu0 %v6771_v42  ;;  %6373 = vmatprep.subr.mxu1 %v6771_v42 }
 0x5a8   :  { %6331 = vmatpush3.msra.mxu0 %v9356_v4  ;;  %6374 = vmatpush3.msra.mxu1 %v9399_v17 }
 0x5a9   :  { %6332 = vmatprep.subr.mxu0 %v6771_v42  ;;  %6375 = vmatprep.subr.mxu1 %v6771_v42 }
 0x5aa   :  { %6333 = vmatpush3.msra.mxu0 %v9359_v31  ;;  %6376 = vmatpush3.msra.mxu1 %v9410_v48 }
 0x5ab   :  { %6334 = vmatprep.subr.mxu0 %v6771_v42  ;;  %6377 = vmatprep.subr.mxu1 %v6771_v42 }
 0x5ac   :  { %6335 = vmatpush3.msra.mxu0 %v9417_v29  ;;  %6378 = vmatpush3.msra.mxu1 %v9412_v56 }
 0x5ad   :  { %6336 = vmatprep.subr.mxu0 %v6771_v42  ;;  %6379 = vmatprep.subr.mxu1 %v6771_v42 }
 0x5ae   :  { %6337 = vmatpush3.msra.mxu0 %v9420_v40  ;;  %6380 = vmatpush3.msra.mxu1 %v9414_v37 }
 0x5af   :  { %6338 = vmatprep.subr.mxu0 %v6771_v42  ;;  %6382 = vmatmul.mubr.f32.vlgmr.msra.gmra.mxu1 %v4097_v27 }
 0x5b0   :  { %6419 = vmatprep.subr.mxu1 %v6771_v42  ;;  %6339 = vmatpush3.msra.mxu0 %v9423_v46 }
 0x5b1   :  { %6420 = vmatpush3.msra.mxu1 %v9245_v24  ;;  %6340 = vmatprep.subr.mxu0 %v6771_v42  ;;  %v10238_v24 = vand.u32 4294901760, %v9359_v31 }
 0x5b2   :  { %6421 = vmatprep.subr.mxu1 %v6771_v42  ;;  %6341 = vmatpush3.msra.mxu0 %v9427_v32 }
 0x5b3   :  { %6422 = vmatpush3.msra.mxu1 %v9247_v38  ;;  %6342 = vmatprep.subr.mxu0 %v6771_v42  ;;  %v10239_v38 = vand.u32 4294901760, %v9417_v29 }
 0x5b4   :  { %6423 = vmatprep.subr.mxu1 %v6771_v42  ;;  %6343 = vmatpush3.msra.mxu0 %v9430_v7 }
 0x5b5   :  { %6424 = vmatpush3.msra.mxu1 %v9249_v55  ;;  %6344 = vmatprep.subr.mxu0 %v6771_v42  ;;  %v10240_v55 = vand.u32 4294901760, %v9420_v40 }
 0x5b6   :  { %6425 = vmatprep.subr.mxu1 %v6771_v42  ;;  %6345 = vmatpush3.msra.mxu0 %v9438_v19 }
 0x5b7   :  { %6346 = vmatprep.mubr.msk.f32.mxu0 %vm6772_vm15, %v6771_v42  ;;  %6426 = vmatpush3.msra.mxu1 %v9260_v22  ;;  %v10241_v22 = vand.u32 4294901760, %v9423_v46 }
 0x5b8   :  { %6347 = vmatmul.mubr.f32.vlgmr.msra.gmra.mxu0 %v9480_v21  ;;  %6384 = vmatprep.subr.mxu0 %v6771_v42 }
 0x5b9   :  { %6427 = vmatprep.subr.mxu1 %v6771_v42  ;;  %6385 = vmatpush3.msra.mxu0 %v4108_v18 }
 0x5ba   :  { %6428 = vmatpush3.msra.mxu1 %v9262_v8  ;;  %6386 = vmatprep.subr.mxu0 %v6771_v42  ;;  %v10242_v8 = vand.u32 4294901760, %v9427_v32 }
 0x5bb   :  { %6429 = vmatprep.subr.mxu1 %v6771_v42  ;;  %6387 = vmatpush3.msra.mxu0 %v4115_v12 }
 0x5bc   :  { %6430 = vmatpush3.msra.mxu1 %v9264_v62  ;;  %6388 = vmatprep.subr.mxu0 %v6771_v42  ;;  %v10243_v62 = vand.u32 4294901760, %v9430_v7 }
 0x5bd   :  { %6431 = vmatprep.subr.mxu1 %v6771_v42  ;;  %6389 = vmatpush3.msra.mxu0 %v4122_v25 }
 0x5be   :  { %6432 = vmatpush3.msra.mxu1 %v9329_v28  ;;  %6390 = vmatprep.subr.mxu0 %v6771_v42 }
 0x5bf   :  { %6433 = vmatprep.subr.mxu1 %v6771_v42  ;;  %6391 = vmatpush3.msra.mxu0 %v4129_v35 }
 0x5c0   :  { %6434 = vmatpush3.msra.mxu1 %v9343_v44  ;;  %6392 = vmatprep.subr.mxu0 %v6771_v42 }
 0x5c1   :  { %6435 = vmatprep.subr.mxu1 %v6771_v42  ;;  %6393 = vmatpush3.msra.mxu0 %v4136_v45 }
 0x5c2   :  { %6436 = vmatpush3.msra.mxu1 %v9345_v10  ;;  %6394 = vmatprep.subr.mxu0 %v6771_v42 }
 0x5c3   :  { %6437 = vmatprep.subr.mxu1 %v6771_v42  ;;  %6395 = vmatpush3.msra.mxu0 %v4143_v51 }
 0x5c4   :  { %6438 = vmatpush3.msra.mxu1 %v9347_v60  ;;  %6396 = vmatprep.subr.mxu0 %v6771_v42  ;;  %v10245_v60 = vld [vmem:[#allocation24_spill] sm:$0xff] }
 0x5c5   :  { %6439 = vmatprep.subr.mxu1 %v6771_v42  ;;  %6397 = vmatpush3.msra.mxu0 %v4150_v52  ;;  %v4664_v52 = vsub.s32 1, %v10245_v60  ;;  %v9645_v3 = vsub.s32 0, %v10245_v60 }
 0x5c6   :  { %6440 = vmatpush3.msra.mxu1 %v9395_v6  ;;  %6398 = vmatprep.subr.mxu0 %v6771_v42 }
 0x5c7   :  { %6441 = vmatprep.subr.mxu1 %v6771_v42  ;;  %6399 = vmatpush3.msra.mxu0 %v4157_v26 }
 0x5c8   :  { %6442 = vmatpush3.msra.mxu1 %v9397_v50  ;;  %6400 = vmatprep.subr.mxu0 %v6771_v42 }
 0x5c9   :  { %6443 = vmatprep.subr.mxu1 %v6771_v42  ;;  %6401 = vmatpush3.msra.mxu0 %v4164_v53 }
 0x5ca   :  { %6444 = vmatpush3.msra.mxu1 %v9399_v17  ;;  %6402 = vmatprep.subr.mxu0 %v6771_v42 }
 0x5cb   :  { %6445 = vmatprep.subr.mxu1 %v6771_v42  ;;  %6403 = vmatpush3.msra.mxu0 %v10238_v24 }
 0x5cc   :  { %6446 = vmatpush3.msra.mxu1 %v9410_v48  ;;  %6404 = vmatprep.subr.mxu0 %v6771_v42 }
 0x5cd   :  { %6447 = vmatprep.subr.mxu1 %v6771_v42  ;;  %6405 = vmatpush3.msra.mxu0 %v10239_v38 }
 0x5ce   :  { %6448 = vmatpush3.msra.mxu1 %v9412_v56  ;;  %6406 = vmatprep.subr.mxu0 %v6771_v42 }
 0x5cf   :  { %6449 = vmatprep.subr.mxu1 %v6771_v42  ;;  %6407 = vmatpush3.msra.mxu0 %v10240_v55 }
 0x5d0   :  { %6450 = vmatpush3.msra.mxu1 %v9414_v37  ;;  %6451 = vmatprep.mubr.msk.f32.mxu1 %vm6772_vm15, %v6771_v42  ;;  %v4669_v37 = vld [vmem:[%s9696_s13] sm:$0xff]  ;;  %s6774_s13 = smov [#allocation17]  }
 0x5d1   :  { %6408 = vmatprep.subr.mxu0 %v6771_v42  ;;  %6452 = vmatmul.mubr.f32.vlgmr.msra.gmra.mxu1 %v9476_v9 }
 0x5d2   :  { %6409 = vmatpush3.msra.mxu0 %v10241_v22  ;;  %6416 = vmatprep.mubr.msk.f32.mxu0 %vm6772_vm15, %v6771_v42 }
 0x5d3   :  { %6410 = vmatprep.subr.mxu0 %v6771_v42  ;;  %6459 = vmatprep.subr.mxu1 %v6771_v42 }
 0x5d4   :  { %6411 = vmatpush3.msra.mxu0 %v10242_v8  ;;  %6461 = vmatprep.mubr.msk.f32.mxu1 %vm6772_vm15, %v6771_v42 }
 0x5d5   :  { %6412 = vmatprep.subr.mxu0 %v6771_v42 }
 0x5d6   :  { %6413 = vmatpush3.msra.mxu0 %v10243_v62 }
 0x5d7   :  { %6414 = vmatprep.subr.mxu0 %v6771_v42 }
 0x5d8   :  { %6415 = vmatpush3.msra.mxu0 %v10244_v39 }
 0x5d9   :  { %6417 = vmatmul.mubr.f32.vlgmr.msra.gmra.mxu0 %v9476_v9  ;;  %6454 = vmatprep.subr.mxu0 %v6771_v42  ;;  %v4694_v9 = vld [vmem:[%s9697_s14] sm:$0xff]  ;;  %s5214_s14 = sshll.u32 %s6774_s13, 4  ;;  %s5215_s14 = int_to_ptr.vmem [resolvable:$true] %s5214_s14 }
 0x5da   :  { %6456 = vmatprep.mubr.msk.f32.mxu0 %vm6772_vm15, %v6771_v42  ;;  %v4729_v6 = vand.u32 4294901760, %v4694_v9  ;;  %p6717_p4 = scmp.lt.s32.totalorder %s5215_s14, %s5215_s14 }
 0x5dc   :  { %v4806_v50 = vsub.f32 %v4694_v9, %v4729_v6  ;;  %6455 = vmatpush3.msra.mxu0 %v4729_v6  ;;  %v6773_v9 = vmov 1966171168  }
 0x5dd   :  { %6464 = vmatprep.subr.mxu0 %v6771_v42 }
 0x5de   :  { %v4807_v17 = vand.u32 4294901760, %v4806_v50 }
 0x5e0   :  { %v4808_v48 = vsub.f32 %v4806_v50, %v4807_v17 }
 0x5e2   :  { %v4809_v56 = vand.u32 4294901760, %v4808_v48 }
 0x5e4   :  { %6460 = vmatpush3.msra.mxu1 %v4809_v56 }
 0x5e5   :  { %6469 = vmatprep.subr.mxu1 %v6771_v42 }
 0x64f   :  { %v4252_v15 = vpop.f32.mrf.mxu1 }
 0x651   :  { %v6313_v16 = vpop.f32.mrf.mxu1 }
 0x657   :  { %v4101_v54 = vpop.f32.mrf.mxu0 }
 0x658   :  { %v4253_v45 = vadd.f32 %v4252_v15, %v4101_v54 }
 0x659   :  { %v6278_v36 = vpop.f32.mrf.mxu0 }
 0x66f   :  { %v4445_v18 = vpop.f32.mrf.mxu1 }
 0x671   :  { %v6383_v12 = vpop.f32.mrf.mxu1 }
 0x678   :  { %v4356_v25 = vpop.f32.mrf.mxu0 }
 0x679   :  { %v4357_v28 = vadd.f32 %v4356_v25, %v4253_v45 }
 0x67a   :  { %v6348_v13 = vpop.f32.mrf.mxu0 }
 0x67b   :  { %v4446_v23 = vadd.f32 %v4445_v18, %v4357_v28 }
 0x691   :  { %v4651_v35 = vpop.f32.mrf.mxu1 }
 0x693   :  { %v6453_v51 = vpop.f32.mrf.mxu1 }
 0x699   :  { %v4564_v44 = vpop.f32.mrf.mxu0 }
 0x69a   :  { %v4565_v10 = vadd.f32 %v4564_v44, %v4446_v23 }
 0x69b   :  { %v6418_v4 = vpop.f32.mrf.mxu0 }
 0x69c   :  { %v4652_v31 = vadd.f32 %v4651_v35, %v4565_v10 }
 0x69e   :  { %v4665_v26 = vrot.slane %v4652_v31, %v4664_v52  ;;  %v4658_v53 = vrot.slane %v4652_v31, %v9645_v3 }
 0x6a0   :  { %4667 = vbcast.lane.b32.xlu1 %v4665_v26, 256  ;;  %4660 = vbcast.lane.b32.xlu0 %v4658_v53, 256 }
 0x712   :  { %v4668_v29 = vpop.permute.xlu1 %4667  ;;  %v4661_v40 = vpop.permute.xlu0 %4660 }
 0x713   :  { %v4671_v46 = vadd.f32 %v4669_v37, %v4668_v29  ;;  %v4670_v32 = vadd.f32 %v4669_v37, %v4661_v40 }
 0x715   :  { %v4679_v7 = vsel %vm319_vm6, %v4671_v46, -inf  ;;  %v4672_v0 = vsel %vm319_vm6, %v4670_v32, -inf }
 0x716   :  { %v4680_v19 = vrot.slane %v4679_v7, 4  ;;  %v4673_v14 = vrot.slane %v4672_v0, 4 }
 0x718   :  { %v4681_v58 = vmax.f32 %v4679_v7, %v4680_v19  ;;  %v4674_v43 = vmax.f32 %v4672_v0, %v4673_v14  ;;  %v6528_v0 = vld [vmem:[#allocation2] sm:$0xff]  ;;  %v6529_v14 = vld [vmem:[#allocation2 + $0x8] sm:$0xff] }
 0x71a   :  { %v4682_v59 = vrot.slane %v4681_v58, 2  ;;  %v4675_v49 = vrot.slane %v4674_v43, 2 }
 0x71c   :  { %v4683_v47 = vmax.f32 %v4681_v58, %v4682_v59  ;;  %v4676_v30 = vmax.f32 %v4674_v43, %v4675_v49  ;;  %v6530_v43 = vld [vmem:[#allocation2 + $0x10] sm:$0xff]  ;;  %v6531_v59 = vld [vmem:[#allocation2 + $0x18] sm:$0xff] }
 0x71e   :  { %v4684_v63 = vrot.slane %v4683_v47, 1  ;;  %v4677_v34 = vrot.slane %v4676_v30, 1 }
 0x720   :  { %v4685_v33 = vmax.f32 %v4683_v47, %v4684_v63  ;;  %v4678_v2 = vmax.f32 %v4676_v30, %v4677_v34 }
 0x722   :  { %v4689_v11 = vsel %vm4688_vm0, %v4685_v33, %v4678_v2 }
 0x723   :  { %v4691_v5 = vsub.f32 %v4652_v31, %v4689_v11 }
 0x725   :  { %v4692_v20 = vmul.f32 1.442695, %v4691_v5 }
 0x727   :  { %6524 = vpow2.f32 %v4692_v20 }
 0x734   :  { %v6525_v1 = vpop.eup %6524 }
 0x735   :  { %v4696_v41 = vsel %vm319_vm6, %v6525_v1, 0 }
 0x736   :  { %v4764_v21 = vand.u32 4294901760, %v4696_v41 }
 0x738   :  { %v4765_v27 = vsub.f32 %v4696_v41, %v4764_v21  ;;  %6462 = vmatmul.mubr.f32.vlgmr.msra.gmra.mxu1 %v4764_v21 }
 0x739   :  { %6470 = vmatpush3.msra.mxu1 %v4729_v6  ;;  %6471 = vmatprep.mubr.msk.f32.mxu1 %vm6772_vm15, %v6771_v42 }
 0x73a   :  { %v4766_v57 = vand.u32 4294901760, %v4765_v27  ;;  %6479 = vmatprep.subr.mxu1 %v6771_v42 }
 0x73c   :  { %6472 = vmatmul.mubr.f32.vlgmr.msra.gmra.mxu1 %v4766_v57  ;;  %v4767_v61 = vsub.f32 %v4765_v27, %v4766_v57 }
 0x73d   :  { %6480 = vmatpush3.msra.mxu1 %v4729_v6  ;;  %6481 = vmatprep.mubr.msk.f32.mxu1 %vm6772_vm15, %v6771_v42  ;;  %v5170_v6 = vunpack.c.l.s4 %v6773_v9 }
 0x73e   :  { %v4768_v24 = vand.u32 4294901760, %v4767_v61 }
 0x740   :  { %6457 = vmatmul.mubr.f32.vlgmr.msra.gmra.mxu0 %v4768_v24  ;;  %6482 = vmatmul.mubr.f32.vlgmr.msra.gmra.mxu1 %v4764_v21 }
 0x741   :  { %6465 = vmatpush3.msra.mxu0 %v4806_v50  ;;  %6466 = vmatprep.mubr.msk.f32.mxu0 %vm6772_vm15, %v6771_v42  ;;  %v5171_v50 = vunpack.c.0.s8 %v5170_v6 }
 0x742   :  { %6474 = vmatprep.subr.mxu0 %v6771_v42 }
 0x744   :  { %6467 = vmatmul.mubr.f32.vlgmr.msra.gmra.mxu0 %v4765_v27 }
 0x745   :  { %6475 = vmatpush3.msra.mxu0 %v4807_v17  ;;  %6476 = vmatprep.mubr.msk.f32.mxu0 %vm6772_vm15, %v6771_v42  ;;  %v5174_v17 = vsub.s32 %v5171_v50, %v10245_v60 }
 0x748   :  { %6477 = vmatmul.mubr.f32.vlgmr.msra.gmra.mxu0 %v4764_v21 }
 0x7f8   :  { %v4846_v38 = vpop.f32.mrf.mxu1 }
 0x7fa   :  { %v6463_v55 = vpop.f32.mrf.mxu1 }
 0x7fc   :  { %v4994_v22 = vpop.f32.mrf.mxu1 }
 0x7fe   :  { %v6473_v8 = vpop.f32.mrf.mxu1 }
 0x800   :  { %v4770_v62 = vpop.f32.mrf.mxu0  ;;  %v5140_v39 = vpop.f32.mrf.mxu1 }
 0x801   :  { %v4847_v54 = vadd.f32 %v4846_v38, %v4770_v62 }
 0x802   :  { %v6458_v15 = vpop.f32.mrf.mxu0  ;;  %v6483_v16 = vpop.f32.mrf.mxu1 }
 0x804   :  { %v4920_v36 = vpop.f32.mrf.mxu0 }
 0x805   :  { %v4921_v18 = vadd.f32 %v4920_v36, %v4847_v54 }
 0x806   :  { %v6468_v12 = vpop.f32.mrf.mxu0 }
 0x807   :  { %v4995_v25 = vadd.f32 %v4994_v22, %v4921_v18 }
 0x808   :  { %v5068_v13 = vpop.f32.mrf.mxu0 }
 0x809   :  { %v5069_v35 = vadd.f32 %v5068_v13, %v4995_v25 }
 0x80a   :  { %v6478_v45 = vpop.f32.mrf.mxu0 }
 0x80b   :  { %v5141_v51 = vadd.f32 %v5140_v39, %v5069_v35 }
 0x80d   :  { %6526 = vrcp.f32 %v5141_v51 }
 0x81a   :  { %v6527_v42 = vpop.eup %6526 }
 0x81b   :  { %v5145_v28 = vmul.f32 %v6527_v42, %v6525_v1 }
 0x81d   :  { %v5146_v23 = vmul.f32 2.0, %v5145_v28 }
 0x81f   :  { %v5147_v44 = vsel %vm319_vm6, %v5146_v23, 0.0 }
 0x820   :  { %5149 = vrot.lane.b32.xlu0 %v5147_v44, %s6750_s28 }
 0x892   :  { %v5150_v10 = vpop.permute.xlu0 %5149 }
 0x893   :  { %v5152_v52 = vadd.f32 %v5150_v10, %v5147_v44 }
 0x895   :  { %5154 = vrot.lane.b32.xlu1 %v5152_v52, %s6759_s22 }
 0x907   :  { %v5155_v4 = vpop.permute.xlu1 %5154 }
 0x908   :  { %v5157_v31 = vadd.f32 %v5155_v4, %v5152_v52 }
 0x90a   :  { %5159 = vrot.lane.b32.xlu0 %v5157_v31, %s6763_s21 }
 0x97c   :  { %v5160_v26 = vpop.permute.xlu0 %5159 }
 0x97d   :  { %v5162_v53 = vadd.f32 %v5160_v26, %v5157_v31 }
 0x97f   :  { %5164 = vrot.lane.b32.xlu1 %v5162_v53, %s6752_s18  ;;  %s6712_s18 = scalar_lea.vmem %s5215_s14, 512 }
 0x980   :  { %p6713_p3 = scmp.ne.s32.totalorder %s5215_s14, %s6712_s18  ;;  %p6718_p5 = scmp.lt.s32.totalorder %s6712_s18, %s6712_s18 }
 0x982   :  { %p6719_p6 = por %p6718_p5, %p6717_p4 }
 0x984   :  { %p6720_p7 = pnand %p6719_p6, %p6713_p3 }
 0x9f1   :  { %v5165_v48 = vpop.permute.xlu1 %5164 }
 0x9f2   :  { %v5167_v56 = vadd.f32 %v5165_v48, %v5162_v53 }
 0x9f4   :  { %v5175_v37 = vrot.slane %v5167_v56, %v5174_v17 }
 0x9f6   :  { %v5176_v29 = vcombine.high %v5175_v37, %v5175_v37  ;;  %v5183_v40 = vrot.slane %v5175_v37, %v5174_v17 }
 0x9f8   :  { %v5190_v46 = vrot.slane %v5176_v29, %v5174_v17  ;;  %v5194_v32 = vrot.slane %v5183_v40, %v9645_v3 }
 0x9fa   :  { %v5198_v7 = vrot.slane %v5190_v46, %v9645_v3  ;;  %v5201_v19 = vmul.f32 %v6528_v0, %v5194_v32  ;;  %v5202_v58 = vmul.f32 %v6529_v14, %v5194_v32 }
 0x9fc   :  { %5205 = vst [vmem:[#allocation17] sm:$0xff] %v5201_v19  ;;  %5206 = vst [vmem:[#allocation17 + $0x8] sm:$0xff] %v5202_v58  ;;  %v5203_v60 = vmul.f32 %v6530_v43, %v5198_v7  ;;  %v5204_v49 = vmul.f32 %v6531_v59, %v5198_v7 }
 0x9fe   :  { %5207 = vst [vmem:[#allocation17 + $0x10] sm:$0xff] %v5203_v60  ;;  %5208 = vst [vmem:[#allocation17 + $0x18] sm:$0xff] %v5204_v49 }
 0x9ff   :  { %6723 = shalt.err (!%p6720_p7)
}
 0xa00   :  { %5220 = dma.vmem_to_hbm [thread:$0]  %s5215_s14, 512, %s9698_s15, [#allocation4], %s6749_s7, %s6749_s7, %s6750_s28  }
 0xa01   :  { %6742 = dma.done.wait [#allocation4], 512  }
 0xa02   :  { %6743 = vsyncadd [#allocation4], 4294966784 }
 0xa03   :  { %5224 = vsyncpa [#allocation3], 1 }
 0xa04   :  { %5225 = vsyncpa [#allocation6], 1 }
 0xa05   :  { %5226 = vsyncpa [#allocation9], 1 }
 0xa06   :  { %5227 = vsyncpa [#allocation12], 1 }
 0xa07   :  { %5228 = vsyncpa [#allocation15], 1 }
 0xa08   :  { %5229 = vsyncpa [#allocation4], 1 }

</bundles_post_ra>
